<compile_context>
chip_gen: v7x
topology: tpu7x:2x2x1
jax: 0.10.0
libtpu: 0.0.40
codegen_flags: <defaults>
</compile_context>

<pallas_src>
import math

import jax
import jax.numpy as jnp
from jax.experimental import pallas as pl
from jax.experimental.pallas import tpu as pltpu

C1, C2 = 64, 128


# ----------------------------------------------------------------------------
# In-kernel helper: 3x3 "SAME" conv + bias + ReLU on a zero-padded VMEM scratch.
#   pin_ref: (hc+2, wc+2, cin) f32 scratch, zero border, valid data in interior
#   w_ref:   (3, 3*cin, cout)  bf16  (kh major; kw folded into the K dim)
#   b_ref:   (1, cout)         f32
#   returns: (hc, wc, cout)    f32
# ----------------------------------------------------------------------------
def _conv3x3_bias_relu(pin_ref, w_ref, b_ref, hc, wc, cin, cout):
    # Bias-initialized accumulator (saves a separate full-tile f32 add).
    acc = jnp.broadcast_to(b_ref[...], (hc * wc, cout))
    for kh in range(3):
        rows = pin_ref[kh:kh + hc, :, :]                       # (hc, wc+2, cin)
        # Pack the 3 kw-shifted windows along channels -> one K=3*cin matmul.
        xcat = jnp.concatenate(
            [rows[:, kw:kw + wc, :] for kw in range(3)], axis=-1)
        xcat = xcat.reshape(hc * wc, 3 * cin).astype(jnp.bfloat16)
        acc = acc + jnp.dot(xcat, w_ref[kh],
                            preferred_element_type=jnp.float32)
    return jnp.maximum(acc, 0.0).reshape(hc, wc, cout)


def _zero_halo(ref):
    """Zero only the 1-pixel border of a (hp, wp, c) padded scratch."""
    hp, wp, c = ref.shape
    z_row = jnp.zeros((1, wp, c), ref.dtype)
    ref[0:1, :, :] = z_row
    ref[hp - 1:hp, :, :] = z_row
    z_col = jnp.zeros((hp, 1, c), ref.dtype)
    ref[:, 0:1, :] = z_col
    ref[:, wp - 1:wp, :] = z_col


# ----------------------------------------------------------------------------
# Fused kernel: one image per grid step, all intermediates in VMEM scratch.
# ----------------------------------------------------------------------------
def vgg_fused_kernel(x_ref, w1_ref, b1_ref, w2_ref, b2_ref, w3_ref, b3_ref,
                     w4_ref, b4_ref, o_ref, p1, rowp, p2, p3):
    H2, W2 = o_ref.shape[1], o_ref.shape[2]
    H, W = 2 * H2, 2 * W2

    # Halo-only zeroing (interiors fully overwritten below).  Border is only
    # ~4*(H+W)*C elements per scratch -> negligible vst traffic, and doing it
    # every step keeps the kernel correct under megacore grid sharding.
    _zero_halo(p1)
    _zero_halo(p2)
    _zero_halo(p3)

    # conv1_1 + ReLU: input arrives as a lane-dense (H*W, 27) bf16 im2col
    # built in the wrapper -> a single well-shaped MXU dot, no RGB scratch.
    acc = jnp.broadcast_to(b1_ref[...], (H * W, C1))
    acc = acc + jnp.dot(x_ref[0], w1_ref[...],
                        preferred_element_type=jnp.float32)
    p1[1:H + 1, 1:W + 1, :] = jnp.maximum(acc, 0.0).reshape(H, W, C1)

    # conv1_2 + ReLU with fused 2x2/2 maxpool.
    y = _conv3x3_bias_relu(p1, w2_ref, b2_ref, H, W, C1, C1)   # (H, W, 64)
    y = y.reshape(H2, 2, W, C1)                                # free leading split
    rowp[...] = jnp.maximum(y[:, 0], y[:, 1])                  # pool row pairs
    pooled = jnp.maximum(rowp[:, pl.ds(0, W2, stride=2), :],   # pool col pairs
                         rowp[:, pl.ds(1, W2, stride=2), :])   # (H2, W2, 64)
    p2[1:H2 + 1, 1:W2 + 1, :] = pooled

    # conv2_1 + ReLU.
    p3[1:H2 + 1, 1:W2 + 1, :] = _conv3x3_bias_relu(p2, w3_ref, b3_ref,
                                                   H2, W2, C1, C2)

    # conv2_2 + ReLU -> output block.
    o_ref[0] = _conv3x3_bias_relu(p3, w4_ref, b4_ref,
                                  H2, W2, C2, C2).astype(o_ref.dtype)


# ----------------------------------------------------------------------------
# Wrapper: PyTorch-facing NCHW in/out; NHWC + HWIO internally.
# ----------------------------------------------------------------------------
def vgg_features(x_nchw, params):
    x = jnp.transpose(x_nchw, (0, 2, 3, 1))                    # NCHW -> NHWC
    N, H, W, cin = x.shape
    assert cin == 3 and H % 2 == 0 and W % 2 == 0
    H2, W2 = H // 2, W // 2

    # conv1_1 im2col in the wrapper: (N, H*W, 27) bf16, K ordered (kh, kw, ci)
    # to match w1.reshape(27, 64).
    xp = jnp.pad(x, ((0, 0), (1, 1), (1, 1), (0, 0)))
    x_cols = jnp.concatenate(
        [xp[:, kh:kh + H, kw:kw + W, :] for kh in range(3) for kw in range(3)],
        axis=-1).reshape(N, H * W, 27).astype(jnp.bfloat16)

    def prep_w(w):   # (3,3,ci,co) -> (3, 3*ci, co) bf16 (kw folded into K)
        ci, co = w.shape[2], w.shape[3]
        return w.reshape(3, 3 * ci, co).astype(jnp.bfloat16)

    def prep_b(b):
        return b.reshape(1, -1).astype(jnp.float32)

    w1 = params["w1"].reshape(27, C1).astype(jnp.bfloat16)
    w2, w3, w4 = (prep_w(params[f"w{i}"]) for i in range(2, 5))
    b1, b2, b3, b4 = (prep_b(params[f"b{i}"]) for i in range(1, 5))

    def full(shape):
        return pl.BlockSpec(shape, lambda n, _s=shape: (0,) * len(_s))

    # Explicit VMEM budget: scratches + double-buffered in/out blocks +
    # weights + largest im2col / accumulator temporaries, with headroom.
    f32b, bf16b = 4, 2
    scratch_bytes = ((H + 2) * (W + 2) * C1 + H2 * W * C1
                     + (H2 + 2) * (W2 + 2) * C1
                     + (H2 + 2) * (W2 + 2) * C2) * f32b
    io_bytes = 2 * (H * W * 27 * bf16b) + 2 * (H2 * W2 * C2 * f32b)
    weight_bytes = 2 * (27 * C1 + 9 * C1 * C1 + 9 * C1 * C2 + 9 * C2 * C2) * bf16b
    temp_bytes = H * W * (3 * C2 * bf16b + C2 * f32b)
    vmem_limit = max(
        32 << 20,
        min(100 << 20,
            int(1.5 * (scratch_bytes + io_bytes + weight_bytes + temp_bytes))
            + (4 << 20)))

    out = pl.pallas_call(
        vgg_fused_kernel,
        out_shape=jax.ShapeDtypeStruct((N, H2, W2, C2), jnp.float32),
        grid=(N,),
        in_specs=[
            pl.BlockSpec((1, H * W, 27), lambda n: (n, 0, 0)),
            full((27, C1)), full((1, C1)),
            full((3, 3 * C1, C1)), full((1, C1)),
            full((3, 3 * C1, C2)), full((1, C2)),
            full((3, 3 * C2, C2)), full((1, C2)),
        ],
        out_specs=pl.BlockSpec((1, H2, W2, C2), lambda n: (n, 0, 0, 0)),
        scratch_shapes=[
            pltpu.VMEM((H + 2, W + 2, C1), jnp.float32),       # padded conv1_1
            pltpu.VMEM((H2, W, C1), jnp.float32),              # row-pooled
            pltpu.VMEM((H2 + 2, W2 + 2, C1), jnp.float32),     # padded pooled
            pltpu.VMEM((H2 + 2, W2 + 2, C2), jnp.float32),     # padded conv2_1
        ],
        compiler_params=pltpu.CompilerParams(
            dimension_semantics=("parallel",),
            vmem_limit_bytes=vmem_limit,
        ),
    )(x_cols, w1, b1, w2, b2, w3, b3, w4, b4)
    return jnp.transpose(out, (0, 3, 1, 2))                    # NHWC -> NCHW


# ----------------------------------------------------------------------------
# Pure-JAX reference (f32) for correctness check.
# ----------------------------------------------------------------------------
def _ref_conv_relu(x_nchw, w_hwio, b):
    y = jax.lax.conv_general_dilated(
        x_nchw, w_hwio, window_strides=(1, 1), padding="SAME",
        dimension_numbers=("NCHW", "HWIO", "NCHW"))
    return jnp.maximum(y + b[None, :, None, None], 0.0)


def _ref_maxpool(x_nchw):
    return jax.lax.reduce_window(
        x_nchw, -jnp.inf, jax.lax.max,
        window_dimensions=(1, 1, 2, 2), window_strides=(1, 1, 2, 2),
        padding="VALID")


def vgg_features_ref(x_nchw, p):
    x = _ref_conv_relu(x_nchw, p["w1"], p["b1"])
    x = _ref_conv_relu(x, p["w2"], p["b2"])
    x = _ref_maxpool(x)
    x = _ref_conv_relu(x, p["w3"], p["b3"])
    x = _ref_conv_relu(x, p["w4"], p["b4"])
    return x


def init_params(key):
    chans = [(3, 64), (64, 64), (64, 128), (128, 128)]
    params = {}
    for i, (cin, cout) in enumerate(chans, start=1):
        key, kw, kb = jax.random.split(key, 3)
        params[f"w{i}"] = (
            jax.random.normal(kw, (3, 3, cin, cout), jnp.float32) * 0.05)
        params[f"b{i}"] = (
            jax.random.normal(kb, (cout,), jnp.float32) * 0.05)
    return params


if __name__ == "__main__":
    key = jax.random.PRNGKey(0)
    kx, kp = jax.random.split(key)
    x = jax.random.normal(kx, (2, 3, 16, 16), jnp.float32)     # NCHW, like PyTorch
    params = init_params(kp)

    out = jax.jit(vgg_features)(x, params)
    out = jax.block_until_ready(out)

    ref = vgg_features_ref(x, params)
    assert out.shape == (2, 128, 8, 8), out.shape
    # bf16 MXU operands (f32 accumulation) -> relaxed tolerance vs f32 reference.
    max_err = float(jnp.max(jnp.abs(out - ref)))
    assert max_err < 5e-2, max_err

    print("KERNEL_OK")
</pallas_src>

<mosaic_0001>
module attributes {stable_mosaic.version = 11 : i64} {
  func.func @vgg_fused_kernel(%arg0: i32, %arg1: memref<1x256x27xbf16, #tpu.memory_space<vmem>>, %arg2: memref<27x64xbf16, #tpu.memory_space<vmem>>, %arg3: memref<1x64xf32, #tpu.memory_space<vmem>>, %arg4: memref<3x192x64xbf16, #tpu.memory_space<vmem>>, %arg5: memref<1x64xf32, #tpu.memory_space<vmem>>, %arg6: memref<3x192x128xbf16, #tpu.memory_space<vmem>>, %arg7: memref<1x128xf32, #tpu.memory_space<vmem>>, %arg8: memref<3x384x128xbf16, #tpu.memory_space<vmem>>, %arg9: memref<1x128xf32, #tpu.memory_space<vmem>>, %arg10: memref<1x8x8x128xf32, #tpu.memory_space<vmem>>, %arg11: memref<18x18x64xf32, #tpu.memory_space<vmem>>, %arg12: memref<8x16x64xf32, #tpu.memory_space<vmem>>, %arg13: memref<10x10x64xf32, #tpu.memory_space<vmem>>, %arg14: memref<10x10x128xf32, #tpu.memory_space<vmem>>) attributes {dimension_semantics = [#tpu.dimension_semantics<parallel>], iteration_bounds = array<i64: 2>, scalar_prefetch = 0 : i64, scratch_operands = 4 : i64, tpu.core_type = #tpu.core_type<tc>, window_params = [{transform_indices = @transform_0, window_bounds = array<i64: 1, 256, 27>}, {pipeline_mode = #tpu.pipeline_mode<synchronous>, transform_indices = @transform_1, window_bounds = array<i64: 27, 64>}, {pipeline_mode = #tpu.pipeline_mode<synchronous>, transform_indices = @transform_2, window_bounds = array<i64: 1, 64>}, {pipeline_mode = #tpu.pipeline_mode<synchronous>, transform_indices = @transform_3, window_bounds = array<i64: 3, 192, 64>}, {pipeline_mode = #tpu.pipeline_mode<synchronous>, transform_indices = @transform_4, window_bounds = array<i64: 1, 64>}, {pipeline_mode = #tpu.pipeline_mode<synchronous>, transform_indices = @transform_5, window_bounds = array<i64: 3, 192, 128>}, {pipeline_mode = #tpu.pipeline_mode<synchronous>, transform_indices = @transform_6, window_bounds = array<i64: 1, 128>}, {pipeline_mode = #tpu.pipeline_mode<synchronous>, transform_indices = @transform_7, window_bounds = array<i64: 3, 384, 128>}, {pipeline_mode = #tpu.pipeline_mode<synchronous>, transform_indices = @transform_8, window_bounds = array<i64: 1, 128>}, {transform_indices = @transform_9, window_bounds = array<i64: 1, 8, 8, 128>}]} {
    %cst = arith.constant 0.000000e+00 : f32
    %0 = vector.broadcast %cst : f32 to vector<1x18x64xf32>
    %c0 = arith.constant 0 : index
    %c0_0 = arith.constant 0 : index
    %c0_1 = arith.constant 0 : index
    %1 = vector.load %arg11[%c0, %c0_0, %c0_1] : memref<18x18x64xf32, #tpu.memory_space<vmem>>, vector<1x18x64xf32>
    tpu.vector_store %arg11[%c0, %c0_0, %c0_1], %0 {strides = array<i32>} : memref<18x18x64xf32, #tpu.memory_space<vmem>>, vector<1x18x64xf32>,
    %c17 = arith.constant 17 : index
    %c0_2 = arith.constant 0 : index
    %c0_3 = arith.constant 0 : index
    %2 = vector.load %arg11[%c17, %c0_2, %c0_3] : memref<18x18x64xf32, #tpu.memory_space<vmem>>, vector<1x18x64xf32>
    tpu.vector_store %arg11[%c17, %c0_2, %c0_3], %0 {strides = array<i32>} : memref<18x18x64xf32, #tpu.memory_space<vmem>>, vector<1x18x64xf32>,
    %cst_4 = arith.constant 0.000000e+00 : f32
    %3 = vector.broadcast %cst_4 : f32 to vector<18x1x64xf32>
    %c0_5 = arith.constant 0 : index
    %c0_6 = arith.constant 0 : index
    %c0_7 = arith.constant 0 : index
    %4 = vector.load %arg11[%c0_5, %c0_6, %c0_7] : memref<18x18x64xf32, #tpu.memory_space<vmem>>, vector<18x1x64xf32>
    tpu.vector_store %arg11[%c0_5, %c0_6, %c0_7], %3 {strides = array<i32>} : memref<18x18x64xf32, #tpu.memory_space<vmem>>, vector<18x1x64xf32>,
    %c0_8 = arith.constant 0 : index
    %c17_9 = arith.constant 17 : index
    %c0_10 = arith.constant 0 : index
    %5 = vector.load %arg11[%c0_8, %c17_9, %c0_10] : memref<18x18x64xf32, #tpu.memory_space<vmem>>, vector<18x1x64xf32>
    tpu.vector_store %arg11[%c0_8, %c17_9, %c0_10], %3 {strides = array<i32>} : memref<18x18x64xf32, #tpu.memory_space<vmem>>, vector<18x1x64xf32>,
    %cst_11 = arith.constant 0.000000e+00 : f32
    %6 = vector.broadcast %cst_11 : f32 to vector<1x10x64xf32>
    %c0_12 = arith.constant 0 : index
    %c0_13 = arith.constant 0 : index
    %c0_14 = arith.constant 0 : index
    %7 = vector.load %arg13[%c0_12, %c0_13, %c0_14] : memref<10x10x64xf32, #tpu.memory_space<vmem>>, vector<1x10x64xf32>
    tpu.vector_store %arg13[%c0_12, %c0_13, %c0_14], %6 {strides = array<i32>} : memref<10x10x64xf32, #tpu.memory_space<vmem>>, vector<1x10x64xf32>,
    %c9 = arith.constant 9 : index
    %c0_15 = arith.constant 0 : index
    %c0_16 = arith.constant 0 : index
    %8 = vector.load %arg13[%c9, %c0_15, %c0_16] : memref<10x10x64xf32, #tpu.memory_space<vmem>>, vector<1x10x64xf32>
    tpu.vector_store %arg13[%c9, %c0_15, %c0_16], %6 {strides = array<i32>} : memref<10x10x64xf32, #tpu.memory_space<vmem>>, vector<1x10x64xf32>,
    %cst_17 = arith.constant 0.000000e+00 : f32
    %9 = vector.broadcast %cst_17 : f32 to vector<10x1x64xf32>
    %c0_18 = arith.constant 0 : index
    %c0_19 = arith.constant 0 : index
    %c0_20 = arith.constant 0 : index
    %10 = vector.load %arg13[%c0_18, %c0_19, %c0_20] : memref<10x10x64xf32, #tpu.memory_space<vmem>>, vector<10x1x64xf32>
    tpu.vector_store %arg13[%c0_18, %c0_19, %c0_20], %9 {strides = array<i32>} : memref<10x10x64xf32, #tpu.memory_space<vmem>>, vector<10x1x64xf32>,
    %c0_21 = arith.constant 0 : index
    %c9_22 = arith.constant 9 : index
    %c0_23 = arith.constant 0 : index
    %11 = vector.load %arg13[%c0_21, %c9_22, %c0_23] : memref<10x10x64xf32, #tpu.memory_space<vmem>>, vector<10x1x64xf32>
    tpu.vector_store %arg13[%c0_21, %c9_22, %c0_23], %9 {strides = array<i32>} : memref<10x10x64xf32, #tpu.memory_space<vmem>>, vector<10x1x64xf32>,
    %cst_24 = arith.constant 0.000000e+00 : f32
    %12 = vector.broadcast %cst_24 : f32 to vector<1x10x128xf32>
    %c0_25 = arith.constant 0 : index
    %c0_26 = arith.constant 0 : index
    %c0_27 = arith.constant 0 : index
    %13 = vector.load %arg14[%c0_25, %c0_26, %c0_27] : memref<10x10x128xf32, #tpu.memory_space<vmem>>, vector<1x10x128xf32>
    tpu.vector_store %arg14[%c0_25, %c0_26, %c0_27], %12 {strides = array<i32>} : memref<10x10x128xf32, #tpu.memory_space<vmem>>, vector<1x10x128xf32>,
    %c9_28 = arith.constant 9 : index
    %c0_29 = arith.constant 0 : index
    %c0_30 = arith.constant 0 : index
    %14 = vector.load %arg14[%c9_28, %c0_29, %c0_30] : memref<10x10x128xf32, #tpu.memory_space<vmem>>, vector<1x10x128xf32>
    tpu.vector_store %arg14[%c9_28, %c0_29, %c0_30], %12 {strides = array<i32>} : memref<10x10x128xf32, #tpu.memory_space<vmem>>, vector<1x10x128xf32>,
    %cst_31 = arith.constant 0.000000e+00 : f32
    %15 = vector.broadcast %cst_31 : f32 to vector<10x1x128xf32>
    %c0_32 = arith.constant 0 : index
    %c0_33 = arith.constant 0 : index
    %c0_34 = arith.constant 0 : index
    %16 = vector.load %arg14[%c0_32, %c0_33, %c0_34] : memref<10x10x128xf32, #tpu.memory_space<vmem>>, vector<10x1x128xf32>
    tpu.vector_store %arg14[%c0_32, %c0_33, %c0_34], %15 {strides = array<i32>} : memref<10x10x128xf32, #tpu.memory_space<vmem>>, vector<10x1x128xf32>,
    %c0_35 = arith.constant 0 : index
    %c9_36 = arith.constant 9 : index
    %c0_37 = arith.constant 0 : index
    %17 = vector.load %arg14[%c0_35, %c9_36, %c0_37] : memref<10x10x128xf32, #tpu.memory_space<vmem>>, vector<10x1x128xf32>
    tpu.vector_store %arg14[%c0_35, %c9_36, %c0_37], %15 {strides = array<i32>} : memref<10x10x128xf32, #tpu.memory_space<vmem>>, vector<10x1x128xf32>,
    %c0_38 = arith.constant 0 : index
    %c0_39 = arith.constant 0 : index
    %18 = vector.load %arg3[%c0_38, %c0_39] : memref<1x64xf32, #tpu.memory_space<vmem>>, vector<1x64xf32>
    %19 = vector.shape_cast %18 : vector<1x64xf32> to vector<1x64xf32>
    %20 = vector.broadcast %19 : vector<1x64xf32> to vector<256x64xf32>
    %c0_40 = arith.constant 0 : index
    %c0_41 = arith.constant 0 : index
    %c0_42 = arith.constant 0 : index
    %21 = vector.load %arg1[%c0_40, %c0_41, %c0_42] : memref<1x256x27xbf16, #tpu.memory_space<vmem>>, vector<1x256x27xbf16>
    %22 = vector.shape_cast %21 : vector<1x256x27xbf16> to vector<256x27xbf16>
    %c0_43 = arith.constant 0 : index
    %c0_44 = arith.constant 0 : index
    %23 = vector.load %arg2[%c0_43, %c0_44] : memref<27x64xbf16, #tpu.memory_space<vmem>>, vector<27x64xbf16>
    %cst_45 = arith.constant dense<0.000000e+00> : vector<256x64xf32>
    %24 = tpu.matmul %22, %23, %cst_45 {dimension_numbers = #tpu.dot_dimension_numbers<[1], [0], [0], [1], [0, 0, 1, 1], [], []>} : vector<256x27xbf16>, vector<27x64xbf16>, vector<256x64xf32> -> vector<256x64xf32>
    %25 = arith.addf %20, %24 : vector<256x64xf32>
    %cst_46 = arith.constant 0.000000e+00 : f32
    %26 = vector.broadcast %cst_46 : f32 to vector<256x64xf32>
    %27 = arith.maximumf %25, %26 : vector<256x64xf32>
    %28 = vector.shape_cast %27 : vector<256x64xf32> to vector<16x16x64xf32>
    %c1 = arith.constant 1 : index
    %c1_47 = arith.constant 1 : index
    %c0_48 = arith.constant 0 : index
    %29 = vector.load %arg11[%c1, %c1_47, %c0_48] : memref<18x18x64xf32, #tpu.memory_space<vmem>>, vector<16x16x64xf32>
    tpu.vector_store %arg11[%c1, %c1_47, %c0_48], %28 {strides = array<i32>} : memref<18x18x64xf32, #tpu.memory_space<vmem>>, vector<16x16x64xf32>,
    %c0_49 = arith.constant 0 : index
    %c0_50 = arith.constant 0 : index
    %30 = vector.load %arg5[%c0_49, %c0_50] : memref<1x64xf32, #tpu.memory_space<vmem>>, vector<1x64xf32>
    %31 = vector.shape_cast %30 : vector<1x64xf32> to vector<1x64xf32>
    %32 = vector.broadcast %31 : vector<1x64xf32> to vector<256x64xf32>
    %c0_51 = arith.constant 0 : index
    %c0_52 = arith.constant 0 : index
    %c0_53 = arith.constant 0 : index
    %33 = vector.load %arg11[%c0_51, %c0_52, %c0_53] : memref<18x18x64xf32, #tpu.memory_space<vmem>>, vector<16x18x64xf32>
    %34 = vector.extract_strided_slice %33 {offsets = [0, 0, 0], sizes = [16, 16, 64], strides = [1, 1, 1]} : vector<16x18x64xf32> to vector<16x16x64xf32>
    %35 = vector.extract_strided_slice %33 {offsets = [0, 1, 0], sizes = [16, 16, 64], strides = [1, 1, 1]} : vector<16x18x64xf32> to vector<16x16x64xf32>
    %36 = vector.extract_strided_slice %33 {offsets = [0, 2, 0], sizes = [16, 16, 64], strides = [1, 1, 1]} : vector<16x18x64xf32> to vector<16x16x64xf32>
    %37 = tpu.concatenate %34, %35, %36 in 2 : vector<16x16x64xf32>, vector<16x16x64xf32>, vector<16x16x64xf32> -> vector<16x16x192xf32>
    %38 = vector.shape_cast %37 : vector<16x16x192xf32> to vector<256x192xf32>
    %39 = arith.truncf %38 : vector<256x192xf32> to vector<256x192xbf16>
    %c0_54 = arith.constant 0 : index
    %c0_55 = arith.constant 0 : index
    %c0_56 = arith.constant 0 : index
    %40 = vector.load %arg4[%c0_54, %c0_55, %c0_56] : memref<3x192x64xbf16, #tpu.memory_space<vmem>>, vector<1x192x64xbf16>
    %41 = vector.shape_cast %40 : vector<1x192x64xbf16> to vector<192x64xbf16>
    %cst_57 = arith.constant dense<0.000000e+00> : vector<256x64xf32>
    %42 = tpu.matmul %39, %41, %cst_57 {dimension_numbers = #tpu.dot_dimension_numbers<[1], [0], [0], [1], [0, 0, 1, 1], [], []>} : vector<256x192xbf16>, vector<192x64xbf16>, vector<256x64xf32> -> vector<256x64xf32>
    %43 = arith.addf %32, %42 : vector<256x64xf32>
    %c1_58 = arith.constant 1 : index
    %c0_59 = arith.constant 0 : index
    %c0_60 = arith.constant 0 : index
    %44 = vector.load %arg11[%c1_58, %c0_59, %c0_60] : memref<18x18x64xf32, #tpu.memory_space<vmem>>, vector<16x18x64xf32>
    %45 = vector.extract_strided_slice %44 {offsets = [0, 0, 0], sizes = [16, 16, 64], strides = [1, 1, 1]} : vector<16x18x64xf32> to vector<16x16x64xf32>
    %46 = vector.extract_strided_slice %44 {offsets = [0, 1, 0], sizes = [16, 16, 64], strides = [1, 1, 1]} : vector<16x18x64xf32> to vector<16x16x64xf32>
    %47 = vector.extract_strided_slice %44 {offsets = [0, 2, 0], sizes = [16, 16, 64], strides = [1, 1, 1]} : vector<16x18x64xf32> to vector<16x16x64xf32>
    %48 = tpu.concatenate %45, %46, %47 in 2 : vector<16x16x64xf32>, vector<16x16x64xf32>, vector<16x16x64xf32> -> vector<16x16x192xf32>
    %49 = vector.shape_cast %48 : vector<16x16x192xf32> to vector<256x192xf32>
    %50 = arith.truncf %49 : vector<256x192xf32> to vector<256x192xbf16>
    %c1_61 = arith.constant 1 : index
    %c0_62 = arith.constant 0 : index
    %c0_63 = arith.constant 0 : index
    %51 = vector.load %arg4[%c1_61, %c0_62, %c0_63] : memref<3x192x64xbf16, #tpu.memory_space<vmem>>, vector<1x192x64xbf16>
    %52 = vector.shape_cast %51 : vector<1x192x64xbf16> to vector<192x64xbf16>
    %cst_64 = arith.constant dense<0.000000e+00> : vector<256x64xf32>
    %53 = tpu.matmul %50, %52, %cst_64 {dimension_numbers = #tpu.dot_dimension_numbers<[1], [0], [0], [1], [0, 0, 1, 1], [], []>} : vector<256x192xbf16>, vector<192x64xbf16>, vector<256x64xf32> -> vector<256x64xf32>
    %54 = arith.addf %43, %53 : vector<256x64xf32>
    %c2 = arith.constant 2 : index
    %c0_65 = arith.constant 0 : index
    %c0_66 = arith.constant 0 : index
    %55 = vector.load %arg11[%c2, %c0_65, %c0_66] : memref<18x18x64xf32, #tpu.memory_space<vmem>>, vector<16x18x64xf32>
    %56 = vector.extract_strided_slice %55 {offsets = [0, 0, 0], sizes = [16, 16, 64], strides = [1, 1, 1]} : vector<16x18x64xf32> to vector<16x16x64xf32>
    %57 = vector.extract_strided_slice %55 {offsets = [0, 1, 0], sizes = [16, 16, 64], strides = [1, 1, 1]} : vector<16x18x64xf32> to vector<16x16x64xf32>
    %58 = vector.extract_strided_slice %55 {offsets = [0, 2, 0], sizes = [16, 16, 64], strides = [1, 1, 1]} : vector<16x18x64xf32> to vector<16x16x64xf32>
    %59 = tpu.concatenate %56, %57, %58 in 2 : vector<16x16x64xf32>, vector<16x16x64xf32>, vector<16x16x64xf32> -> vector<16x16x192xf32>
    %60 = vector.shape_cast %59 : vector<16x16x192xf32> to vector<256x192xf32>
    %61 = arith.truncf %60 : vector<256x192xf32> to vector<256x192xbf16>
    %c2_67 = arith.constant 2 : index
    %c0_68 = arith.constant 0 : index
    %c0_69 = arith.constant 0 : index
    %62 = vector.load %arg4[%c2_67, %c0_68, %c0_69] : memref<3x192x64xbf16, #tpu.memory_space<vmem>>, vector<1x192x64xbf16>
    %63 = vector.shape_cast %62 : vector<1x192x64xbf16> to vector<192x64xbf16>
    %cst_70 = arith.constant dense<0.000000e+00> : vector<256x64xf32>
    %64 = tpu.matmul %61, %63, %cst_70 {dimension_numbers = #tpu.dot_dimension_numbers<[1], [0], [0], [1], [0, 0, 1, 1], [], []>} : vector<256x192xbf16>, vector<192x64xbf16>, vector<256x64xf32> -> vector<256x64xf32>
    %65 = arith.addf %54, %64 : vector<256x64xf32>
    %cst_71 = arith.constant 0.000000e+00 : f32
    %66 = vector.broadcast %cst_71 : f32 to vector<256x64xf32>
    %67 = arith.maximumf %65, %66 : vector<256x64xf32>
    %68 = vector.shape_cast %67 : vector<256x64xf32> to vector<16x16x64xf32>
    %69 = vector.shape_cast %68 : vector<16x16x64xf32> to vector<8x2x16x64xf32>
    %70 = vector.extract_strided_slice %69 {offsets = [0, 0, 0, 0], sizes = [8, 1, 16, 64], strides = [1, 1, 1, 1]} : vector<8x2x16x64xf32> to vector<8x1x16x64xf32>
    %71 = vector.shape_cast %70 : vector<8x1x16x64xf32> to vector<8x16x64xf32>
    %72 = vector.extract_strided_slice %69 {offsets = [0, 1, 0, 0], sizes = [8, 1, 16, 64], strides = [1, 1, 1, 1]} : vector<8x2x16x64xf32> to vector<8x1x16x64xf32>
    %73 = vector.shape_cast %72 : vector<8x1x16x64xf32> to vector<8x16x64xf32>
    %74 = arith.maximumf %71, %73 : vector<8x16x64xf32>
    %c0_72 = arith.constant 0 : index
    %c0_73 = arith.constant 0 : index
    %c0_74 = arith.constant 0 : index
    %75 = vector.load %arg12[%c0_72, %c0_73, %c0_74] : memref<8x16x64xf32, #tpu.memory_space<vmem>>, vector<8x16x64xf32>
    tpu.vector_store %arg12[%c0_72, %c0_73, %c0_74], %74 {strides = array<i32>} : memref<8x16x64xf32, #tpu.memory_space<vmem>>, vector<8x16x64xf32>,
    %c0_75 = arith.constant 0 : index
    %c0_76 = arith.constant 0 : index
    %c0_77 = arith.constant 0 : index
    %76 = tpu.strided_load %arg12[%c0_75, %c0_76, %c0_77] {strides = array<i32: 1, 2, 1>} : memref<8x16x64xf32, #tpu.memory_space<vmem>>, vector<8x8x64xf32>
    %c0_78 = arith.constant 0 : index
    %c1_79 = arith.constant 1 : index
    %c0_80 = arith.constant 0 : index
    %77 = tpu.strided_load %arg12[%c0_78, %c1_79, %c0_80] {strides = array<i32: 1, 2, 1>} : memref<8x16x64xf32, #tpu.memory_space<vmem>>, vector<8x8x64xf32>
    %78 = arith.maximumf %76, %77 : vector<8x8x64xf32>
    %c1_81 = arith.constant 1 : index
    %c1_82 = arith.constant 1 : index
    %c0_83 = arith.constant 0 : index
    %79 = vector.load %arg13[%c1_81, %c1_82, %c0_83] : memref<10x10x64xf32, #tpu.memory_space<vmem>>, vector<8x8x64xf32>
    tpu.vector_store %arg13[%c1_81, %c1_82, %c0_83], %78 {strides = array<i32>} : memref<10x10x64xf32, #tpu.memory_space<vmem>>, vector<8x8x64xf32>,
    %c0_84 = arith.constant 0 : index
    %c0_85 = arith.constant 0 : index
    %80 = vector.load %arg7[%c0_84, %c0_85] : memref<1x128xf32, #tpu.memory_space<vmem>>, vector<1x128xf32>
    %81 = vector.shape_cast %80 : vector<1x128xf32> to vector<1x128xf32>
    %82 = vector.broadcast %81 : vector<1x128xf32> to vector<64x128xf32>
    %c0_86 = arith.constant 0 : index
    %c0_87 = arith.constant 0 : index
    %c0_88 = arith.constant 0 : index
    %83 = vector.load %arg13[%c0_86, %c0_87, %c0_88] : memref<10x10x64xf32, #tpu.memory_space<vmem>>, vector<8x10x64xf32>
    %84 = vector.extract_strided_slice %83 {offsets = [0, 0, 0], sizes = [8, 8, 64], strides = [1, 1, 1]} : vector<8x10x64xf32> to vector<8x8x64xf32>
    %85 = vector.extract_strided_slice %83 {offsets = [0, 1, 0], sizes = [8, 8, 64], strides = [1, 1, 1]} : vector<8x10x64xf32> to vector<8x8x64xf32>
    %86 = vector.extract_strided_slice %83 {offsets = [0, 2, 0], sizes = [8, 8, 64], strides = [1, 1, 1]} : vector<8x10x64xf32> to vector<8x8x64xf32>
    %87 = tpu.concatenate %84, %85, %86 in 2 : vector<8x8x64xf32>, vector<8x8x64xf32>, vector<8x8x64xf32> -> vector<8x8x192xf32>
    %88 = vector.shape_cast %87 : vector<8x8x192xf32> to vector<64x192xf32>
    %89 = arith.truncf %88 : vector<64x192xf32> to vector<64x192xbf16>
    %c0_89 = arith.constant 0 : index
    %c0_90 = arith.constant 0 : index
    %c0_91 = arith.constant 0 : index
    %90 = vector.load %arg6[%c0_89, %c0_90, %c0_91] : memref<3x192x128xbf16, #tpu.memory_space<vmem>>, vector<1x192x128xbf16>
    %91 = vector.shape_cast %90 : vector<1x192x128xbf16> to vector<192x128xbf16>
    %cst_92 = arith.constant dense<0.000000e+00> : vector<64x128xf32>
    %92 = tpu.matmul %89, %91, %cst_92 {dimension_numbers = #tpu.dot_dimension_numbers<[1], [0], [0], [1], [0, 0, 1, 1], [], []>} : vector<64x192xbf16>, vector<192x128xbf16>, vector<64x128xf32> -> vector<64x128xf32>
    %93 = arith.addf %82, %92 : vector<64x128xf32>
    %c1_93 = arith.constant 1 : index
    %c0_94 = arith.constant 0 : index
    %c0_95 = arith.constant 0 : index
    %94 = vector.load %arg13[%c1_93, %c0_94, %c0_95] : memref<10x10x64xf32, #tpu.memory_space<vmem>>, vector<8x10x64xf32>
    %95 = vector.extract_strided_slice %94 {offsets = [0, 0, 0], sizes = [8, 8, 64], strides = [1, 1, 1]} : vector<8x10x64xf32> to vector<8x8x64xf32>
    %96 = vector.extract_strided_slice %94 {offsets = [0, 1, 0], sizes = [8, 8, 64], strides = [1, 1, 1]} : vector<8x10x64xf32> to vector<8x8x64xf32>
    %97 = vector.extract_strided_slice %94 {offsets = [0, 2, 0], sizes = [8, 8, 64], strides = [1, 1, 1]} : vector<8x10x64xf32> to vector<8x8x64xf32>
    %98 = tpu.concatenate %95, %96, %97 in 2 : vector<8x8x64xf32>, vector<8x8x64xf32>, vector<8x8x64xf32> -> vector<8x8x192xf32>
    %99 = vector.shape_cast %98 : vector<8x8x192xf32> to vector<64x192xf32>
    %100 = arith.truncf %99 : vector<64x192xf32> to vector<64x192xbf16>
    %c1_96 = arith.constant 1 : index
    %c0_97 = arith.constant 0 : index
    %c0_98 = arith.constant 0 : index
    %101 = vector.load %arg6[%c1_96, %c0_97, %c0_98] : memref<3x192x128xbf16, #tpu.memory_space<vmem>>, vector<1x192x128xbf16>
    %102 = vector.shape_cast %101 : vector<1x192x128xbf16> to vector<192x128xbf16>
    %cst_99 = arith.constant dense<0.000000e+00> : vector<64x128xf32>
    %103 = tpu.matmul %100, %102, %cst_99 {dimension_numbers = #tpu.dot_dimension_numbers<[1], [0], [0], [1], [0, 0, 1, 1], [], []>} : vector<64x192xbf16>, vector<192x128xbf16>, vector<64x128xf32> -> vector<64x128xf32>
    %104 = arith.addf %93, %103 : vector<64x128xf32>
    %c2_100 = arith.constant 2 : index
    %c0_101 = arith.constant 0 : index
    %c0_102 = arith.constant 0 : index
    %105 = vector.load %arg13[%c2_100, %c0_101, %c0_102] : memref<10x10x64xf32, #tpu.memory_space<vmem>>, vector<8x10x64xf32>
    %106 = vector.extract_strided_slice %105 {offsets = [0, 0, 0], sizes = [8, 8, 64], strides = [1, 1, 1]} : vector<8x10x64xf32> to vector<8x8x64xf32>
    %107 = vector.extract_strided_slice %105 {offsets = [0, 1, 0], sizes = [8, 8, 64], strides = [1, 1, 1]} : vector<8x10x64xf32> to vector<8x8x64xf32>
    %108 = vector.extract_strided_slice %105 {offsets = [0, 2, 0], sizes = [8, 8, 64], strides = [1, 1, 1]} : vector<8x10x64xf32> to vector<8x8x64xf32>
    %109 = tpu.concatenate %106, %107, %108 in 2 : vector<8x8x64xf32>, vector<8x8x64xf32>, vector<8x8x64xf32> -> vector<8x8x192xf32>
    %110 = vector.shape_cast %109 : vector<8x8x192xf32> to vector<64x192xf32>
    %111 = arith.truncf %110 : vector<64x192xf32> to vector<64x192xbf16>
    %c2_103 = arith.constant 2 : index
    %c0_104 = arith.constant 0 : index
    %c0_105 = arith.constant 0 : index
    %112 = vector.load %arg6[%c2_103, %c0_104, %c0_105] : memref<3x192x128xbf16, #tpu.memory_space<vmem>>, vector<1x192x128xbf16>
    %113 = vector.shape_cast %112 : vector<1x192x128xbf16> to vector<192x128xbf16>
    %cst_106 = arith.constant dense<0.000000e+00> : vector<64x128xf32>
    %114 = tpu.matmul %111, %113, %cst_106 {dimension_numbers = #tpu.dot_dimension_numbers<[1], [0], [0], [1], [0, 0, 1, 1], [], []>} : vector<64x192xbf16>, vector<192x128xbf16>, vector<64x128xf32> -> vector<64x128xf32>
    %115 = arith.addf %104, %114 : vector<64x128xf32>
    %cst_107 = arith.constant 0.000000e+00 : f32
    %116 = vector.broadcast %cst_107 : f32 to vector<64x128xf32>
    %117 = arith.maximumf %115, %116 : vector<64x128xf32>
    %118 = vector.shape_cast %117 : vector<64x128xf32> to vector<8x8x128xf32>
    %c1_108 = arith.constant 1 : index
    %c1_109 = arith.constant 1 : index
    %c0_110 = arith.constant 0 : index
    %119 = vector.load %arg14[%c1_108, %c1_109, %c0_110] : memref<10x10x128xf32, #tpu.memory_space<vmem>>, vector<8x8x128xf32>
    tpu.vector_store %arg14[%c1_108, %c1_109, %c0_110], %118 {strides = array<i32>} : memref<10x10x128xf32, #tpu.memory_space<vmem>>, vector<8x8x128xf32>,
    %c0_111 = arith.constant 0 : index
    %c0_112 = arith.constant 0 : index
    %120 = vector.load %arg9[%c0_111, %c0_112] : memref<1x128xf32, #tpu.memory_space<vmem>>, vector<1x128xf32>
    %121 = vector.shape_cast %120 : vector<1x128xf32> to vector<1x128xf32>
    %122 = vector.broadcast %121 : vector<1x128xf32> to vector<64x128xf32>
    %c0_113 = arith.constant 0 : index
    %c0_114 = arith.constant 0 : index
    %c0_115 = arith.constant 0 : index
    %123 = vector.load %arg14[%c0_113, %c0_114, %c0_115] : memref<10x10x128xf32, #tpu.memory_space<vmem>>, vector<8x10x128xf32>
    %124 = vector.extract_strided_slice %123 {offsets = [0, 0, 0], sizes = [8, 8, 128], strides = [1, 1, 1]} : vector<8x10x128xf32> to vector<8x8x128xf32>
    %125 = vector.extract_strided_slice %123 {offsets = [0, 1, 0], sizes = [8, 8, 128], strides = [1, 1, 1]} : vector<8x10x128xf32> to vector<8x8x128xf32>
    %126 = vector.extract_strided_slice %123 {offsets = [0, 2, 0], sizes = [8, 8, 128], strides = [1, 1, 1]} : vector<8x10x128xf32> to vector<8x8x128xf32>
    %127 = tpu.concatenate %124, %125, %126 in 2 : vector<8x8x128xf32>, vector<8x8x128xf32>, vector<8x8x128xf32> -> vector<8x8x384xf32>
    %128 = vector.shape_cast %127 : vector<8x8x384xf32> to vector<64x384xf32>
    %129 = arith.truncf %128 : vector<64x384xf32> to vector<64x384xbf16>
    %c0_116 = arith.constant 0 : index
    %c0_117 = arith.constant 0 : index
    %c0_118 = arith.constant 0 : index
    %130 = vector.load %arg8[%c0_116, %c0_117, %c0_118] : memref<3x384x128xbf16, #tpu.memory_space<vmem>>, vector<1x384x128xbf16>
    %131 = vector.shape_cast %130 : vector<1x384x128xbf16> to vector<384x128xbf16>
    %cst_119 = arith.constant dense<0.000000e+00> : vector<64x128xf32>
    %132 = tpu.matmul %129, %131, %cst_119 {dimension_numbers = #tpu.dot_dimension_numbers<[1], [0], [0], [1], [0, 0, 1, 1], [], []>} : vector<64x384xbf16>, vector<384x128xbf16>, vector<64x128xf32> -> vector<64x128xf32>
    %133 = arith.addf %122, %132 : vector<64x128xf32>
    %c1_120 = arith.constant 1 : index
    %c0_121 = arith.constant 0 : index
    %c0_122 = arith.constant 0 : index
    %134 = vector.load %arg14[%c1_120, %c0_121, %c0_122] : memref<10x10x128xf32, #tpu.memory_space<vmem>>, vector<8x10x128xf32>
    %135 = vector.extract_strided_slice %134 {offsets = [0, 0, 0], sizes = [8, 8, 128], strides = [1, 1, 1]} : vector<8x10x128xf32> to vector<8x8x128xf32>
    %136 = vector.extract_strided_slice %134 {offsets = [0, 1, 0], sizes = [8, 8, 128], strides = [1, 1, 1]} : vector<8x10x128xf32> to vector<8x8x128xf32>
    %137 = vector.extract_strided_slice %134 {offsets = [0, 2, 0], sizes = [8, 8, 128], strides = [1, 1, 1]} : vector<8x10x128xf32> to vector<8x8x128xf32>
    %138 = tpu.concatenate %135, %136, %137 in 2 : vector<8x8x128xf32>, vector<8x8x128xf32>, vector<8x8x128xf32> -> vector<8x8x384xf32>
    %139 = vector.shape_cast %138 : vector<8x8x384xf32> to vector<64x384xf32>
    %140 = arith.truncf %139 : vector<64x384xf32> to vector<64x384xbf16>
    %c1_123 = arith.constant 1 : index
    %c0_124 = arith.constant 0 : index
    %c0_125 = arith.constant 0 : index
    %141 = vector.load %arg8[%c1_123, %c0_124, %c0_125] : memref<3x384x128xbf16, #tpu.memory_space<vmem>>, vector<1x384x128xbf16>
    %142 = vector.shape_cast %141 : vector<1x384x128xbf16> to vector<384x128xbf16>
    %cst_126 = arith.constant dense<0.000000e+00> : vector<64x128xf32>
    %143 = tpu.matmul %140, %142, %cst_126 {dimension_numbers = #tpu.dot_dimension_numbers<[1], [0], [0], [1], [0, 0, 1, 1], [], []>} : vector<64x384xbf16>, vector<384x128xbf16>, vector<64x128xf32> -> vector<64x128xf32>
    %144 = arith.addf %133, %143 : vector<64x128xf32>
    %c2_127 = arith.constant 2 : index
    %c0_128 = arith.constant 0 : index
    %c0_129 = arith.constant 0 : index
    %145 = vector.load %arg14[%c2_127, %c0_128, %c0_129] : memref<10x10x128xf32, #tpu.memory_space<vmem>>, vector<8x10x128xf32>
    %146 = vector.extract_strided_slice %145 {offsets = [0, 0, 0], sizes = [8, 8, 128], strides = [1, 1, 1]} : vector<8x10x128xf32> to vector<8x8x128xf32>
    %147 = vector.extract_strided_slice %145 {offsets = [0, 1, 0], sizes = [8, 8, 128], strides = [1, 1, 1]} : vector<8x10x128xf32> to vector<8x8x128xf32>
    %148 = vector.extract_strided_slice %145 {offsets = [0, 2, 0], sizes = [8, 8, 128], strides = [1, 1, 1]} : vector<8x10x128xf32> to vector<8x8x128xf32>
    %149 = tpu.concatenate %146, %147, %148 in 2 : vector<8x8x128xf32>, vector<8x8x128xf32>, vector<8x8x128xf32> -> vector<8x8x384xf32>
    %150 = vector.shape_cast %149 : vector<8x8x384xf32> to vector<64x384xf32>
    %151 = arith.truncf %150 : vector<64x384xf32> to vector<64x384xbf16>
    %c2_130 = arith.constant 2 : index
    %c0_131 = arith.constant 0 : index
    %c0_132 = arith.constant 0 : index
    %152 = vector.load %arg8[%c2_130, %c0_131, %c0_132] : memref<3x384x128xbf16, #tpu.memory_space<vmem>>, vector<1x384x128xbf16>
    %153 = vector.shape_cast %152 : vector<1x384x128xbf16> to vector<384x128xbf16>
    %cst_133 = arith.constant dense<0.000000e+00> : vector<64x128xf32>
    %154 = tpu.matmul %151, %153, %cst_133 {dimension_numbers = #tpu.dot_dimension_numbers<[1], [0], [0], [1], [0, 0, 1, 1], [], []>} : vector<64x384xbf16>, vector<384x128xbf16>, vector<64x128xf32> -> vector<64x128xf32>
    %155 = arith.addf %144, %154 : vector<64x128xf32>
    %cst_134 = arith.constant 0.000000e+00 : f32
    %156 = vector.broadcast %cst_134 : f32 to vector<64x128xf32>
    %157 = arith.maximumf %155, %156 : vector<64x128xf32>
    %158 = vector.shape_cast %157 : vector<64x128xf32> to vector<8x8x128xf32>
    %c0_135 = arith.constant 0 : index
    %c0_136 = arith.constant 0 : index
    %c0_137 = arith.constant 0 : index
    %c0_138 = arith.constant 0 : index
    %159 = vector.load %arg10[%c0_135, %c0_136, %c0_137, %c0_138] : memref<1x8x8x128xf32, #tpu.memory_space<vmem>>, vector<1x8x8x128xf32>
    %160 = vector.shape_cast %159 : vector<1x8x8x128xf32> to vector<8x8x128xf32>
    %161 = vector.shape_cast %158 : vector<8x8x128xf32> to vector<1x8x8x128xf32>
    tpu.vector_store %arg10[%c0_135, %c0_136, %c0_137, %c0_138], %161 {strides = array<i32>} : memref<1x8x8x128xf32, #tpu.memory_space<vmem>>, vector<1x8x8x128xf32>,
    return
  }
  func.func @transform_0(%arg0: i32) -> (i32, i32, i32) {
    %c0_i32 = arith.constant 0 : i32
    %c0_i32_0 = arith.constant 0 : i32
    %c0_i32_1 = arith.constant 0 : i32
    return %arg0, %c0_i32, %c0_i32_0 : i32, i32, i32
  }
  func.func @transform_1(%arg0: i32) -> (i32, i32) {
    %c0_i32 = arith.constant 0 : i32
    %c0_i32_0 = arith.constant 0 : i32
    %c0_i32_1 = arith.constant 0 : i32
    return %c0_i32, %c0_i32_0 : i32, i32
  }
  func.func @transform_2(%arg0: i32) -> (i32, i32) {
    %c0_i32 = arith.constant 0 : i32
    %c0_i32_0 = arith.constant 0 : i32
    %c0_i32_1 = arith.constant 0 : i32
    return %c0_i32, %c0_i32_0 : i32, i32
  }
  func.func @transform_3(%arg0: i32) -> (i32, i32, i32) {
    %c0_i32 = arith.constant 0 : i32
    %c0_i32_0 = arith.constant 0 : i32
    %c0_i32_1 = arith.constant 0 : i32
    %c0_i32_2 = arith.constant 0 : i32
    return %c0_i32, %c0_i32_0, %c0_i32_1 : i32, i32, i32
  }
  func.func @transform_4(%arg0: i32) -> (i32, i32) {
    %c0_i32 = arith.constant 0 : i32
    %c0_i32_0 = arith.constant 0 : i32
    %c0_i32_1 = arith.constant 0 : i32
    return %c0_i32, %c0_i32_0 : i32, i32
  }
  func.func @transform_5(%arg0: i32) -> (i32, i32, i32) {
    %c0_i32 = arith.constant 0 : i32
    %c0_i32_0 = arith.constant 0 : i32
    %c0_i32_1 = arith.constant 0 : i32
    %c0_i32_2 = arith.constant 0 : i32
    return %c0_i32, %c0_i32_0, %c0_i32_1 : i32, i32, i32
  }
  func.func @transform_6(%arg0: i32) -> (i32, i32) {
    %c0_i32 = arith.constant 0 : i32
    %c0_i32_0 = arith.constant 0 : i32
    %c0_i32_1 = arith.constant 0 : i32
    return %c0_i32, %c0_i32_0 : i32, i32
  }
  func.func @transform_7(%arg0: i32) -> (i32, i32, i32) {
    %c0_i32 = arith.constant 0 : i32
    %c0_i32_0 = arith.constant 0 : i32
    %c0_i32_1 = arith.constant 0 : i32
    %c0_i32_2 = arith.constant 0 : i32
    return %c0_i32, %c0_i32_0, %c0_i32_1 : i32, i32, i32
  }
  func.func @transform_8(%arg0: i32) -> (i32, i32) {
    %c0_i32 = arith.constant 0 : i32
    %c0_i32_0 = arith.constant 0 : i32
    %c0_i32_1 = arith.constant 0 : i32
    return %c0_i32, %c0_i32_0 : i32, i32
  }
  func.func @transform_9(%arg0: i32) -> (i32, i32, i32, i32) {
    %c0_i32 = arith.constant 0 : i32
    %c0_i32_0 = arith.constant 0 : i32
    %c0_i32_1 = arith.constant 0 : i32
    %c0_i32_2 = arith.constant 0 : i32
    return %arg0, %c0_i32, %c0_i32_0, %c0_i32_1 : i32, i32, i32, i32
  }
}

</mosaic_0001>

<bundles_post_ra>
// kernel: vgg_features.1
= control target key start
LH: loop header
LB: loop body
LE: loop exit
PB: predicated region body
PF: predicated region fallthrough
CT: control target
= control target key end

     0   :  { %14 = vsyncpa [#allocation7], 0  ;;  %s10303_s0 = inlined_call_operand.vmem [shape: bf16[2,256,27], index: 0, kind: input, shape index: {}]   ;;  %s10304_s1 = inlined_call_operand.vmem [shape: bf16[27,64], index: 1, kind: input, shape index: {}]   ;;  %s10305_s2 = inlined_call_operand.vmem [shape: f32[1,64], index: 2, kind: input, shape index: {}]   ;;  %s10306_s3 = inlined_call_operand.vmem [shape: bf16[3,192,64], index: 3, kind: input, shape index: {}]   ;;  %s10307_s4 = inlined_call_operand.vmem [shape: f32[1,64], index: 4, kind: input, shape index: {}]   ;;  %s10308_s5 = inlined_call_operand.vmem [shape: bf16[3,192,128], index: 5, kind: input, shape index: {}]   ;;  %s10309_s6 = inlined_call_operand.vmem [shape: f32[1,128], index: 6, kind: input, shape index: {}]   ;;  %s10310_s7 = inlined_call_operand.vmem [shape: bf16[3,384,128], index: 7, kind: input, shape index: {}]   ;;  %s10311_s8 = inlined_call_operand.vmem [shape: f32[1,128], index: 8, kind: input, shape index: {}]   ;;  %s10312_s9 = inlined_call_operand.hbm [shape: f32[2,8,8,128], index: 9, kind: output, shape index: {}]  }
   0x1   :  { %16 = vsyncpa [#allocation7 + $0x1], 0  ;;  %s7371_s30 = smov 0   ;;  %s7373_s10 = smov 0  }
   0x2   :  { %s7375_s11 = smov 0   ;;  %s7377_s12 = smov 0  }
   0x3 LB: > { %s7392_s13 = sadd.s32 4294967295, %s7312_s12   ;;  %s5724_s14 = sadd.s32 4294967294, %s7312_s12   ;;  %s7312_s12 = sphi %s7377_s12, %s10623_s12   ;;  %s7308_s11 = sphi %s7375_s11, %s10622_s11   ;;  %s7304_s10 = sphi %s7373_s10, %s10621_s10   ;;  %s7300_s30 = sphi %s7371_s30, %s10620_s30  }
   0x4   : > { %s7396_s15 = sadd.s32 1, %s7312_s12   ;;  %s223_s16 = sadd.s32 1, %s7308_s11 }
   0x5   : > { %s220_s17 = ssub.s32 %s7312_s12, %s7396_s15  ;;  %p233_p0 = scmp.ne.s32.totalorder %s7308_s11, %s7304_s10 }
   0x6   : > { %p221_p1 = scmp.eq.s32.totalorder %s220_s17, 0  ;;  %p234_p2 = scmp.eq.s32.totalorder %s7392_s13, 1 }
   0x7   : > { %p239_p3 = scmp.ne.s32.totalorder %s7304_s10, %s7300_s30  ;;  %p240_p4 = scmp.eq.s32.totalorder %s5724_s14, 1 }
   0x8   : > { %s7407_s18 = scalar_select %p221_p1, %s7308_s11, %s223_s16  }
   0x9   : > { %p7409_p5 = por %p234_p2, %p233_p0  ;;  %p7413_p6 = por %p240_p4, %p239_p3 }
   0xa   : > { %p5727_p7 = scmp.ge.s32.totalorder %s7312_s12, 1  ;;  %p290_p8 = scmp.lt.s32.totalorder %s7312_s12, 3 }
   0xc   : > { %p291_p9 = pnand %p5727_p7, %p290_p8 }
   0xe   : > { %294 = sbr.rel (%p291_p9) target bundleno = 1790 (0x6fe), region = 56 }
  0x15   : > { %v7047_v0 = vld [vmem:[%s10304_s1] sm:$0xff]   ;;  %vm611_vm0 = vcmask 1044480   ;;  %v7425_v1 = vld [vmem:[%s10304_s1 + $0x8] sm:$0x3f]   ;;  %vm612_vm1 = vcmask 1045504   ;;  %p326_p10 = scmp.lt.s32.totalorder %s7392_s13, 1 }
  0x16   : > { %6346 = vmatprep.subr.bf16.mxu0 %v7047_v0  ;;  %vm332_vm2 = vcmask 523264   ;;  %v7314_v2 = vmov 65535   ;;  %vm335_vm3 = vcmask 517120   ;;  %vm341_vm4 = vcmask 516096   ;;  %v7065_v8 = vld [vmem:[%s10306_s3] sm:$0xff]   ;;  %v7066_v9 = vld [vmem:[%s10306_s3 + $0x8] sm:$0xff]  }
  0x17   : > { %6347 = vmatpush3.bf16.msra.mxu0 %v7047_v0  ;;  %v613_v3 = vsel %vm611_vm0, 4294967295, %v7314_v2  ;;  %s7432_s25 = scalar_select %p326_p10, %s7392_s13, 1  ;;  %v7315_v5 = vmov 0.0   ;;  %v10313_v7 = vmov 0   ;;  %vm562_vm5 = vcmask 220160   ;;  %v7067_v13 = vld [vmem:[%s10306_s3 + $0x10] sm:$0xff]  }
  0x18   : > { %v7429_v4 = vsel %vm612_vm1, %v613_v3, 0  ;;  %333 = vst.msk [vmem:[#allocation2] sm:$0xff] %vm332_vm2, %v7315_v5  ;;  %334 = vst.msk [vmem:[#allocation2 + $0x8] sm:$0xff] %vm332_vm2, %v7315_v5  ;;  %1476 = vmatprep.subr.bf16.mxu1 %v10313_v7  ;;  %vm979_vm6 = vcmask 1046528   ;;  %v7068_v24 = vld [vmem:[%s10306_s3 + $0x18] sm:$0xff]   ;;  %v7069_v27 = vld [vmem:[%s10306_s3 + $0x20] sm:$0xff]  }
  0x19   : > { %336 = vst.msk [vmem:[#allocation2 + $0x10] sm:$0x3] %vm335_vm3, %v7315_v5  ;;  %340 = vst.msk [vmem:[#allocation2 + $0x1a8] sm:$0x3] %vm335_vm3, %v7315_v5  ;;  %v616_v6 = vand.u32 %v7425_v1, %v7429_v4  ;;  %s6170_s28 = sshll.u32 %s7432_s25, 7  ;;  %1477 = vmatpush1.bf16.msra.mxu1 %v7065_v8  ;;  %v7070_v30 = vld [vmem:[%s10306_s3 + $0x28] sm:$0xff]  }
  0x1a   : > { %338 = vst.msk [vmem:[#allocation2 + $0x198] sm:$0xff] %vm332_vm2, %v7315_v5  ;;  %339 = vst.msk [vmem:[#allocation2 + $0x1a0] sm:$0xff] %vm332_vm2, %v7315_v5  ;;  %s7600_s16 = scalar_lea.vmem %s10303_s0, %s6170_s28  ;;  %1478 = vmatprep.subr.bf16.mxu1 %v10313_v7  ;;  %s7317_s14 = smov 64   ;;  %v7071_v32 = vld [vmem:[%s10306_s3 + $0x30] sm:$0xff]   ;;  %v7072_v40 = vld [vmem:[%s10306_s3 + $0x38] sm:$0xff]  }
  0x1b   : > { %343 = vst.msk [vmem:[#allocation2 + $0x18] sm:$0x1] %vm341_vm4, %v7315_v5  ;;  %344 = vst.msk [vmem:[#allocation2 + $0x30] sm:$0x1] %vm341_vm4, %v7315_v5  ;;  %6348 = vmatprep.subr.bf16.mxu0 %v616_v6  ;;  %v7049_v10 = vld [vmem:[%s7600_s16] sm:$0xff]   ;;  %v7050_v11 = vld [vmem:[%s7600_s16 + $0x8] sm:$0xff]  }
  0x1c   : > { %345 = vst.msk [vmem:[#allocation2 + $0x48] sm:$0x1] %vm341_vm4, %v7315_v5  ;;  %346 = vst.msk [vmem:[#allocation2 + $0x60] sm:$0x1] %vm341_vm4, %v7315_v5  ;;  %6349 = vmatpush3.bf16.msra.mxu0 %v616_v6  ;;  %6350 = vmatprep.mubr.msk.bf16.mxu0 %vm562_vm5, %v7049_v10  ;;  %v7051_v12 = vld [vmem:[%s7600_s16 + $0x10] sm:$0xff]   ;;  %v7052_v14 = vld [vmem:[%s7600_s16 + $0x18] sm:$0xff]  }
  0x1d   : > { %347 = vst.msk [vmem:[#allocation2 + $0x78] sm:$0x1] %vm341_vm4, %v7315_v5  ;;  %348 = vst.msk [vmem:[#allocation2 + $0x90] sm:$0x1] %vm341_vm4, %v7315_v5  ;;  %3597 = vmatprep.subr.bf16.mxu0 %v10313_v7  ;;  %1479 = vmatpush1.bf16.msra.mxu1 %v7066_v9  ;;  %v7053_v15 = vld [vmem:[%s7600_s16 + $0x20] sm:$0xff]   ;;  %v7054_v16 = vld [vmem:[%s7600_s16 + $0x28] sm:$0xff]  }
  0x1e   : > { %349 = vst.msk [vmem:[#allocation2 + $0xa8] sm:$0x1] %vm341_vm4, %v7315_v5  ;;  %350 = vst.msk [vmem:[#allocation2 + $0xc0] sm:$0x1] %vm341_vm4, %v7315_v5  ;;  %1480 = vmatprep.subr.bf16.mxu1 %v10313_v7  ;;  %v7055_v17 = vld [vmem:[%s7600_s16 + $0x30] sm:$0xff]   ;;  %v7056_v29 = vld [vmem:[%s7600_s16 + $0x38] sm:$0xff]  }
  0x1f   : > { %351 = vst.msk [vmem:[#allocation2 + $0xd8] sm:$0x1] %vm341_vm4, %v7315_v5  ;;  %352 = vst.msk [vmem:[#allocation2 + $0xf0] sm:$0x1] %vm341_vm4, %v7315_v5  ;;  %6351 = vmatmul.mubr.msk.bf16.vlgmr.msra.gmra.mrb[0].mxu0 %vm562_vm5, %v7050_v11  ;;  %v7626_v19 = vld [vmem:[#allocation2 + $0x8] sm:$0xff]  ;;  %v7057_v31 = vld [vmem:[%s7600_s16 + $0x40] sm:$0xff]  }
  0x20   : > { %353 = vst.msk [vmem:[#allocation2 + $0x108] sm:$0x1] %vm341_vm4, %v7315_v5  ;;  %354 = vst.msk [vmem:[#allocation2 + $0x120] sm:$0x1] %vm341_vm4, %v7315_v5  ;;  %6354 = vmatprep.mubr.msk.bf16.mxu0 %vm562_vm5, %v7051_v12  ;;  %v981_v22 = vrot.slane %v7626_v19, 1  ;;  %v7058_v33 = vld [vmem:[%s7600_s16 + $0x48] sm:$0xff]  }
  0x21   : > { %355 = vst.msk [vmem:[#allocation2 + $0x138] sm:$0x1] %vm341_vm4, %v7315_v5  ;;  %356 = vst.msk [vmem:[#allocation2 + $0x150] sm:$0x1] %vm341_vm4, %v7315_v5  ;;  %1481 = vmatpush1.bf16.msra.mxu1 %v7067_v13  ;;  %v7059_v34 = vld [vmem:[%s7600_s16 + $0x50] sm:$0xff]   ;;  %v7060_v35 = vld [vmem:[%s7600_s16 + $0x58] sm:$0xff]  }
  0x22   : > { %357 = vst.msk [vmem:[#allocation2 + $0x168] sm:$0x1] %vm341_vm4, %v7315_v5  ;;  %358 = vst.msk [vmem:[#allocation2 + $0x180] sm:$0x1] %vm341_vm4, %v7315_v5  ;;  %1482 = vmatprep.subr.bf16.mxu1 %v10313_v7  ;;  %v7061_v36 = vld [vmem:[%s7600_s16 + $0x60] sm:$0xff]   ;;  %v7062_v37 = vld [vmem:[%s7600_s16 + $0x68] sm:$0xff]  }
  0x23   : > { %361 = vst.msk [vmem:[#allocation2 + $0x29] sm:$0x1] %vm341_vm4, %v7315_v5  ;;  %362 = vst.msk [vmem:[#allocation2 + $0x41] sm:$0x1] %vm341_vm4, %v7315_v5  ;;  %v7063_v38 = vld [vmem:[%s7600_s16 + $0x70] sm:$0xff]   ;;  %v7064_v39 = vld [vmem:[%s7600_s16 + $0x78] sm:$0xff]  }
  0x24   : > { %363 = vst.msk [vmem:[#allocation2 + $0x59] sm:$0x1] %vm341_vm4, %v7315_v5  ;;  %364 = vst.msk [vmem:[#allocation2 + $0x71] sm:$0x1] %vm341_vm4, %v7315_v5  ;;  %v7073_v41 = vld [vmem:[%s10306_s3 + $0x40] sm:$0xff]   ;;  %v7074_v42 = vld [vmem:[%s10306_s3 + $0x48] sm:$0xff]  }
  0x25   : > { %365 = vst.msk [vmem:[#allocation2 + $0x89] sm:$0x1] %vm341_vm4, %v7315_v5  ;;  %366 = vst.msk [vmem:[#allocation2 + $0xa1] sm:$0x1] %vm341_vm4, %v7315_v5  ;;  %1483 = vmatpush1.bf16.msra.mxu1 %v7068_v24  ;;  %v7075_v43 = vld [vmem:[%s10306_s3 + $0x50] sm:$0xff]   ;;  %v1157_v45 = vrot.slane %v7626_v19, 2 }
  0x26   : > { %367 = vst.msk [vmem:[#allocation2 + $0xb9] sm:$0x1] %vm341_vm4, %v7315_v5  ;;  %368 = vst.msk [vmem:[#allocation2 + $0xd1] sm:$0x1] %vm341_vm4, %v7315_v5  ;;  %1484 = vmatprep.subr.bf16.mxu1 %v10313_v7  ;;  %v7076_v47 = vld [vmem:[%s10306_s3 + $0x58] sm:$0xff]   ;;  %s323_s24 = sand.u32 1, %s7304_s10  }
  0x27   : > { %369 = vst.msk [vmem:[#allocation2 + $0xe9] sm:$0x1] %vm341_vm4, %v7315_v5  ;;  %370 = vst.msk [vmem:[#allocation2 + $0x101] sm:$0x1] %vm341_vm4, %v7315_v5  ;;  %6355 = vmatmul.mubr.msk.bf16.gmra.mrb[4].mxu0 %vm562_vm5, %v7052_v14  ;;  %v7701_v57 = vld [vmem:[%s10305_s2] ss:$0 sm:$0xff] }
  0x28   : > { %371 = vst.msk [vmem:[#allocation2 + $0x119] sm:$0x1] %vm341_vm4, %v7315_v5  ;;  %372 = vst.msk [vmem:[#allocation2 + $0x131] sm:$0x1] %vm341_vm4, %v7315_v5  ;;  %6358 = vmatprep.mubr.msk.bf16.mxu0 %vm562_vm5, %v7053_v15  ;;  %s5728_s25 = sshll.u32 %s323_s24, 6  ;;  %s6171_s26 = sshll.u32 %s7392_s13, 10 }
  0x29   : > { %373 = vst.msk [vmem:[#allocation2 + $0x149] sm:$0x1] %vm341_vm4, %v7315_v5  ;;  %374 = vst.msk [vmem:[#allocation2 + $0x161] sm:$0x1] %vm341_vm4, %v7315_v5  ;;  %1485 = vmatpush1.bf16.msra.mxu1 %v7069_v27  ;;  %s10256_s29 = scalar_lea.hbm %s10312_s9, %s6171_s26  ;;  %s10262_s13 = scalar_lea.sflag [#allocation7], %s323_s24 }
  0x2a   : > { %375 = vst.msk [vmem:[#allocation2 + $0x179] sm:$0x1] %vm341_vm4, %v7315_v5  ;;  %376 = vst.msk [vmem:[#allocation2 + $0x191] sm:$0x1] %vm341_vm4, %v7315_v5  ;;  %1486 = vmatprep.subr.bf16.mxu1 %v10313_v7  ;;  %s7318_s21 = smov [#allocation6]  }
  0x2b   : > { %378 = vst.msk [vmem:[#allocation4] sm:$0xff] %vm332_vm2, %v7315_v5  ;;  %381 = vst.msk [vmem:[#allocation4 + $0x90] sm:$0xff] %vm332_vm2, %v7315_v5  ;;  %s7254_s22 = sshll.u32 %s7318_s21, 4  ;;  %s7255_s22 = int_to_ptr.vmem [resolvable:$false] %s7254_s22 }
  0x2c   : > { %379 = vst.msk [vmem:[#allocation4 + $0x8] sm:$0x3] %vm335_vm3, %v7315_v5  ;;  %382 = vst.msk [vmem:[#allocation4 + $0x98] sm:$0x3] %vm335_vm3, %v7315_v5  ;;  %s7256_s23 = scalar_lea.vmem %s7255_s22, 2048 }
  0x2d   : > { %384 = vst.msk [vmem:[#allocation4 + $0x10] sm:$0x1] %vm341_vm4, %v7315_v5  ;;  %385 = vst.msk [vmem:[#allocation4 + $0x20] sm:$0x1] %vm341_vm4, %v7315_v5  ;;  %1487 = vmatpush1.bf16.msra.mxu1 %v7070_v30 }
  0x2e   : > { %386 = vst.msk [vmem:[#allocation4 + $0x30] sm:$0x1] %vm341_vm4, %v7315_v5  ;;  %387 = vst.msk [vmem:[#allocation4 + $0x40] sm:$0x1] %vm341_vm4, %v7315_v5  ;;  %1488 = vmatprep.subr.bf16.mxu1 %v10313_v7 }
  0x2f   : > { %388 = vst.msk [vmem:[#allocation4 + $0x50] sm:$0x1] %vm341_vm4, %v7315_v5  ;;  %389 = vst.msk [vmem:[#allocation4 + $0x60] sm:$0x1] %vm341_vm4, %v7315_v5  ;;  %6359 = vmatmul.mubr.msk.bf16.gmra.mrb[8].mxu0 %vm562_vm5, %v7054_v16 }
  0x30   : > { %390 = vst.msk [vmem:[#allocation4 + $0x70] sm:$0x1] %vm341_vm4, %v7315_v5  ;;  %391 = vst.msk [vmem:[#allocation4 + $0x80] sm:$0x1] %vm341_vm4, %v7315_v5  ;;  %6362 = vmatprep.mubr.msk.bf16.mxu0 %vm562_vm5, %v7055_v17 }
  0x31   : > { %394 = vst.msk [vmem:[#allocation4 + $0x19] sm:$0x1] %vm341_vm4, %v7315_v5  ;;  %395 = vst.msk [vmem:[#allocation4 + $0x29] sm:$0x1] %vm341_vm4, %v7315_v5  ;;  %1489 = vmatpush1.bf16.msra.mxu1 %v7071_v32 }
  0x32   : > { %396 = vst.msk [vmem:[#allocation4 + $0x39] sm:$0x1] %vm341_vm4, %v7315_v5  ;;  %397 = vst.msk [vmem:[#allocation4 + $0x49] sm:$0x1] %vm341_vm4, %v7315_v5  ;;  %1490 = vmatprep.subr.bf16.mxu1 %v10313_v7 }
  0x33   : > { %398 = vst.msk [vmem:[#allocation4 + $0x59] sm:$0x1] %vm341_vm4, %v7315_v5  ;;  %399 = vst.msk [vmem:[#allocation4 + $0x69] sm:$0x1] %vm341_vm4, %v7315_v5 }
  0x34   : > { %400 = vst.msk [vmem:[#allocation4 + $0x79] sm:$0x1] %vm341_vm4, %v7315_v5  ;;  %401 = vst.msk [vmem:[#allocation4 + $0x89] sm:$0x1] %vm341_vm4, %v7315_v5 }
  0x35   : > { %403 = vst [vmem:[#allocation5] sm:$0xff] %v7315_v5  ;;  %404 = vst [vmem:[#allocation5 + $0x8] sm:$0x3] %v7315_v5  ;;  %1491 = vmatpush1.bf16.msra.mxu1 %v7072_v40 }
  0x36   : > { %406 = vst [vmem:[#allocation5 + $0x90] sm:$0xff] %v7315_v5  ;;  %407 = vst [vmem:[#allocation5 + $0x98] sm:$0x3] %v7315_v5  ;;  %1492 = vmatprep.subr.bf16.mxu1 %v10313_v7 }
  0x37   : > { %409 = vst [vmem:[#allocation5 + $0x10] sm:$0x1] %v7315_v5  ;;  %410 = vst [vmem:[#allocation5 + $0x20] sm:$0x1] %v7315_v5  ;;  %6363 = vmatmul.mubr.msk.bf16.gmra.mrb[12].mxu0 %vm562_vm5, %v7056_v29 }
  0x38   : > { %411 = vst [vmem:[#allocation5 + $0x30] sm:$0x1] %v7315_v5  ;;  %412 = vst [vmem:[#allocation5 + $0x40] sm:$0x1] %v7315_v5  ;;  %6366 = vmatprep.mubr.msk.bf16.mxu0 %vm562_vm5, %v7057_v31 }
  0x39   : > { %413 = vst [vmem:[#allocation5 + $0x50] sm:$0x1] %v7315_v5  ;;  %414 = vst [vmem:[#allocation5 + $0x60] sm:$0x1] %v7315_v5  ;;  %1493 = vmatpush1.bf16.msra.mxu1 %v7073_v41 }
  0x3a   : > { %415 = vst [vmem:[#allocation5 + $0x70] sm:$0x1] %v7315_v5  ;;  %416 = vst [vmem:[#allocation5 + $0x80] sm:$0x1] %v7315_v5  ;;  %1494 = vmatprep.subr.bf16.mxu1 %v10313_v7 }
  0x3b   : > { %419 = vst [vmem:[#allocation5 + $0x19] sm:$0x1] %v7315_v5  ;;  %420 = vst [vmem:[#allocation5 + $0x29] sm:$0x1] %v7315_v5 }
  0x3c   : > { %421 = vst [vmem:[#allocation5 + $0x39] sm:$0x1] %v7315_v5  ;;  %422 = vst [vmem:[#allocation5 + $0x49] sm:$0x1] %v7315_v5 }
  0x3d   : > { %423 = vst [vmem:[#allocation5 + $0x59] sm:$0x1] %v7315_v5  ;;  %424 = vst [vmem:[#allocation5 + $0x69] sm:$0x1] %v7315_v5  ;;  %1495 = vmatpush1.bf16.msra.mxu1 %v7074_v42 }
  0x3e   : > { %425 = vst [vmem:[#allocation5 + $0x79] sm:$0x1] %v7315_v5  ;;  %426 = vst [vmem:[#allocation5 + $0x89] sm:$0x1] %v7315_v5  ;;  %1496 = vmatprep.subr.bf16.mxu1 %v10313_v7 }
  0x3f   : > { %342 = vst.msk [vmem:[#allocation2] sm:$0x1] %vm341_vm4, %v7315_v5  ;;  %360 = vst.msk [vmem:[#allocation2 + $0x11] sm:$0x1] %vm341_vm4, %v7315_v5  ;;  %6367 = vmatmul.mubr.msk.bf16.gmra.mrb[16].mxu0 %vm562_vm5, %v7058_v33 }
  0x40   : > { %359 = vst.msk [vmem:[#allocation2 + $0x198] sm:$0x1] %vm341_vm4, %v7315_v5  ;;  %377 = vst.msk [vmem:[#allocation2 + $0x1a9] sm:$0x1] %vm341_vm4, %v7315_v5  ;;  %6370 = vmatprep.mubr.msk.bf16.mxu0 %vm562_vm5, %v7059_v34 }
  0x41   : > { %383 = vst.msk [vmem:[#allocation4] sm:$0x1] %vm341_vm4, %v7315_v5  ;;  %392 = vst.msk [vmem:[#allocation4 + $0x90] sm:$0x1] %vm341_vm4, %v7315_v5  ;;  %1497 = vmatpush1.bf16.msra.mxu1 %v7075_v43 }
  0x42   : > { %393 = vst.msk [vmem:[#allocation4 + $0x9] sm:$0x1] %vm341_vm4, %v7315_v5  ;;  %402 = vst.msk [vmem:[#allocation4 + $0x99] sm:$0x1] %vm341_vm4, %v7315_v5  ;;  %1498 = vmatprep.subr.bf16.mxu1 %v10313_v7 }
  0x43   : > { %408 = vst [vmem:[#allocation5] sm:$0x1] %v7315_v5  ;;  %417 = vst [vmem:[#allocation5 + $0x90] sm:$0x1] %v7315_v5 }
  0x44   : > { %418 = vst [vmem:[#allocation5 + $0x9] sm:$0x1] %v7315_v5  ;;  %427 = vst [vmem:[#allocation5 + $0x99] sm:$0x1] %v7315_v5  ;;  %v7077_v5 = vld [vmem:[%s10306_s3 + $0x60] sm:$0xff]  }
  0x45   : > { %1499 = vmatpush1.bf16.msra.mxu1 %v7076_v47 }
  0x46   : > { %v7624_v18 = vld [vmem:[#allocation2] sm:$0xff]  ;;  %v885_v20 = vld [vmem:[#allocation2 + $0x10] sm:$0x3]  ;;  %2262 = vmatprep.subr.bf16.mxu1 %v10313_v7 }
  0x47   : > { %v980_v21 = vrot.slane %v7624_v18, 1  ;;  %v983_v23 = vrot.slane %v885_v20, 1  ;;  %6371 = vmatmul.mubr.msk.bf16.gmra.mrb[20].mxu0 %vm562_vm5, %v7060_v35  ;;  %v1156_v44 = vrot.slane %v7624_v18, 2  ;;  %v1159_v46 = vrot.slane %v885_v20, 2 }
  0x48   : > { %6374 = vmatprep.mubr.msk.bf16.mxu0 %vm562_vm5, %v7061_v36 }
  0x49   : > { %v982_v25 = vsel %vm979_vm6, %v980_v21, %v981_v22  ;;  %v984_v26 = vsel %vm979_vm6, %v981_v22, %v983_v23  ;;  %v1158_v48 = vsel %vm612_vm1, %v1156_v44, %v1157_v45  ;;  %v1160_v49 = vsel %vm612_vm1, %v1157_v45, %v1159_v46  ;;  %v7078_v44 = vld [vmem:[%s10306_s3 + $0x68] sm:$0xff]  }
  0x4a   : > { %v6747_v28 = vpack.i.bf16 %v984_v26, %v982_v25  ;;  %v1301_v50 = vpack.c.bf16 %v1160_v49, %v1158_v48 }
  0x4c   : > { %6748 = vrot.lane.b32.xlu0 %v6747_v28, %s7317_s14  ;;  %5779 = vmatprep.mubr.msk.bf16.mxu1 %vm332_vm2, %v1301_v50 }
  0x4f   : > { %6375 = vmatmul.mubr.msk.bf16.gmra.mrb[24].mxu0 %vm562_vm5, %v7062_v37 }
  0x50   : > { %6378 = vmatprep.mubr.msk.bf16.mxu0 %vm562_vm5, %v7063_v38 }
  0x57   : > { %6379 = vmatmul.mubr.msk.bf16.gmra.mrb[28].mxu0 %vm562_vm5, %v7064_v39 }
  0xbe   : > { %v6749_v51 = vpop.permute.xlu0 %6748 }
  0xbf   : > { %v6751_v52 = vunpack.i.h.bf16 %v6749_v51  ;;  %v6750_v53 = vunpack.i.l.bf16 %v6749_v51 }
  0xc1   : > { %v1268_v54 = vsel %vm332_vm2, %v7624_v18, %v6750_v53  ;;  %v1269_v55 = vsel %vm332_vm2, %v7626_v19, %v6751_v52 }
  0xc2   : > { %v1300_v56 = vpack.c.bf16 %v1269_v55, %v1268_v54 }
  0xc4   : > { %1509 = vmatmul.mubr.bf16.vlgmr.msra.gmra.mrb[0].mxu1 %v1300_v56 }
  0xc5   : > { %2263 = vmatpush1.bf16.msra.mxu1 %v7077_v5 }
  0xc6   : > { %2264 = vmatprep.subr.bf16.mxu1 %v10313_v7 }
  0xc9   : > { %2265 = vmatpush1.bf16.msra.mxu1 %v7078_v44 }
  0xca   : > { %2266 = vmatprep.subr.bf16.mxu1 %v10313_v7 }
  0xf2   : > { %v6352_v58 = vpop.f32.mrb[0].mxu0 }
  0xf3   : > { %v781_v59 = vadd.f32 %v6352_v58, %v7701_v57  ;;  %v652_v60 = vpop.f32.mrb[1].mxu0 }
  0xf4   : > { %v779_v61 = vadd.f32 %v7701_v57, %v652_v60  ;;  %v6353_v62 = vpop.f32.mrb[2].mxu0 }
  0xf5   : > { %v813_v63 = vmax.f32 %v781_v59, 0.0  ;;  %v782_v0 = vadd.f32 %v6353_v62, %v7701_v57  ;;  %v655_v1 = vpop.f32.mrb[3].mxu0 }
  0xf6   : > { %v811_v2 = vmax.f32 %v779_v61, 0.0  ;;  %v780_v3 = vadd.f32 %v7701_v57, %v655_v1 }
  0xf7   : > { %846 = vst.msk [vmem:[#allocation2 + $0x31] sm:$0xff] %vm332_vm2, %v813_v63  ;;  %v814_v4 = vmax.f32 %v782_v0, 0.0 }
  0xf8   : > { %844 = vst.msk [vmem:[#allocation2 + $0x19] sm:$0xff] %vm332_vm2, %v811_v2  ;;  %v812_v6 = vmax.f32 %v780_v3, 0.0 }
  0xf9   : > { %847 = vst.msk [vmem:[#allocation2 + $0x39] sm:$0xff] %vm332_vm2, %v814_v4 }
  0xfa   : > { %845 = vst.msk [vmem:[#allocation2 + $0x21] sm:$0xff] %vm332_vm2, %v812_v6  ;;  %v6356_v8 = vpop.f32.mrb[4].mxu0 }
  0xfb   : > { %v785_v9 = vadd.f32 %v6356_v8, %v7701_v57  ;;  %v668_v10 = vpop.f32.mrb[5].mxu0 }
  0xfc   : > { %v783_v11 = vadd.f32 %v7701_v57, %v668_v10  ;;  %v6357_v12 = vpop.f32.mrb[6].mxu0 }
  0xfd   : > { %v817_v13 = vmax.f32 %v785_v9, 0.0  ;;  %v786_v14 = vadd.f32 %v6357_v12, %v7701_v57  ;;  %v671_v15 = vpop.f32.mrb[7].mxu0 }
  0xfe   : > { %v815_v16 = vmax.f32 %v783_v11, 0.0  ;;  %v784_v17 = vadd.f32 %v7701_v57, %v671_v15  ;;  %v7719_v18 = vld [vmem:[#allocation2 + $0x30] sm:$0xff] }
  0xff   : > { %850 = vst.msk [vmem:[#allocation2 + $0x61] sm:$0xff] %vm332_vm2, %v817_v13  ;;  %v818_v19 = vmax.f32 %v786_v14, 0.0  ;;  %v886_v20 = vld [vmem:[#allocation2 + $0x18] sm:$0xff]  ;;  %v990_v24 = vrot.slane %v7719_v18, 1 }
 0x100   : > { %848 = vst.msk [vmem:[#allocation2 + $0x49] sm:$0xff] %vm332_vm2, %v815_v16  ;;  %v816_v21 = vmax.f32 %v784_v17, 0.0  ;;  %v7723_v22 = vld [vmem:[#allocation2 + $0x38] sm:$0xff]  ;;  %v891_v23 = vld [vmem:[#allocation2 + $0x40] sm:$0x3]  ;;  %v1161_v28 = vrot.slane %v886_v20, 2 }
 0x101   : > { %10406 = vst [vmem:[#allocation9_spill] sm:$0xff] %v7723_v22  ;;  %851 = vst.msk [vmem:[#allocation2 + $0x69] sm:$0xff] %vm332_vm2, %v818_v19  ;;  %v7728_v25 = vrot.slane %v7723_v22, 1  ;;  %v993_v26 = vrot.slane %v891_v23, 1  ;;  %v887_v27 = vld [vmem:[#allocation2 + $0x20] sm:$0xff]  ;;  %v985_v32 = vrot.slane %v886_v20, 1 }
 0x102   : > { %849 = vst.msk [vmem:[#allocation2 + $0x51] sm:$0xff] %vm332_vm2, %v816_v21  ;;  %v6360_v29 = vpop.f32.mrb[8].mxu0  ;;  %v888_v30 = vld [vmem:[#allocation2 + $0x28] sm:$0x3]  ;;  %v1162_v31 = vrot.slane %v887_v27, 2  ;;  %v7731_v33 = vrot.slane %v887_v27, 1 }
 0x103   : > { %v789_v34 = vadd.f32 %v6360_v29, %v7701_v57  ;;  %v684_v35 = vpop.f32.mrb[9].mxu0  ;;  %v7736_v36 = vsel %vm979_vm6, %v990_v24, %v7728_v25  ;;  %v994_v37 = vsel %vm979_vm6, %v7728_v25, %v993_v26  ;;  %v1164_v38 = vrot.slane %v888_v30, 2  ;;  %v7079_v17 = vld [vmem:[%s10306_s3 + $0x70] sm:$0xff]  }
 0x104   : > { %10407 = vst [vmem:[#allocation10_spill] sm:$0xff] %v7736_v36  ;;  %v787_v39 = vadd.f32 %v7701_v57, %v684_v35  ;;  %v6361_v40 = vpop.f32.mrb[10].mxu0  ;;  %v6757_v41 = vpack.i.bf16 %v994_v37, %v7736_v36  ;;  %v1163_v42 = vsel %vm612_vm1, %v1161_v28, %v1162_v31  ;;  %v7745_v43 = vsel %vm979_vm6, %v985_v32, %v7731_v33 }
 0x105   : > { %v821_v45 = vmax.f32 %v789_v34, 0.0  ;;  %v790_v46 = vadd.f32 %v6361_v40, %v7701_v57  ;;  %v687_v47 = vpop.f32.mrb[11].mxu0  ;;  %v1165_v48 = vsel %vm612_vm1, %v1162_v31, %v1164_v38  ;;  %v988_v49 = vrot.slane %v888_v30, 1  ;;  %2267 = vmatpush1.bf16.msra.mxu1 %v7079_v17 }
 0x106   : > { %v819_v50 = vmax.f32 %v787_v39, 0.0  ;;  %v788_v51 = vadd.f32 %v7701_v57, %v687_v47  ;;  %6758 = vrot.lane.b32.xlu1 %v6757_v41, %s7317_s14  ;;  %v1303_v52 = vpack.c.bf16 %v1165_v48, %v1163_v42  ;;  %v7754_v53 = vld [vmem:[#allocation2 + $0x60] sm:$0xff]  ;;  %2268 = vmatprep.subr.bf16.mxu1 %v10313_v7 }
 0x107   : > { %854 = vst.msk [vmem:[#allocation2 + $0x91] sm:$0xff] %vm332_vm2, %v821_v45  ;;  %v822_v54 = vmax.f32 %v790_v46, 0.0  ;;  %v989_v55 = vsel %vm979_vm6, %v7731_v33, %v988_v49  ;;  %v1000_v56 = vrot.slane %v7754_v53, 1  ;;  %v7760_v58 = vld [vmem:[#allocation2 + $0x48] sm:$0xff] }
 0x108   : > { %852 = vst.msk [vmem:[#allocation2 + $0x79] sm:$0xff] %vm332_vm2, %v819_v50  ;;  %v820_v59 = vmax.f32 %v788_v51, 0.0  ;;  %5780 = vmatprep.mubr.msk.bf16.mxu1 %vm332_vm2, %v1303_v52  ;;  %v6752_v60 = vpack.i.bf16 %v989_v55, %v7745_v43  ;;  %v7766_v61 = vld [vmem:[#allocation2 + $0x68] sm:$0xff]  ;;  %v897_v62 = vld [vmem:[#allocation2 + $0x70] sm:$0x3]  ;;  %v995_v63 = vrot.slane %v7760_v58, 1 }
 0x109   : > { %855 = vst.msk [vmem:[#allocation2 + $0x99] sm:$0xff] %vm332_vm2, %v822_v54  ;;  %v7771_v0 = vrot.slane %v7766_v61, 1  ;;  %v1003_v1 = vrot.slane %v897_v62, 1  ;;  %v7773_v2 = vld [vmem:[#allocation2 + $0x50] sm:$0xff]  ;;  %v894_v3 = vld [vmem:[#allocation2 + $0x58] sm:$0x3] }
 0x10a   : > { %853 = vst.msk [vmem:[#allocation2 + $0x81] sm:$0xff] %vm332_vm2, %v820_v59  ;;  %6753 = vrot.lane.b32.xlu0 %v6752_v60, %s7317_s14  ;;  %v6364_v4 = vpop.f32.mrb[12].mxu0  ;;  %v7778_v5 = vrot.slane %v7773_v2, 1  ;;  %v998_v6 = vrot.slane %v894_v3, 1 }
 0x10b   : > { %v793_v8 = vadd.f32 %v6364_v4, %v7701_v57  ;;  %v700_v9 = vpop.f32.mrb[13].mxu0  ;;  %v7783_v10 = vsel %vm979_vm6, %v1000_v56, %v7771_v0  ;;  %v1004_v11 = vsel %vm979_vm6, %v7771_v0, %v1003_v1 }
 0x10c   : > { %v791_v12 = vadd.f32 %v7701_v57, %v700_v9  ;;  %v6365_v13 = vpop.f32.mrb[14].mxu0  ;;  %v6767_v14 = vpack.i.bf16 %v1004_v11, %v7783_v10  ;;  %v7791_v15 = vsel %vm979_vm6, %v995_v63, %v7778_v5  ;;  %v999_v16 = vsel %vm979_vm6, %v7778_v5, %v998_v6 }
 0x10d   : > { %v825_v19 = vmax.f32 %v793_v8, 0.0  ;;  %v794_v20 = vadd.f32 %v6365_v13, %v7701_v57  ;;  %v703_v21 = vpop.f32.mrb[15].mxu0  ;;  %v6762_v23 = vpack.i.bf16 %v999_v16, %v7791_v15 }
 0x10e   : > { %v823_v24 = vmax.f32 %v791_v12, 0.0  ;;  %v792_v26 = vadd.f32 %v7701_v57, %v703_v21  ;;  %6768 = vrot.lane.b32.xlu0 %v6767_v14, %s7317_s14  ;;  %v7802_v27 = vld [vmem:[#allocation2 + $0x90] sm:$0xff] }
 0x10f   : > { %858 = vst.msk [vmem:[#allocation2 + $0xc1] sm:$0xff] %vm332_vm2, %v825_v19  ;;  %v826_v28 = vmax.f32 %v794_v20, 0.0  ;;  %6763 = vrot.lane.b32.xlu1 %v6762_v23, %s7317_s14  ;;  %v1010_v29 = vrot.slane %v7802_v27, 1  ;;  %v7807_v30 = vld [vmem:[#allocation2 + $0x78] sm:$0xff] }
 0x110   : > { %856 = vst.msk [vmem:[#allocation2 + $0xa9] sm:$0xff] %vm332_vm2, %v823_v24  ;;  %v824_v31 = vmax.f32 %v792_v26, 0.0  ;;  %v7811_v32 = vld [vmem:[#allocation2 + $0x98] sm:$0xff]  ;;  %v903_v34 = vld [vmem:[#allocation2 + $0xa0] sm:$0x3]  ;;  %v1005_v35 = vrot.slane %v7807_v30, 1 }
 0x111   : > { %859 = vst.msk [vmem:[#allocation2 + $0xc9] sm:$0xff] %vm332_vm2, %v826_v28  ;;  %v7816_v37 = vrot.slane %v7811_v32, 1  ;;  %v1013_v38 = vrot.slane %v903_v34, 1  ;;  %v7818_v39 = vld [vmem:[#allocation2 + $0x80] sm:$0xff]  ;;  %v7820_v40 = vld [vmem:[#allocation2 + $0x88] sm:$0x3] }
 0x112   : > { %10408 = vst [vmem:[#allocation11_spill] sm:$0xff] %v7820_v40  ;;  %857 = vst.msk [vmem:[#allocation2 + $0xb1] sm:$0xff] %vm332_vm2, %v824_v31  ;;  %v6368_v41 = vpop.f32.mrb[16].mxu0  ;;  %v7824_v42 = vrot.slane %v7818_v39, 1  ;;  %v1008_v44 = vrot.slane %v7820_v40, 1 }
 0x113   : > { %v797_v45 = vadd.f32 %v6368_v41, %v7701_v57  ;;  %v716_v46 = vpop.f32.mrb[17].mxu0  ;;  %v7830_v47 = vsel %vm979_vm6, %v1010_v29, %v7816_v37  ;;  %v1014_v48 = vsel %vm979_vm6, %v7816_v37, %v1013_v38  ;;  %v7080_v41 = vld [vmem:[%s10306_s3 + $0x78] sm:$0xff]  }
 0x114   : > { %v795_v49 = vadd.f32 %v7701_v57, %v716_v46  ;;  %v6369_v50 = vpop.f32.mrb[18].mxu0  ;;  %v6777_v51 = vpack.i.bf16 %v1014_v48, %v7830_v47  ;;  %v7838_v52 = vsel %vm979_vm6, %v1005_v35, %v7824_v42  ;;  %v1009_v54 = vsel %vm979_vm6, %v7824_v42, %v1008_v44  ;;  %2269 = vmatpush1.bf16.msra.mxu1 %v7080_v41 }
 0x115   : > { %10409 = vst [vmem:[#allocation12_spill] sm:$0xff] %v7838_v52  ;;  %v829_v55 = vmax.f32 %v797_v45, 0.0  ;;  %v798_v56 = vadd.f32 %v6369_v50, %v7701_v57  ;;  %v719_v59 = vpop.f32.mrb[19].mxu0  ;;  %v6772_v60 = vpack.i.bf16 %v1009_v54, %v7838_v52  ;;  %2270 = vmatprep.subr.bf16.mxu1 %v10313_v7 }
 0x116   : > { %v827_v62 = vmax.f32 %v795_v49, 0.0  ;;  %v796_v63 = vadd.f32 %v7701_v57, %v719_v59  ;;  %6778 = vrot.lane.b32.xlu0 %v6777_v51, %s7317_s14  ;;  %v7846_v1 = vld [vmem:[#allocation2 + $0xc0] sm:$0xff] }
 0x117   : > { %862 = vst.msk [vmem:[#allocation2 + $0xf1] sm:$0xff] %vm332_vm2, %v829_v55  ;;  %v830_v3 = vmax.f32 %v798_v56, 0.0  ;;  %6773 = vrot.lane.b32.xlu1 %v6772_v60, %s7317_s14  ;;  %v1020_v4 = vrot.slane %v7846_v1, 1  ;;  %v7851_v6 = vld [vmem:[#allocation2 + $0xa8] sm:$0xff] }
 0x118   : > { %860 = vst.msk [vmem:[#allocation2 + $0xd9] sm:$0xff] %vm332_vm2, %v827_v62  ;;  %v828_v8 = vmax.f32 %v796_v63, 0.0  ;;  %v7854_v9 = vld [vmem:[#allocation2 + $0xc8] sm:$0xff]  ;;  %v7856_v11 = vld [vmem:[#allocation2 + $0xd0] sm:$0x3]  ;;  %v1015_v12 = vrot.slane %v7851_v6, 1 }
 0x119   : > { %10410 = vst [vmem:[#allocation13_spill] sm:$0xff] %v7854_v9  ;;  %10411 = vst [vmem:[#allocation14_spill] sm:$0xff] %v7856_v11  ;;  %v7861_v13 = vrot.slane %v7854_v9, 1  ;;  %v1023_v14 = vrot.slane %v7856_v11, 1  ;;  %v7864_v16 = vld [vmem:[#allocation2 + $0xb0] sm:$0xff] }
 0x11a   : > { %863 = vst.msk [vmem:[#allocation2 + $0xf9] sm:$0xff] %vm332_vm2, %v830_v3  ;;  %10412 = vst [vmem:[#allocation15_spill] sm:$0xff] %v7864_v16  ;;  %v7866_v17 = vld [vmem:[#allocation2 + $0xb8] sm:$0x3]  ;;  %v6372_v19 = vpop.f32.mrb[20].mxu0  ;;  %v7870_v20 = vrot.slane %v7864_v16, 1 }
 0x11b   : > { %10413 = vst [vmem:[#allocation16_spill] sm:$0xff] %v7866_v17  ;;  %861 = vst.msk [vmem:[#allocation2 + $0xe1] sm:$0xff] %vm332_vm2, %v828_v8  ;;  %v1018_v21 = vrot.slane %v7866_v17, 1  ;;  %v801_v23 = vadd.f32 %v6372_v19, %v7701_v57  ;;  %v732_v24 = vpop.f32.mrb[21].mxu0  ;;  %v7876_v26 = vsel %vm979_vm6, %v1020_v4, %v7861_v13  ;;  %v1024_v28 = vsel %vm979_vm6, %v7861_v13, %v1023_v14  ;;  %v8002_v17 = vld [vmem:[#allocation2 + $0x58] sm:$0x3] }
 0x11c   : > { %v799_v29 = vadd.f32 %v7701_v57, %v732_v24  ;;  %v6373_v31 = vpop.f32.mrb[22].mxu0  ;;  %v6787_v34 = vpack.i.bf16 %v1024_v28, %v7876_v26  ;;  %v7884_v35 = vsel %vm979_vm6, %v1015_v12, %v7870_v20  ;;  %v8118_v9 = vld [vmem:[#allocation2 + $0xb8] sm:$0x3] }
 0x11d   : > { %10414 = vst [vmem:[#allocation17_spill] sm:$0xff] %v7884_v35  ;;  %v1019_v38 = vsel %vm979_vm6, %v7870_v20, %v1018_v21  ;;  %v833_v44 = vmax.f32 %v801_v23, 0.0  ;;  %v802_v45 = vadd.f32 %v6373_v31, %v7701_v57  ;;  %v735_v46 = vpop.f32.mrb[23].mxu0  ;;  %10453 = vst [vmem:[#allocation55_spill] sm:$0xff] %v8118_v9 }
 0x11e   : > { %v6782_v48 = vpack.i.bf16 %v1019_v38, %v7884_v35  ;;  %v831_v49 = vmax.f32 %v799_v29, 0.0  ;;  %v800_v50 = vadd.f32 %v7701_v57, %v735_v46  ;;  %6788 = vrot.lane.b32.xlu0 %v6787_v34, %s7317_s14  ;;  %v7895_v51 = vld [vmem:[#allocation2 + $0xf0] sm:$0xff] }
 0x11f   : > { %10415 = vst [vmem:[#allocation18_spill] sm:$0xff] %v7895_v51  ;;  %866 = vst.msk [vmem:[#allocation2 + $0x121] sm:$0xff] %vm332_vm2, %v833_v44  ;;  %v834_v54 = vmax.f32 %v802_v45, 0.0  ;;  %v1030_v55 = vrot.slane %v7895_v51, 1  ;;  %v7900_v56 = vld [vmem:[#allocation2 + $0xd8] sm:$0xff]  ;;  %v7081_v45 = vld [vmem:[%s10306_s3 + $0x80] sm:$0xff]  }
 0x120   : > { %6783 = vrot.lane.b32.xlu1 %v6782_v48, %s7317_s14  ;;  %10416 = vst [vmem:[#allocation19_spill] sm:$0xff] %v7900_v56  ;;  %864 = vst.msk [vmem:[#allocation2 + $0x109] sm:$0xff] %vm332_vm2, %v831_v49  ;;  %v832_v59 = vmax.f32 %v800_v50, 0.0  ;;  %v1025_v63 = vrot.slane %v7900_v56, 1  ;;  %2271 = vmatpush1.bf16.msra.mxu1 %v7081_v45  ;;  %v2467_v51 = vld [vmem:[#allocation2 + $0x88] sm:$0x3] }
 0x121   : > { %v7904_v60 = vld [vmem:[#allocation2 + $0xf8] sm:$0xff]  ;;  %v7906_v62 = vld [vmem:[#allocation2 + $0x100] sm:$0x3]  ;;  %867 = vst.msk [vmem:[#allocation2 + $0x129] sm:$0xff] %vm332_vm2, %v834_v54  ;;  %2272 = vmatprep.subr.bf16.mxu1 %v10313_v7 }
 0x122   : > { %10417 = vst [vmem:[#allocation20_spill] sm:$0xff] %v7904_v60  ;;  %10418 = vst [vmem:[#allocation21_spill] sm:$0xff] %v7906_v62  ;;  %v7911_v3 = vrot.slane %v7904_v60, 1  ;;  %v1033_v4 = vrot.slane %v7906_v62, 1  ;;  %v7914_v8 = vld [vmem:[#allocation2 + $0xe0] sm:$0xff]  ;;  %v6376_v14 = vpop.f32.mrb[24].mxu0 }
 0x123   : > { %10419 = vst [vmem:[#allocation22_spill] sm:$0xff] %v7914_v8  ;;  %v7916_v12 = vld [vmem:[#allocation2 + $0xe8] sm:$0x3]  ;;  %865 = vst.msk [vmem:[#allocation2 + $0x111] sm:$0xff] %vm332_vm2, %v832_v59  ;;  %v7920_v19 = vrot.slane %v7914_v8, 1  ;;  %v805_v23 = vadd.f32 %v6376_v14, %v7701_v57  ;;  %v748_v24 = vpop.f32.mrb[25].mxu0 }
 0x124   : > { %10420 = vst [vmem:[#allocation23_spill] sm:$0xff] %v7916_v12  ;;  %v1028_v21 = vrot.slane %v7916_v12, 1  ;;  %v7926_v28 = vsel %vm979_vm6, %v1030_v55, %v7911_v3  ;;  %v1034_v29 = vsel %vm979_vm6, %v7911_v3, %v1033_v4  ;;  %v803_v31 = vadd.f32 %v7701_v57, %v748_v24  ;;  %v6377_v34 = vpop.f32.mrb[26].mxu0 }
 0x125   : > { %10421 = vst [vmem:[#allocation24_spill] sm:$0xff] %v7926_v28  ;;  %v6797_v38 = vpack.i.bf16 %v1034_v29, %v7926_v28  ;;  %v7934_v41 = vsel %vm979_vm6, %v1025_v63, %v7920_v19  ;;  %v837_v46 = vmax.f32 %v805_v23, 0.0  ;;  %v806_v48 = vadd.f32 %v6377_v34, %v7701_v57  ;;  %v751_v49 = vpop.f32.mrb[27].mxu0 }
 0x126   : > { %10422 = vst [vmem:[#allocation25_spill] sm:$0xff] %v7934_v41  ;;  %v1029_v44 = vsel %vm979_vm6, %v7920_v19, %v1028_v21  ;;  %v835_v54 = vmax.f32 %v803_v31, 0.0  ;;  %v804_v55 = vadd.f32 %v7701_v57, %v751_v49  ;;  %v7945_v59 = vld [vmem:[#allocation2 + $0x120] sm:$0xff] }
 0x127   : > { %v6792_v50 = vpack.i.bf16 %v1029_v44, %v7934_v41  ;;  %6798 = vrot.lane.b32.xlu0 %v6797_v38, %s7317_s14  ;;  %10423 = vst [vmem:[#allocation26_spill] sm:$0xff] %v7945_v59  ;;  %870 = vst.msk [vmem:[#allocation2 + $0x151] sm:$0xff] %vm332_vm2, %v837_v46  ;;  %v838_v63 = vmax.f32 %v806_v48, 0.0  ;;  %v1040_v4 = vrot.slane %v7945_v59, 1  ;;  %v7950_v14 = vld [vmem:[#allocation2 + $0x108] sm:$0xff] }
 0x128   : > { %10424 = vst [vmem:[#allocation27_spill] sm:$0xff] %v7950_v14  ;;  %868 = vst.msk [vmem:[#allocation2 + $0x139] sm:$0xff] %vm332_vm2, %v835_v54  ;;  %v836_v21 = vmax.f32 %v804_v55, 0.0  ;;  %v7954_v23 = vld [vmem:[#allocation2 + $0x128] sm:$0xff]  ;;  %v7956_v24 = vld [vmem:[#allocation2 + $0x130] sm:$0x3] }
 0x129   : > { %6793 = vrot.lane.b32.xlu1 %v6792_v50, %s7317_s14  ;;  %10425 = vst [vmem:[#allocation28_spill] sm:$0xff] %v7954_v23  ;;  %10426 = vst [vmem:[#allocation29_spill] sm:$0xff] %v7956_v24  ;;  %v1035_v29 = vrot.slane %v7950_v14, 1  ;;  %v7961_v31 = vrot.slane %v7954_v23, 1  ;;  %v1043_v34 = vrot.slane %v7956_v24, 1 }
 0x12a   : > { %871 = vst.msk [vmem:[#allocation2 + $0x159] sm:$0xff] %vm332_vm2, %v838_v63  ;;  %v7964_v38 = vld [vmem:[#allocation2 + $0x110] sm:$0xff]  ;;  %v7966_v44 = vld [vmem:[#allocation2 + $0x118] sm:$0x3]  ;;  %869 = vst.msk [vmem:[#allocation2 + $0x141] sm:$0xff] %vm332_vm2, %v836_v21  ;;  %v6380_v45 = vpop.f32.mrb[28].mxu0 }
 0x12b   : > { %10427 = vst [vmem:[#allocation30_spill] sm:$0xff] %v7964_v38  ;;  %10428 = vst [vmem:[#allocation31_spill] sm:$0xff] %v7966_v44  ;;  %v7970_v46 = vrot.slane %v7964_v38, 1  ;;  %v1038_v48 = vrot.slane %v7966_v44, 1  ;;  %v809_v49 = vadd.f32 %v6380_v45, %v7701_v57  ;;  %v764_v50 = vpop.f32.mrb[29].mxu0  ;;  %v7976_v54 = vsel %vm979_vm6, %v1040_v4, %v7961_v31 }
 0x12c   : > { %10429 = vst [vmem:[#allocation32_spill] sm:$0xff] %v7976_v54  ;;  %v1044_v55 = vsel %vm979_vm6, %v7961_v31, %v1043_v34  ;;  %v807_v63 = vadd.f32 %v7701_v57, %v764_v50  ;;  %v6381_v7 = vpop.f32.mrb[30].mxu0  ;;  %v7988_v44 = vld [vmem:[#allocation2 + $0x28] sm:$0x3]  ;;  %v8066_v14 = vld [vmem:[#allocation2 + $0x70] sm:$0x3] }
 0x12d   : > { %v6807_v21 = vpack.i.bf16 %v1044_v55, %v7976_v54  ;;  %v7984_v24 = vsel %vm979_vm6, %v1035_v29, %v7970_v46  ;;  %v1039_v45 = vsel %vm979_vm6, %v7970_v46, %v1038_v48  ;;  %10431 = vst [vmem:[#allocation34_spill] sm:$0xff] %v7988_v44  ;;  %v841_v62 = vmax.f32 %v809_v49, 0.0  ;;  %v767_v12 = vpop.f32.mrb[31].mxu0 }
 0x12e   : > { %10430 = vst [vmem:[#allocation33_spill] sm:$0xff] %v7984_v24  ;;  %v810_v4 = vadd.f32 %v6381_v7, %v7701_v57  ;;  %v6802_v34 = vpack.i.bf16 %v1039_v45, %v7984_v24  ;;  %v839_v11 = vmax.f32 %v807_v63, 0.0  ;;  %v808_v50 = vadd.f32 %v7701_v57, %v767_v12  ;;  %v7994_v55 = vld [vmem:[#allocation2 + $0x150] sm:$0xff] }
 0x12f   : > { %6808 = vrot.lane.b32.xlu0 %v6807_v21, %s7317_s14  ;;  %10432 = vst [vmem:[#allocation35_spill] sm:$0xff] %v7994_v55  ;;  %874 = vst.msk [vmem:[#allocation2 + $0x181] sm:$0xff] %vm332_vm2, %v841_v62  ;;  %v1050_v48 = vrot.slane %v7994_v55, 1  ;;  %v7999_v49 = vld [vmem:[#allocation2 + $0x138] sm:$0xff]  ;;  %v1768_v7 = vrot.slane %v7988_v44, 1  ;;  %v1778_v55 = vrot.slane %v8002_v17, 1 }
 0x130   : > { %v842_v29 = vmax.f32 %v810_v4, 0.0  ;;  %6803 = vrot.lane.b32.xlu1 %v6802_v34, %s7317_s14  ;;  %10433 = vst [vmem:[#allocation36_spill] sm:$0xff] %v7999_v49  ;;  %872 = vst.msk [vmem:[#allocation2 + $0x169] sm:$0xff] %vm332_vm2, %v839_v11  ;;  %v840_v57 = vmax.f32 %v808_v50, 0.0  ;;  %v1045_v62 = vrot.slane %v7999_v49, 1  ;;  %v1783_v60 = vrot.slane %v8066_v14, 1 }
 0x131   : > { %v8005_v12 = vld [vmem:[#allocation2 + $0x158] sm:$0xff]  ;;  %v8007_v63 = vld [vmem:[#allocation2 + $0x160] sm:$0x3]  ;;  %v8017_v34 = vld [vmem:[#allocation2 + $0x148] sm:$0x3]  ;;  %v1779_v59 = vsel %vm979_vm6, %v7778_v5, %v1778_v55 }
 0x132   : > { %10434 = vst [vmem:[#allocation37_spill] sm:$0xff] %v8005_v12  ;;  %10435 = vst [vmem:[#allocation38_spill] sm:$0xff] %v8007_v63  ;;  %v8012_v21 = vrot.slane %v8005_v12, 1  ;;  %v1053_v45 = vrot.slane %v8007_v63, 1  ;;  %v8015_v4 = vld [vmem:[#allocation2 + $0x140] sm:$0xff]  ;;  %v1048_v50 = vrot.slane %v8017_v34, 1 }
 0x133   : > { %875 = vst.msk [vmem:[#allocation2 + $0x189] sm:$0xff] %vm332_vm2, %v842_v29  ;;  %10437 = vst [vmem:[#allocation40_spill] sm:$0xff] %v8015_v4  ;;  %v8021_v11 = vrot.slane %v8015_v4, 1  ;;  %v8024_v44 = vld [vmem:[#allocation2 + $0x40] sm:$0x3]  ;;  %v7082_v29 = vld [vmem:[%s10306_s3 + $0x88] sm:$0xff]  }
 0x134   : > { %10436 = vst [vmem:[#allocation39_spill] sm:$0xff] %v8012_v21  ;;  %10438 = vst [vmem:[#allocation41_spill] sm:$0xff] %v8017_v34  ;;  %v8031_v63 = vsel %vm979_vm6, %v1050_v48, %v8012_v21  ;;  %v1054_v40 = vsel %vm979_vm6, %v8012_v21, %v1053_v45  ;;  %v8045_v4 = vld [vmem:[#allocation2 + $0x40] sm:$0x3]  ;;  %v2464_v48 = vld [vmem:[#allocation2 + $0x70] sm:$0x3]  ;;  %2273 = vmatpush1.bf16.msra.mxu1 %v7082_v29 }
 0x135   : > { %873 = vst.msk [vmem:[#allocation2 + $0x171] sm:$0xff] %vm332_vm2, %v840_v57  ;;  %10439 = vst [vmem:[#allocation42_spill] sm:$0xff] %v8031_v63  ;;  %v1769_v57 = vsel %vm979_vm6, %v7731_v33, %v1768_v7  ;;  %v6817_v22 = vpack.i.bf16 %v1054_v40, %v8031_v63  ;;  %v8040_v34 = vsel %vm979_vm6, %v1045_v62, %v8021_v11  ;;  %v8048_v49 = vld [vmem:[#allocation2 + $0x88] sm:$0x3]  ;;  %v2555_v33 = vrot.slane %v8024_v44, 1 }
 0x136   : > { %10440 = vst [vmem:[#allocation43_spill] sm:$0xff] %v8040_v34  ;;  %v1049_v12 = vsel %vm979_vm6, %v8021_v11, %v1048_v50  ;;  %10441 = vst [vmem:[#allocation44_spill] sm:$0xff] %v8045_v4  ;;  %v10442_v40 = vmov 0   ;;  %v2470_v7 = vld [vmem:[#allocation2 + $0xa0] sm:$0x3]  ;;  %v6827_v62 = vpack.i.bf16 %v1769_v57, %v7745_v43  ;;  %v1773_v23 = vrot.slane %v8045_v4, 1 }
 0x137   : > { %v6812_v45 = vpack.i.bf16 %v1049_v12, %v8040_v34  ;;  %2274 = vmatprep.subr.bf16.mxu1 %v10442_v40  ;;  %6818 = vrot.lane.b32.xlu0 %v6817_v22, %s7317_s14  ;;  %v8055_v50 = vld [vmem:[#allocation2 + $0x168] sm:$0xff]  ;;  %v8060_v12 = vsel %vm979_vm6, %v7728_v25, %v2555_v33  ;;  %v2565_v29 = vrot.slane %v2464_v48, 1  ;;  %v1788_v22 = vrot.slane %v8048_v49, 1  ;;  %v8074_v4 = vld [vmem:[#allocation2 + $0xb8] sm:$0x3] }
 0x138   : > { %10443 = vst [vmem:[#allocation45_spill] sm:$0xff] %v8055_v50  ;;  %10444 = vst [vmem:[#allocation46_spill] sm:$0xff] %v8060_v12  ;;  %v1055_v38 = vrot.slane %v8055_v50, 1  ;;  %v2575_v55 = vrot.slane %v2470_v7, 1  ;;  %v6837_v43 = vpack.i.bf16 %v1779_v59, %v7791_v15  ;;  %v1774_v12 = vsel %vm979_vm6, %v7728_v25, %v1773_v23  ;;  %v7083_v7 = vld [vmem:[%s10306_s3 + $0x90] sm:$0xff]  }
 0x139   : > { %6813 = vrot.lane.b32.xlu1 %v6812_v45, %s7317_s14  ;;  %v8078_v48 = vsel %vm979_vm6, %v7771_v0, %v2565_v29  ;;  %v2461_v29 = vld [vmem:[#allocation2 + $0x58] sm:$0x3]  ;;  %v1789_v25 = vsel %vm979_vm6, %v7824_v42, %v1788_v22  ;;  %v1798_v23 = vrot.slane %v8074_v4, 1  ;;  %2275 = vmatpush1.bf16.msra.mxu1 %v7083_v7  ;;  %v8125_v7 = vld [vmem:[#allocation2 + $0xa0] sm:$0x3] }
 0x13a   : > { %10447 = vst [vmem:[#allocation49_spill] sm:$0xff] %v8078_v48  ;;  %v8110_v8 = vsel %vm979_vm6, %v7816_v37, %v2575_v55  ;;  %v2560_v56 = vrot.slane %v2461_v29, 1  ;;  %2276 = vmatprep.subr.bf16.mxu1 %v10442_v40  ;;  %v6847_v55 = vpack.i.bf16 %v1789_v25, %v7838_v52 }
 0x13b   : > { %6828 = vrot.lane.b32.xlu0 %v6827_v62, %s7317_s14  ;;  %10451 = vst [vmem:[#allocation53_spill] sm:$0xff] %v8110_v8  ;;  %v1799_v22 = vsel %vm979_vm6, %v7870_v20, %v1798_v23  ;;  %v8131_v8 = vld [vmem:[#allocation2 + $0x118] sm:$0x3]  ;;  %v2580_v23 = vrot.slane %v8118_v9, 1 }
 0x13c   : > { %v8070_v57 = vld [vmem:[#allocation2 + $0x170] sm:$0xff]  ;;  %v8072_v45 = vld [vmem:[#allocation2 + $0x178] sm:$0x3] }
 0x13d   : > { %10445 = vst [vmem:[#allocation47_spill] sm:$0xff] %v8070_v57  ;;  %10446 = vst [vmem:[#allocation48_spill] sm:$0xff] %v8072_v45  ;;  %v8082_v33 = vrot.slane %v8070_v57, 1  ;;  %v1058_v50 = vrot.slane %v8072_v45, 1  ;;  %v8103_v45 = vld [vmem:[#allocation2 + $0xd0] sm:$0x3]  ;;  %v8173_v9 = vsel %vm979_vm6, %v7870_v20, %v2580_v23 }
 0x13e   : > { %10450 = vst [vmem:[#allocation52_spill] sm:$0xff] %v8103_v45  ;;  %v8106_v57 = vld [vmem:[#allocation2 + $0xe8] sm:$0x3]  ;;  %10457 = vst [vmem:[#allocation59_spill] sm:$0xff] %v8173_v9 }
 0x13f   : > { %10448 = vst [vmem:[#allocation50_spill] sm:$0xff] %v8082_v33  ;;  %v8096_v62 = vsel %vm979_vm6, %v1055_v38, %v8082_v33  ;;  %v1059_v59 = vsel %vm979_vm6, %v8082_v33, %v1058_v50  ;;  %v8112_v38 = vld [vmem:[#allocation2 + $0x100] sm:$0x3]  ;;  %6838 = vrot.lane.b32.xlu0 %v6837_v43, %s7317_s14  ;;  %v6832_v50 = vpack.i.bf16 %v1774_v12, %v7736_v36  ;;  %v2585_v43 = vrot.slane %v8103_v45, 1  ;;  %v8138_v36 = vld [vmem:[#allocation2 + $0x130] sm:$0x3] }
 0x140   : > { %10449 = vst [vmem:[#allocation51_spill] sm:$0xff] %v8096_v62  ;;  %v6822_v48 = vpack.i.bf16 %v1059_v59, %v8096_v62  ;;  %10452 = vst [vmem:[#allocation54_spill] sm:$0xff] %v8112_v38  ;;  %v1784_v59 = vsel %vm979_vm6, %v7771_v0, %v1783_v60  ;;  %v2570_v12 = vrot.slane %v2467_v51, 1  ;;  %v1808_v29 = vrot.slane %v8106_v57, 1  ;;  %v8151_v45 = vld [vmem:[#allocation2 + $0xe8] sm:$0x3] }
 0x141   : > { %v2595_v25 = vrot.slane %v8112_v38, 1  ;;  %10454 = vst [vmem:[#allocation56_spill] sm:$0xff] %v8138_v36  ;;  %v8144_v51 = vsel %vm979_vm6, %v7861_v13, %v2585_v43  ;;  %v2605_v0 = vrot.slane %v8138_v36, 1  ;;  %v6857_v43 = vpack.i.bf16 %v1799_v22, %v7884_v35  ;;  %v8194_v36 = vld [vmem:[#allocation2 + $0x148] sm:$0x3] }
 0x142   : > { %6823 = vrot.lane.b32.xlu1 %v6822_v48, %s7317_s14  ;;  %v8135_v48 = vsel %vm979_vm6, %v7778_v5, %v2560_v56  ;;  %v8148_v60 = vsel %vm979_vm6, %v7824_v42, %v2570_v12  ;;  %v1793_v5 = vrot.slane %v8125_v7, 1  ;;  %v8155_v56 = vld [vmem:[#allocation2 + $0xd0] sm:$0x3]  ;;  %v8165_v12 = vld [vmem:[#allocation2 + $0x118] sm:$0x3]  ;;  %v6842_v52 = vpack.i.bf16 %v1784_v59, %v7783_v10  ;;  %10459 = vst [vmem:[#allocation61_spill] sm:$0xff] %v8194_v36 }
 0x143   : > { %10455 = vst [vmem:[#allocation57_spill] sm:$0xff] %v8148_v60  ;;  %6848 = vrot.lane.b32.xlu0 %v6847_v55, %s7317_s14  ;;  %v8163_v42 = vsel %vm979_vm6, %v7911_v3, %v2595_v25  ;;  %v1818_v55 = vrot.slane %v8131_v8, 1  ;;  %v7084_v25 = vld [vmem:[%s10306_s3 + $0x98] sm:$0xff]   ;;  %v2590_v38 = vrot.slane %v8151_v45, 1  ;;  %v1809_v20 = vsel %vm979_vm6, %v7920_v19, %v1808_v29  ;;  %v8212_v35 = vld [vmem:[#allocation2 + $0x130] sm:$0x3] }
 0x144   : > { %10456 = vst [vmem:[#allocation58_spill] sm:$0xff] %v8163_v42  ;;  %v1803_v23 = vrot.slane %v8155_v56, 1  ;;  %v8191_v42 = vsel %vm979_vm6, %v7961_v31, %v2605_v0  ;;  %v2600_v22 = vrot.slane %v8165_v12, 1  ;;  %2277 = vmatpush1.bf16.msra.mxu1 %v7084_v25  ;;  %v1794_v59 = vsel %vm979_vm6, %v7816_v37, %v1793_v5  ;;  %v8221_v5 = vld [vmem:[#allocation2 + $0x178] sm:$0x3] }
 0x145   : > { %10458 = vst [vmem:[#allocation60_spill] sm:$0xff] %v8191_v42  ;;  %v8203_v29 = vsel %vm979_vm6, %v7920_v19, %v2590_v38  ;;  %2278 = vmatprep.subr.bf16.mxu1 %v10442_v40  ;;  %v1819_v0 = vsel %vm979_vm6, %v7970_v46, %v1818_v55  ;;  %v6867_v38 = vpack.i.bf16 %v1809_v20, %v7934_v41  ;;  %v2610_v60 = vrot.slane %v8194_v36, 1  ;;  %v8236_v41 = vld [vmem:[#allocation2 + $0x188] sm:$0xff] }
 0x146   : > { %6833 = vrot.lane.b32.xlu1 %v6832_v50, %s7317_s14  ;;  %v8181_v50 = vld [vmem:[#allocation2 + $0x148] sm:$0x3]  ;;  %10460 = vst [vmem:[#allocation62_spill] sm:$0xff] %v8203_v29  ;;  %v8218_v19 = vsel %vm979_vm6, %v7970_v46, %v2600_v22  ;;  %v6852_v46 = vpack.i.bf16 %v1794_v59, %v7830_v47  ;;  %v1804_v20 = vsel %vm979_vm6, %v7861_v13, %v1803_v23  ;;  %v8234_v22 = vld [vmem:[#allocation2 + $0x180] sm:$0xff]  ;;  %v1716_v29 = vld [vmem:[#allocation2 + $0x190] sm:$0x3] }
 0x147   : > { %6858 = vrot.lane.b32.xlu0 %v6857_v43, %s7317_s14  ;;  %v1828_v25 = vrot.slane %v8181_v50, 1  ;;  %v8210_v43 = vld [vmem:[#allocation2 + $0x100] sm:$0x3]  ;;  %10461 = vst [vmem:[#allocation63_spill] sm:$0xff] %v8218_v19  ;;  %v6877_v55 = vpack.i.bf16 %v1819_v0, %v7984_v24  ;;  %v1823_v9 = vrot.slane %v8212_v35, 1  ;;  %v8244_v37 = vsel %vm979_vm6, %v8021_v11, %v2610_v60  ;;  %v10469_v36 = vld [vmem:[#allocation20_spill] sm:$0xff] }
 0x148   : > { %v1813_v42 = vrot.slane %v8210_v43, 1  ;;  %10462 = vst [vmem:[#allocation64_spill] sm:$0xff] %v8244_v37  ;;  %v1838_v23 = vrot.slane %v8221_v5, 1  ;;  %v1840_v24 = vrot.slane %v8234_v22, 1  ;;  %v8256_v19 = vrot.slane %v8236_v41, 1 }
 0x149   : > { %v1829_v13 = vsel %vm979_vm6, %v8021_v11, %v1828_v25  ;;  %v1843_v60 = vrot.slane %v1716_v29, 1  ;;  %v6862_v25 = vpack.i.bf16 %v1804_v20, %v7876_v26  ;;  %v1824_v29 = vsel %vm979_vm6, %v7961_v31, %v1823_v9 }
 0x14a   : > { %6843 = vrot.lane.b32.xlu1 %v6842_v52, %s7317_s14  ;;  %v8223_v52 = vld [vmem:[#allocation2 + $0x160] sm:$0x3]  ;;  %10463 = vst [vmem:[#allocation65_spill] sm:$0xff] %v8256_v19  ;;  %v1814_v37 = vsel %vm979_vm6, %v7911_v3, %v1813_v42  ;;  %v1839_v20 = vsel %vm979_vm6, %v8082_v33, %v1838_v23  ;;  %v1171_v9 = vrot.slane %v7760_v58, 2  ;;  %v8286_v31 = vrot.slane %v7773_v2, 2  ;;  %v10475_v33 = vld [vmem:[#allocation40_spill] sm:$0xff] }
 0x14b   : > { %6868 = vrot.lane.b32.xlu0 %v6867_v38, %s7317_s14  ;;  %v1833_v59 = vrot.slane %v8223_v52, 1  ;;  %v6887_v38 = vpack.i.bf16 %v1829_v13, %v8040_v34  ;;  %v8278_v13 = vsel %vm979_vm6, %v1840_v24, %v8256_v19  ;;  %v8282_v3 = vsel %vm979_vm6, %v8256_v19, %v1843_v60  ;;  %v7085_v42 = vld [vmem:[%s10306_s3 + $0xa0] sm:$0xff]   ;;  %v10477_v19 = vld [vmem:[#allocation37_spill] sm:$0xff] }
 0x14c   : > { %10464 = vst [vmem:[#allocation66_spill] sm:$0xff] %v8278_v13  ;;  %v6897_v60 = vpack.i.bf16 %v1839_v20, %v8096_v62  ;;  %v6902_v23 = vpack.i.bf16 %v8282_v3, %v8278_v13  ;;  %v8305_v24 = vrot.slane %v7766_v61, 2  ;;  %2279 = vmatpush1.bf16.msra.mxu1 %v7085_v42  ;;  %v8313_v20 = vrot.slane %v7818_v39, 2  ;;  %v10465_v3 = vld [vmem:[#allocation13_spill] sm:$0xff]  ;;  %v10466_v39 = vld [vmem:[#allocation19_spill] sm:$0xff] }
 0x14d   : > { %2280 = vmatprep.subr.bf16.mxu1 %v10442_v40  ;;  %v8322_v61 = vrot.slane %v7864_v16, 2  ;;  %v1201_v42 = vrot.slane %v10466_v39, 2  ;;  %v8335_v0 = vrot.slane %v10469_v36, 2  ;;  %v10474_v39 = vld [vmem:[#allocation36_spill] sm:$0xff]  ;;  %v8348_v13 = vrot.slane %v10475_v33, 2  ;;  %v10481_v33 = vld [vmem:[#allocation46_spill] sm:$0xff] }
 0x14e   : > { %6853 = vrot.lane.b32.xlu1 %v6852_v46, %s7317_s14 }
 0x14f   : > { %6878 = vrot.lane.b32.xlu0 %v6877_v55, %s7317_s14  ;;  %v1834_v55 = vsel %vm979_vm6, %v8012_v21, %v1833_v59  ;;  %v6872_v59 = vpack.i.bf16 %v1814_v37, %v7926_v28  ;;  %v1176_v37 = vrot.slane %v7754_v53, 2  ;;  %v1191_v53 = vrot.slane %v7851_v6, 2  ;;  %v10470_v6 = vld [vmem:[#allocation27_spill] sm:$0xff] }
 0x150   : > { %v6892_v46 = vpack.i.bf16 %v1834_v55, %v8031_v63  ;;  %v1186_v55 = vrot.slane %v7802_v27, 2  ;;  %v10467_v27 = vld [vmem:[#allocation22_spill] sm:$0xff]  ;;  %v1211_v11 = vrot.slane %v10470_v6, 2  ;;  %v8352_v63 = vrot.slane %v10477_v19, 2 }
 0x151   : > { %v8331_v58 = vrot.slane %v10467_v27, 2  ;;  %v1221_v27 = vrot.slane %v10474_v39, 2  ;;  %v10482_v39 = vld [vmem:[#allocation10_spill] sm:$0xff] }
 0x152   : > { %6863 = vrot.lane.b32.xlu1 %v6862_v25, %s7317_s14  ;;  %v6882_v25 = vpack.i.bf16 %v1824_v29, %v7976_v54  ;;  %v8310_v29 = vsel %vm612_vm1, %v1171_v9, %v8286_v31  ;;  %v8326_v9 = vrot.slane %v10465_v3, 2  ;;  %v10472_v3 = vld [vmem:[#allocation26_spill] sm:$0xff]  ;;  %v10483_v28 = vpack.i.bf16 %v10481_v33, %v10482_v39 }
 0x153   : > { %6888 = vrot.lane.b32.xlu0 %v6887_v38, %s7317_s14  ;;  %v1181_v38 = vrot.slane %v7807_v30, 2  ;;  %v1196_v30 = vrot.slane %v7846_v1, 2  ;;  %v10471_v1 = vld [vmem:[#allocation30_spill] sm:$0xff]  ;;  %v1216_v62 = vrot.slane %v10472_v3, 2  ;;  %v10479_v3 = vld [vmem:[#allocation47_spill] sm:$0xff] }
 0x154   : > { %v8340_v16 = vrot.slane %v10471_v1, 2  ;;  %v10478_v1 = vld [vmem:[#allocation45_spill] sm:$0xff]  ;;  %v8360_v54 = vrot.slane %v10479_v3, 2 }
 0x155   : > { %v1231_v6 = vrot.slane %v10478_v1, 2  ;;  %v8371_v19 = vsel %vm612_vm1, %v1181_v38, %v8313_v20  ;;  %v10484_v1 = vrot.slane %v8002_v17, 2  ;;  %v8396_v38 = vsel %vm612_vm1, %v1196_v30, %v8326_v9 }
 0x156   : > { %6873 = vrot.lane.b32.xlu1 %v6872_v59, %s7317_s14  ;;  %v8317_v59 = vrot.slane %v7811_v32, 2  ;;  %v10468_v32 = vld [vmem:[#allocation18_spill] sm:$0xff]  ;;  %v8400_v17 = vsel %vm612_vm1, %v1201_v42, %v8331_v58  ;;  %v8419_v30 = vsel %vm612_vm1, %v1221_v27, %v8348_v13 }
 0x157   : > { %6898 = vrot.lane.b32.xlu0 %v6897_v60, %s7317_s14  ;;  %v1206_v2 = vrot.slane %v10468_v32, 2  ;;  %v10473_v60 = vld [vmem:[#allocation28_spill] sm:$0xff]  ;;  %v10476_v32 = vld [vmem:[#allocation35_spill] sm:$0xff]  ;;  %v8381_v3 = vsel %vm612_vm1, %v8286_v31, %v10484_v1  ;;  %v8427_v39 = vsel %vm612_vm1, %v1231_v6, %v8360_v54  ;;  %v10487_v1 = vld [vmem:[#allocation49_spill] sm:$0xff] }
 0x158   : > { %v8344_v34 = vrot.slane %v10473_v60, 2  ;;  %v1226_v36 = vrot.slane %v10476_v32, 2  ;;  %v10480_v60 = vld [vmem:[#allocation9_spill] sm:$0xff]  ;;  %v2497_v27 = vld [vmem:[#allocation2 + $0x178] sm:$0x3] }
 0x159   : > { %v8363_v21 = vrot.slane %v10480_v60, 2  ;;  %v10485_v60 = vrot.slane %v8066_v14, 2  ;;  %v8404_v14 = vsel %vm612_vm1, %v1206_v2, %v8335_v0 }
 0x15a   : > { %6883 = vrot.lane.b32.xlu1 %v6882_v25, %s7317_s14  ;;  %v8356_v25 = vsel %vm612_vm1, %v1176_v37, %v8305_v24  ;;  %v8375_v37 = vsel %vm612_vm1, %v1186_v55, %v8317_v59  ;;  %v8411_v55 = vsel %vm612_vm1, %v1211_v11, %v8340_v16  ;;  %v8423_v2 = vsel %vm612_vm1, %v1226_v36, %v8352_v63 }
 0x15b   : > { %6908 = vrot.lane.b32.xlu0 %v10483_v28, %s7317_s14  ;;  %v8387_v33 = vsel %vm612_vm1, %v8305_v24, %v10485_v60  ;;  %v8392_v28 = vsel %vm612_vm1, %v1191_v53, %v8322_v61  ;;  %v8415_v53 = vsel %vm612_vm1, %v1216_v62, %v8344_v34  ;;  %v10486_v11 = vrot.slane %v7719_v18, 2 }
 0x15c   : > { %v2014_v36 = vrot.slane %v8221_v5, 2  ;;  %v10488_v60 = vpack.i.bf16 %v10487_v1, %v7783_v10  ;;  %v10489_v18 = vrot.slane %v8048_v49, 2  ;;  %v10491_v5 = vrot.slane %v8074_v4, 2 }
 0x15d   : > { %v8433_v42 = vsel %vm612_vm1, %v10486_v11, %v8363_v21  ;;  %v10500_v1 = vrot.slane %v8181_v50, 2  ;;  %v2494_v50 = vld [vmem:[#allocation2 + $0x160] sm:$0x3] }
 0x15e   : > { %6893 = vrot.lane.b32.xlu1 %v6892_v46, %s7317_s14  ;;  %v7086_v46 = vld [vmem:[%s10306_s3 + $0xa8] sm:$0xff]   ;;  %v8449_v6 = vsel %vm612_vm1, %v8313_v20, %v10489_v18  ;;  %v8461_v10 = vsel %vm612_vm1, %v8322_v61, %v10491_v5  ;;  %v10494_v5 = vrot.slane %v8210_v43, 2  ;;  %v10496_v43 = vrot.slane %v8212_v35, 2 }
 0x15f   : > { %2281 = vmatpush1.bf16.msra.mxu1 %v7086_v46  ;;  %6918 = vrot.lane.b32.xlu0 %v10488_v60, %s7317_s14  ;;  %v10490_v46 = vrot.slane %v8125_v7, 2  ;;  %v10492_v60 = vrot.slane %v8155_v56, 2  ;;  %v10495_v56 = vrot.slane %v8131_v8, 2  ;;  %v10498_v8 = vld [vmem:[#allocation53_spill] sm:$0xff]  ;;  %v10502_v35 = vrot.slane %v8223_v52, 2 }
 0x160   : > { %2282 = vmatprep.subr.bf16.mxu1 %v10442_v40  ;;  %v8488_v7 = vsel %vm612_vm1, %v8335_v0, %v10494_v5  ;;  %v8506_v5 = vsel %vm612_vm1, %v8344_v34, %v10496_v43  ;;  %v10507_v18 = vrot.slane %v8024_v44, 2  ;;  %v10512_v44 = vld [vmem:[#allocation57_spill] sm:$0xff] }
 0x161   : > { %v8455_v11 = vsel %vm612_vm1, %v8317_v59, %v10490_v46  ;;  %v8474_v4 = vsel %vm612_vm1, %v8326_v9, %v10492_v60  ;;  %v8494_v60 = vsel %vm612_vm1, %v8340_v16, %v10495_v56  ;;  %10497 = vst [vmem:[#allocation13_spill] sm:$0xff] %v8506_v5  ;;  %v10499_v56 = vpack.i.bf16 %v10498_v8, %v7830_v47  ;;  %v2500_v52 = vld [vmem:[#allocation2 + $0x190] sm:$0x3]  ;;  %v10524_v5 = vld [vmem:[#allocation59_spill] sm:$0xff] }
 0x162   : > { %6903 = vrot.lane.b32.xlu1 %v6902_v23, %s7317_s14  ;;  %v10493_v23 = vrot.slane %v8106_v57, 2  ;;  %v8518_v57 = vsel %vm612_vm1, %v8348_v13, %v10500_v1  ;;  %v8524_v43 = vsel %vm612_vm1, %v8352_v63, %v10502_v35  ;;  %v10505_v47 = vpack.i.bf16 %v8135_v48, %v7791_v15  ;;  %v7087_v1 = vld [vmem:[%s10306_s3 + $0xb0] sm:$0xff]   ;;  %v10509_v48 = vld [vmem:[#allocation52_spill] sm:$0xff] }
 0x163   : > { %6928 = vrot.lane.b32.xlu0 %v10499_v56, %s7317_s14  ;;  %10501 = vst [vmem:[#allocation18_spill] sm:$0xff] %v8518_v57  ;;  %10503 = vst [vmem:[#allocation35_spill] sm:$0xff] %v8524_v43  ;;  %v10506_v56 = vld [vmem:[#allocation55_spill] sm:$0xff]  ;;  %v8548_v15 = vsel %vm612_vm1, %v8363_v21, %v10507_v18  ;;  %2283 = vmatpush1.bf16.msra.mxu1 %v7087_v1  ;;  %v10510_v8 = vpack.i.bf16 %v8144_v51, %v7876_v26  ;;  %v10513_v18 = vld [vmem:[#allocation12_spill] sm:$0xff]  ;;  %v2766_v1 = vrot.slane %v8151_v45, 2 }
 0x164   : > { %v8482_v46 = vsel %vm612_vm1, %v8331_v58, %v10493_v23  ;;  %v8528_v23 = vsel %vm612_vm1, %v8360_v54, %v2014_v36  ;;  %v2756_v35 = vrot.slane %v10506_v56, 2  ;;  %10508 = vst [vmem:[#allocation46_spill] sm:$0xff] %v8548_v15  ;;  %v10511_v36 = vld [vmem:[#allocation54_spill] sm:$0xff]  ;;  %v2615_v56 = vrot.slane %v2494_v50, 1  ;;  %2284 = vmatprep.subr.bf16.mxu1 %v10442_v40  ;;  %v10516_v51 = vld [vmem:[#allocation56_spill] sm:$0xff]  ;;  %v10518_v43 = vld [vmem:[#allocation61_spill] sm:$0xff] }
 0x165   : > { %10504 = vst [vmem:[#allocation9_spill] sm:$0xff] %v8528_v23  ;;  %v2771_v49 = vrot.slane %v10511_v36, 2  ;;  %v10514_v62 = vpack.i.bf16 %v10512_v44, %v10513_v18  ;;  %v2016_v15 = vrot.slane %v8234_v22, 2  ;;  %v8567_v26 = vrot.slane %v8236_v41, 2  ;;  %v10520_v41 = vld [vmem:[#allocation58_spill] sm:$0xff]  ;;  %v10521_v22 = vld [vmem:[#allocation24_spill] sm:$0xff] }
 0x166   : > { %6913 = vrot.lane.b32.xlu1 %v10505_v47, %s7317_s14  ;;  %v2761_v47 = vrot.slane %v10509_v48, 2  ;;  %v2776_v48 = vrot.slane %v8165_v12, 2  ;;  %v2791_v36 = vrot.slane %v2494_v50, 2  ;;  %v8572_v23 = vsel %vm612_vm1, %v8322_v61, %v2756_v35  ;;  %v10523_v50 = vld [vmem:[#allocation39_spill] sm:$0xff]  ;;  %v10525_v45 = vld [vmem:[#allocation17_spill] sm:$0xff] }
 0x167   : > { %6938 = vrot.lane.b32.xlu0 %v10510_v8, %s7317_s14  ;;  %10515 = vst [vmem:[#allocation10_spill] sm:$0xff] %v8567_v26  ;;  %v2781_v8 = vrot.slane %v10516_v51, 2  ;;  %10517 = vst [vmem:[#allocation49_spill] sm:$0xff] %v8572_v23  ;;  %v2786_v44 = vrot.slane %v10518_v43, 2  ;;  %v10522_v18 = vpack.i.bf16 %v10520_v41, %v10521_v22  ;;  %v2616_v51 = vsel %vm979_vm6, %v10523_v50, %v2615_v56  ;;  %v10536_v50 = vld [vmem:[#allocation32_spill] sm:$0xff]  ;;  %v10543_v43 = vld [vmem:[#allocation65_spill] sm:$0xff] }
 0x168   : > { %v8579_v12 = vsel %vm612_vm1, %v8326_v9, %v2761_v47  ;;  %v2625_v35 = vrot.slane %v2500_v52, 1  ;;  %v2801_v57 = vrot.slane %v2500_v52, 2  ;;  %v10526_v23 = vpack.i.bf16 %v10524_v5, %v10525_v45  ;;  %v10542_v5 = vld [vmem:[#allocation42_spill] sm:$0xff] }
 0x169   : > { %10519 = vst [vmem:[#allocation53_spill] sm:$0xff] %v8579_v12  ;;  %v8595_v47 = vsel %vm612_vm1, %v2016_v15, %v8567_v26  ;;  %v8599_v41 = vsel %vm612_vm1, %v8331_v58, %v2766_v1  ;;  %v8603_v56 = vsel %vm612_vm1, %v8335_v0, %v2771_v49  ;;  %v8607_v52 = vsel %vm612_vm1, %v8340_v16, %v2776_v48  ;;  %v7088_v49 = vld [vmem:[%s10306_s3 + $0xb8] sm:$0xff]   ;;  %v10544_v15 = vld [vmem:[#allocation63_spill] sm:$0xff] }
 0x16a   : > { %6923 = vrot.lane.b32.xlu1 %v10514_v62, %s7317_s14  ;;  %v2796_v62 = vrot.slane %v2497_v27, 2  ;;  %10527 = vst [vmem:[#allocation55_spill] sm:$0xff] %v8595_v47  ;;  %10528 = vst [vmem:[#allocation52_spill] sm:$0xff] %v8599_v41  ;;  %v8617_v1 = vsel %vm612_vm1, %v8344_v34, %v2781_v8  ;;  %v8623_v48 = vsel %vm612_vm1, %v8348_v13, %v2786_v44  ;;  %2285 = vmatpush1.bf16.msra.mxu1 %v7088_v49  ;;  %v10552_v49 = vld [vmem:[#allocation51_spill] sm:$0xff] }
 0x16b   : > { %6948 = vrot.lane.b32.xlu0 %v10522_v18, %s7317_s14  ;;  %10529 = vst [vmem:[#allocation54_spill] sm:$0xff] %v8603_v56  ;;  %10530 = vst [vmem:[#allocation57_spill] sm:$0xff] %v8607_v52  ;;  %v8627_v45 = vsel %vm612_vm1, %v8352_v63, %v2791_v36  ;;  %v10535_v18 = vld [vmem:[#allocation60_spill] sm:$0xff]  ;;  %v6967_v44 = vpack.i.bf16 %v2616_v51, %v10542_v5  ;;  %v2626_v36 = vsel %vm979_vm6, %v10543_v43, %v2625_v35  ;;  %v10550_v35 = vld [vmem:[#allocation43_spill] sm:$0xff] }
 0x16c   : > { %10531 = vst [vmem:[#allocation12_spill] sm:$0xff] %v8617_v1  ;;  %10532 = vst [vmem:[#allocation56_spill] sm:$0xff] %v8623_v48  ;;  %v8631_v22 = vsel %vm612_vm1, %v8360_v54, %v2796_v62  ;;  %v10537_v8 = vpack.i.bf16 %v10535_v18, %v10536_v50  ;;  %v8648_v62 = vsel %vm612_vm1, %v8567_v26, %v2801_v57  ;;  %v10539_v18 = vld [vmem:[#allocation62_spill] sm:$0xff]  ;;  %v10540_v50 = vld [vmem:[#allocation25_spill] sm:$0xff]  ;;  %3049 = vmatprep.subr.bf16.mxu1 %v10442_v40 }
 0x16d   : > { %10533 = vst [vmem:[#allocation61_spill] sm:$0xff] %v8627_v45  ;;  %10534 = vst [vmem:[#allocation58_spill] sm:$0xff] %v8631_v22  ;;  %v2620_v57 = vrot.slane %v2497_v27, 1  ;;  %v10545_v22 = vld [vmem:[#allocation33_spill] sm:$0xff]  ;;  %v10549_v5 = vld [vmem:[#allocation64_spill] sm:$0xff] }
 0x16e   : > { %6933 = vrot.lane.b32.xlu1 %v10526_v23, %s7317_s14  ;;  %10538 = vst [vmem:[#allocation24_spill] sm:$0xff] %v8648_v62  ;;  %v10546_v45 = vpack.i.bf16 %v10544_v15, %v10545_v22  ;;  %v10551_v43 = vpack.i.bf16 %v10549_v5, %v10550_v35  ;;  %v8674_v27 = vld [vmem:[#allocation2 + $0x38] sm:$0xff]  ;;  %v7210_v15 = vld [vmem:[#allocation2 + $0x40] sm:$0x3]  ;;  %v8678_v22 = vld [vmem:[#allocation2 + $0x30] sm:$0xff] }
 0x16f   : > { %6958 = vrot.lane.b32.xlu0 %v10537_v8, %s7317_s14  ;;  %v10541_v8 = vpack.i.bf16 %v10539_v18, %v10540_v50  ;;  %v10547_v18 = vld [vmem:[#allocation66_spill] sm:$0xff]  ;;  %v1167_v23 = vrot.slane %v8674_v27, 2 }
 0x170   : > { %v6977_v50 = vpack.i.bf16 %v2626_v36, %v10547_v18  ;;  %v1166_v36 = vrot.slane %v8678_v22, 2  ;;  %v8683_v35 = vld [vmem:[#allocation2 + $0x18] sm:$0xff] }
 0x172   : > { %6943 = vrot.lane.b32.xlu1 %v10541_v8, %s7317_s14  ;;  %v10548_v8 = vld [vmem:[#allocation50_spill] sm:$0xff]  ;;  %v1168_v5 = vsel %vm612_vm1, %v1166_v36, %v1167_v23 }
 0x173   : > { %6968 = vrot.lane.b32.xlu0 %v6967_v44, %s7317_s14  ;;  %v2621_v51 = vsel %vm979_vm6, %v10548_v8, %v2620_v57 }
 0x174   : > { %v6972_v44 = vpack.i.bf16 %v2621_v51, %v10552_v49  ;;  %v8687_v49 = vld [vmem:[#allocation2 + $0x20] sm:$0xff] }
 0x176   : > { %6953 = vrot.lane.b32.xlu1 %v10546_v45, %s7317_s14  ;;  %v1169_v45 = vrot.slane %v7210_v15, 2 }
 0x177   : > { %6978 = vrot.lane.b32.xlu0 %v6977_v50, %s7317_s14 }
 0x178   : > { %v6759_v8 = vpop.permute.xlu1 %6758  ;;  %v1170_v51 = vsel %vm612_vm1, %v1167_v23, %v1169_v45 }
 0x179   : > { %v6761_v62 = vunpack.i.h.bf16 %v6759_v8  ;;  %v6760_v48 = vunpack.i.l.bf16 %v6759_v8  ;;  %v1305_v1 = vpack.c.bf16 %v1170_v51, %v1168_v5  ;;  %v7215_v5 = vld [vmem:[#allocation2 + $0x70] sm:$0x3] }
 0x17a   : > { %6963 = vrot.lane.b32.xlu1 %v10551_v43, %s7317_s14  ;;  %v1179_v51 = vrot.slane %v7215_v5, 2 }
 0x17b   : > { %v1272_v23 = vsel %vm332_vm2, %v8678_v22, %v6760_v48  ;;  %v1273_v45 = vsel %vm332_vm2, %v8674_v27, %v6761_v62  ;;  %v8704_v62 = vld [vmem:[#allocation2 + $0x50] sm:$0xff] }
 0x17c   : > { %v6754_v57 = vpop.permute.xlu0 %6753 }
 0x17d   : > { %v6756_v18 = vunpack.i.h.bf16 %v6754_v57  ;;  %v6755_v50 = vunpack.i.l.bf16 %v6754_v57  ;;  %v7214_v57 = vld [vmem:[#allocation2 + $0x58] sm:$0x3] }
 0x17e   : > { %6973 = vrot.lane.b32.xlu1 %v6972_v44, %s7317_s14  ;;  %v1174_v52 = vrot.slane %v7214_v57, 2 }
 0x17f   : > { %v1270_v43 = vsel %vm332_vm2, %v8683_v35, %v6755_v50  ;;  %v1271_v44 = vsel %vm332_vm2, %v8687_v49, %v6756_v18  ;;  %v1304_v18 = vpack.c.bf16 %v1273_v45, %v1272_v23 }
 0x180   : > { %v1302_v15 = vpack.c.bf16 %v1271_v44, %v1270_v43  ;;  %v1175_v50 = vsel %vm612_vm1, %v8286_v31, %v1174_v52  ;;  %v6769_v52 = vpop.permute.xlu0 %6768 }
 0x181   : > { %v6764_v36 = vpop.permute.xlu1 %6763  ;;  %v1307_v8 = vpack.c.bf16 %v1175_v50, %v8310_v29  ;;  %v6771_v23 = vunpack.i.h.bf16 %v6769_v52  ;;  %v6770_v45 = vunpack.i.l.bf16 %v6769_v52  ;;  %v10553_v50 = vld [vmem:[#allocation11_spill] sm:$0xff] }
 0x182   : > { %1517 = vmatmul.mubr.bf16.gmra.mrb[4].mxu1 %v1302_v15  ;;  %v6766_v43 = vunpack.i.h.bf16 %v6764_v36  ;;  %v6765_v44 = vunpack.i.l.bf16 %v6764_v36  ;;  %v1180_v15 = vsel %vm612_vm1, %v8305_v24, %v1179_v51 }
 0x183   : > { %5781 = vmatprep.mubr.msk.bf16.mxu1 %vm332_vm2, %v1305_v1  ;;  %v8700_v1 = vld [vmem:[#allocation2 + $0x48] sm:$0xff]  ;;  %v1309_v36 = vpack.c.bf16 %v1180_v15, %v8356_v25 }
 0x184   : > { %v1274_v48 = vsel %vm332_vm2, %v8700_v1, %v6765_v44  ;;  %v1275_v31 = vsel %vm332_vm2, %v8704_v62, %v6766_v43  ;;  %v8713_v44 = vld [vmem:[#allocation2 + $0x60] sm:$0xff]  ;;  %v8717_v43 = vld [vmem:[#allocation2 + $0x68] sm:$0xff] }
 0x185   : > { %v1306_v57 = vpack.c.bf16 %v1275_v31, %v1274_v48  ;;  %v1277_v24 = vsel %vm332_vm2, %v8717_v43, %v6771_v23  ;;  %v8729_v23 = vld [vmem:[#allocation2 + $0x80] sm:$0xff] }
 0x189   : > { %v6774_v5 = vpop.permute.xlu1 %6773 }
 0x18a   : > { %1525 = vmatmul.mubr.bf16.gmra.mrb[8].mxu1 %v1304_v18  ;;  %v1184_v18 = vrot.slane %v10553_v50, 2  ;;  %v6776_v31 = vunpack.i.h.bf16 %v6774_v5  ;;  %v6775_v52 = vunpack.i.l.bf16 %v6774_v5 }
 0x18b   : > { %5782 = vmatprep.mubr.msk.bf16.mxu1 %vm332_vm2, %v1307_v8  ;;  %v1276_v8 = vsel %vm332_vm2, %v8713_v44, %v6770_v45  ;;  %v8725_v45 = vld [vmem:[#allocation2 + $0x78] sm:$0xff] }
 0x18c   : > { %v1185_v51 = vsel %vm612_vm1, %v8313_v20, %v1184_v18  ;;  %v1308_v48 = vpack.c.bf16 %v1277_v24, %v1276_v8  ;;  %v1278_v50 = vsel %vm332_vm2, %v8725_v45, %v6775_v52  ;;  %v1279_v20 = vsel %vm332_vm2, %v8729_v23, %v6776_v31  ;;  %v6779_v18 = vpop.permute.xlu0 %6778  ;;  %v8738_v52 = vld [vmem:[#allocation2 + $0x90] sm:$0xff]  ;;  %v8742_v31 = vld [vmem:[#allocation2 + $0x98] sm:$0xff] }
 0x18d   : > { %v1311_v15 = vpack.c.bf16 %v1185_v51, %v8371_v19  ;;  %v1310_v24 = vpack.c.bf16 %v1279_v20, %v1278_v50  ;;  %v6781_v5 = vunpack.i.h.bf16 %v6779_v18  ;;  %v6780_v51 = vunpack.i.l.bf16 %v6779_v18 }
 0x18f   : > { %v1280_v56 = vsel %vm332_vm2, %v8738_v52, %v6780_v51  ;;  %v8751_v51 = vld [vmem:[#allocation2 + $0xa8] sm:$0xff] }
 0x190   : > { %v6789_v47 = vpop.permute.xlu0 %6788 }
 0x192   : > { %1533 = vmatmul.mubr.bf16.gmra.mrb[12].mxu1 %v1306_v57  ;;  %v7220_v57 = vld [vmem:[#allocation2 + $0xa0] sm:$0x3] }
 0x193   : > { %5783 = vmatprep.mubr.msk.bf16.mxu1 %vm332_vm2, %v1309_v36  ;;  %v1189_v36 = vrot.slane %v7220_v57, 2 }
 0x195   : > { %v1190_v8 = vsel %vm612_vm1, %v8317_v59, %v1189_v36  ;;  %v1281_v59 = vsel %vm332_vm2, %v8742_v31, %v6781_v5  ;;  %v6784_v36 = vpop.permute.xlu1 %6783  ;;  %v10556_v5 = vld [vmem:[#allocation15_spill] sm:$0xff] }
 0x196   : > { %v1312_v20 = vpack.c.bf16 %v1281_v59, %v1280_v56  ;;  %v6786_v18 = vunpack.i.h.bf16 %v6784_v36  ;;  %v6790_v59 = vunpack.i.l.bf16 %v6789_v47 }
 0x198   : > { %v1283_v12 = vsel %vm332_vm2, %v10556_v5, %v6786_v18  ;;  %v8766_v18 = vld [vmem:[#allocation2 + $0xc8] sm:$0xff] }
 0x199   : > { %v6799_v26 = vpop.permute.xlu0 %6798 }
 0x19a   : > { %1541 = vmatmul.mubr.bf16.gmra.mrb[16].mxu1 %v1308_v48  ;;  %v1313_v48 = vpack.c.bf16 %v1190_v8, %v8375_v37  ;;  %v6785_v8 = vunpack.i.l.bf16 %v6784_v36 }
 0x19b   : > { %5784 = vmatprep.mubr.msk.bf16.mxu1 %vm332_vm2, %v1311_v15  ;;  %v10554_v15 = vld [vmem:[#allocation16_spill] sm:$0xff] }
 0x19c   : > { %v1194_v57 = vrot.slane %v10554_v15, 2  ;;  %v1282_v41 = vsel %vm332_vm2, %v8751_v51, %v6785_v8 }
 0x19d   : > { %v1314_v56 = vpack.c.bf16 %v1283_v12, %v1282_v41  ;;  %v6794_v12 = vpop.permute.xlu1 %6793 }
 0x19e   : > { %v1195_v50 = vsel %vm612_vm1, %v8322_v61, %v1194_v57  ;;  %v6791_v57 = vunpack.i.h.bf16 %v6789_v47 }
 0x1a2   : > { %1549 = vmatmul.mubr.bf16.gmra.mrb[20].mxu1 %v1310_v24  ;;  %v1315_v24 = vpack.c.bf16 %v1195_v50, %v8392_v28  ;;  %v10557_v50 = vld [vmem:[#allocation23_spill] sm:$0xff] }
 0x1a3   : > { %5785 = vmatprep.mubr.msk.bf16.mxu1 %vm332_vm2, %v1313_v48  ;;  %v10555_v48 = vld [vmem:[#allocation14_spill] sm:$0xff] }
 0x1a4   : > { %v1199_v15 = vrot.slane %v10555_v48, 2  ;;  %v6796_v48 = vunpack.i.h.bf16 %v6794_v12 }
 0x1a6   : > { %v1200_v61 = vsel %vm612_vm1, %v8326_v9, %v1199_v15  ;;  %v1285_v9 = vsel %vm332_vm2, %v8766_v18, %v6791_v57  ;;  %v6795_v15 = vunpack.i.l.bf16 %v6794_v12 }
 0x1a7   : > { %v1317_v36 = vpack.c.bf16 %v1200_v61, %v8396_v38  ;;  %v10558_v61 = vld [vmem:[#allocation21_spill] sm:$0xff] }
 0x1aa   : > { %1557 = vmatmul.mubr.bf16.gmra.mrb[24].mxu1 %v1312_v20  ;;  %v1204_v20 = vrot.slane %v10557_v50, 2  ;;  %v10560_v50 = vld [vmem:[#allocation22_spill] sm:$0xff] }
 0x1ab   : > { %5786 = vmatprep.mubr.msk.bf16.mxu1 %vm332_vm2, %v1315_v24  ;;  %v8762_v24 = vld [vmem:[#allocation2 + $0xc0] sm:$0xff]  ;;  %v1287_v57 = vsel %vm332_vm2, %v10560_v50, %v6796_v48  ;;  %v10562_v48 = vld [vmem:[#allocation20_spill] sm:$0xff] }
 0x1ac   : > { %v1284_v8 = vsel %vm332_vm2, %v8762_v24, %v6790_v59  ;;  %v1205_v47 = vsel %vm612_vm1, %v8331_v58, %v1204_v20  ;;  %v10559_v59 = vld [vmem:[#allocation19_spill] sm:$0xff] }
 0x1ad   : > { %v1316_v41 = vpack.c.bf16 %v1285_v9, %v1284_v8  ;;  %v1319_v5 = vpack.c.bf16 %v1205_v47, %v8400_v17  ;;  %v6801_v8 = vunpack.i.h.bf16 %v6799_v26  ;;  %v6800_v9 = vunpack.i.l.bf16 %v6799_v26  ;;  %v10561_v47 = vld [vmem:[#allocation31_spill] sm:$0xff] }
 0x1b2   : > { %1565 = vmatmul.mubr.bf16.gmra.mrb[28].mxu1 %v1314_v56  ;;  %v1209_v56 = vrot.slane %v10558_v61, 2  ;;  %v1214_v61 = vrot.slane %v10561_v47, 2  ;;  %v6809_v47 = vpop.permute.xlu0 %6808 }
 0x1b3   : > { %5787 = vmatprep.mubr.msk.bf16.mxu1 %vm332_vm2, %v1317_v36  ;;  %v1286_v36 = vsel %vm332_vm2, %v10559_v59, %v6795_v15  ;;  %v6804_v59 = vpop.permute.xlu1 %6803 }
 0x1b4   : > { %v1210_v58 = vsel %vm612_vm1, %v8335_v0, %v1209_v56  ;;  %v1318_v20 = vpack.c.bf16 %v1287_v57, %v1286_v36  ;;  %v1215_v0 = vsel %vm612_vm1, %v8340_v16, %v1214_v61  ;;  %v6806_v56 = vunpack.i.h.bf16 %v6804_v59  ;;  %v10563_v57 = vld [vmem:[#allocation29_spill] sm:$0xff] }
 0x1b5   : > { %v1321_v12 = vpack.c.bf16 %v1210_v58, %v8404_v14  ;;  %v6805_v36 = vunpack.i.l.bf16 %v6804_v59  ;;  %v1323_v50 = vpack.c.bf16 %v1215_v0, %v8411_v55  ;;  %v1219_v58 = vrot.slane %v10563_v57, 2  ;;  %v10566_v59 = vld [vmem:[#allocation41_spill] sm:$0xff] }
 0x1b6   : > { %v1224_v0 = vrot.slane %v10566_v59, 2 }
 0x1b7   : > { %v1220_v16 = vsel %vm612_vm1, %v8344_v34, %v1219_v58  ;;  %v6814_v57 = vpop.permute.xlu1 %6813 }
 0x1b8   : > { %v1225_v34 = vsel %vm612_vm1, %v8348_v13, %v1224_v0 }
 0x1ba   : > { %1573 = vmatmul.mubr.bf16.gmra.mrb[32].mxu1 %v1316_v41  ;;  %v8784_v41 = vld [vmem:[#allocation2 + $0xf0] sm:$0xff] }
 0x1bb   : > { %5788 = vmatprep.mubr.msk.bf16.mxu1 %vm332_vm2, %v1319_v5  ;;  %v1288_v15 = vsel %vm332_vm2, %v8784_v41, %v6800_v9  ;;  %v1289_v5 = vsel %vm332_vm2, %v10562_v48, %v6801_v8  ;;  %v6810_v48 = vunpack.i.l.bf16 %v6809_v47 }
 0x1bc   : > { %v1320_v26 = vpack.c.bf16 %v1289_v5, %v1288_v15  ;;  %v6811_v15 = vunpack.i.h.bf16 %v6809_v47  ;;  %v1325_v5 = vpack.c.bf16 %v1220_v16, %v8415_v53  ;;  %v10570_v16 = vld [vmem:[#allocation36_spill] sm:$0xff] }
 0x1c2   : > { %1581 = vmatmul.mubr.bf16.gmra.mrb[36].mxu1 %v1318_v20  ;;  %v10564_v20 = vld [vmem:[#allocation27_spill] sm:$0xff] }
 0x1c3   : > { %5789 = vmatprep.mubr.msk.bf16.mxu1 %vm332_vm2, %v1321_v12  ;;  %v1290_v9 = vsel %vm332_vm2, %v10564_v20, %v6805_v36  ;;  %v10565_v12 = vld [vmem:[#allocation30_spill] sm:$0xff]  ;;  %v6816_v20 = vunpack.i.h.bf16 %v6814_v57 }
 0x1c4   : > { %v1291_v8 = vsel %vm332_vm2, %v10565_v12, %v6806_v56  ;;  %v1327_v12 = vpack.c.bf16 %v1225_v34, %v8419_v30  ;;  %v10573_v34 = vld [vmem:[#allocation37_spill] sm:$0xff] }
 0x1c5   : > { %v1322_v61 = vpack.c.bf16 %v1291_v8, %v1290_v9  ;;  %v6815_v9 = vunpack.i.l.bf16 %v6814_v57  ;;  %v10569_v8 = vld [vmem:[#allocation38_spill] sm:$0xff] }
 0x1c6   : > { %v1229_v47 = vrot.slane %v10569_v8, 2 }
 0x1c8   : > { %v1230_v13 = vsel %vm612_vm1, %v8352_v63, %v1229_v47 }
 0x1ca   : > { %1589 = vmatmul.mubr.bf16.gmra.mrb[40].mxu1 %v1320_v26  ;;  %v10567_v26 = vld [vmem:[#allocation26_spill] sm:$0xff] }
 0x1cb   : > { %5790 = vmatprep.mubr.msk.bf16.mxu1 %vm332_vm2, %v1323_v50  ;;  %v1292_v36 = vsel %vm332_vm2, %v10567_v26, %v6810_v48  ;;  %v10568_v50 = vld [vmem:[#allocation28_spill] sm:$0xff] }
 0x1cc   : > { %v1293_v56 = vsel %vm332_vm2, %v10568_v50, %v6811_v15  ;;  %v10571_v48 = vld [vmem:[#allocation40_spill] sm:$0xff] }
 0x1cd   : > { %v1324_v58 = vpack.c.bf16 %v1293_v56, %v1292_v36  ;;  %v1295_v15 = vsel %vm332_vm2, %v10571_v48, %v6816_v20  ;;  %v1329_v36 = vpack.c.bf16 %v1230_v13, %v8423_v2  ;;  %v10572_v50 = vld [vmem:[#allocation48_spill] sm:$0xff]  ;;  %v6824_v20 = vpop.permute.xlu1 %6823  ;;  %v1942_v48 = vrot.slane %v8687_v49, 2  ;;  %v10576_v13 = vld [vmem:[#allocation47_spill] sm:$0xff] }
 0x1ce   : > { %v1234_v56 = vrot.slane %v10572_v50, 2  ;;  %v6825_v8 = vunpack.i.l.bf16 %v6824_v20 }
 0x1d0   : > { %v1235_v63 = vsel %vm612_vm1, %v8360_v54, %v1234_v56 }
 0x1d1   : > { %v1331_v47 = vpack.c.bf16 %v1235_v63, %v8427_v39  ;;  %v8843_v63 = vld [vmem:[#allocation2 + $0x1a0] sm:$0xff] }
 0x1d2   : > { %1597 = vmatmul.mubr.bf16.gmra.mrb[44].mxu1 %v1322_v61  ;;  %v1294_v61 = vsel %vm332_vm2, %v10570_v16, %v6815_v9  ;;  %v10574_v16 = vld [vmem:[#allocation34_spill] sm:$0xff] }
 0x1d3   : > { %5791 = vmatprep.mubr.msk.bf16.mxu1 %vm332_vm2, %v1325_v5  ;;  %v6819_v5 = vpop.permute.xlu0 %6818  ;;  %v1326_v59 = vpack.c.bf16 %v1295_v15, %v1294_v61  ;;  %v1944_v61 = vrot.slane %v10574_v16, 2  ;;  %v10575_v15 = vld [vmem:[#allocation45_spill] sm:$0xff] }
 0x1d4   : > { %v6821_v0 = vunpack.i.h.bf16 %v6819_v5  ;;  %v6820_v26 = vunpack.i.l.bf16 %v6819_v5  ;;  %v1298_v5 = vsel %vm332_vm2, %v10575_v15, %v6825_v8  ;;  %v2628_v8 = vrot.slane %v8843_v63, 1 }
 0x1d6   : > { %v1296_v57 = vsel %vm332_vm2, %v10476_v32, %v6820_v26  ;;  %v1941_v32 = vrot.slane %v8683_v35, 2  ;;  %v1945_v26 = vsel %vm612_vm1, %v1942_v48, %v1944_v61 }
 0x1da   : > { %1605 = vmatmul.mubr.bf16.gmra.mrb[48].mxu1 %v1324_v58  ;;  %v1297_v58 = vsel %vm332_vm2, %v10573_v34, %v6821_v0  ;;  %v1943_v0 = vsel %vm612_vm1, %v1941_v32, %v1942_v48  ;;  %v10577_v34 = vld [vmem:[#allocation44_spill] sm:$0xff]  ;;  %v6834_v48 = vpop.permute.xlu1 %6833 }
 0x1db   : > { %5792 = vmatprep.mubr.msk.bf16.mxu1 %vm332_vm2, %v1327_v12  ;;  %v1328_v9 = vpack.c.bf16 %v1297_v58, %v1296_v57  ;;  %v6826_v12 = vunpack.i.h.bf16 %v6824_v20  ;;  %v2086_v57 = vpack.c.bf16 %v1945_v26, %v1943_v0  ;;  %v1949_v58 = vrot.slane %v10577_v34, 2  ;;  %v8841_v20 = vld [vmem:[#allocation2 + $0x198] sm:$0xff] }
 0x1dc   : > { %v6836_v0 = vunpack.i.h.bf16 %v6834_v48  ;;  %v6835_v26 = vunpack.i.l.bf16 %v6834_v48 }
 0x1dd   : > { %v1299_v54 = vsel %vm332_vm2, %v10576_v13, %v6826_v12  ;;  %v2627_v12 = vrot.slane %v8841_v20, 1  ;;  %v1950_v32 = vsel %vm612_vm1, %v8363_v21, %v1949_v58  ;;  %v7089_v13 = vld [vmem:[%s10306_s3 + $0xc0] sm:$0xff]   ;;  %v7090_v21 = vld [vmem:[%s10306_s3 + $0xc8] sm:$0xff]  }
 0x1df   : > { %v2629_v15 = vsel %vm979_vm6, %v2627_v12, %v2628_v8  ;;  %v10578_v12 = vpack.c.bf16 %v8381_v3, %v8310_v29  ;;  %v7093_v29 = vld [vmem:[%s10306_s3 + $0xe0] sm:$0xff]  }
 0x1e2   : > { %1613 = vmatmul.mubr.bf16.gmra.mrb[52].mxu1 %v1326_v59  ;;  %v6829_v59 = vpop.permute.xlu0 %6828 }
 0x1e3   : > { %5793 = vmatprep.mubr.msk.bf16.mxu1 %vm332_vm2, %v1329_v36  ;;  %v1330_v36 = vpack.c.bf16 %v1299_v54, %v1298_v5  ;;  %v6831_v50 = vunpack.i.h.bf16 %v6829_v59  ;;  %v6830_v56 = vunpack.i.l.bf16 %v6829_v59 }
 0x1e5   : > { %v2054_v16 = vsel %vm332_vm2, %v8687_v49, %v6831_v50  ;;  %v2053_v61 = vsel %vm332_vm2, %v8683_v35, %v6830_v56  ;;  %v2088_v49 = vpack.c.bf16 %v1950_v32, %v8433_v42  ;;  %v2055_v35 = vsel %vm332_vm2, %v8678_v22, %v6835_v26  ;;  %v7091_v56 = vld [vmem:[%s10306_s3 + $0xd0] sm:$0xff]  }
 0x1e6   : > { %v2085_v59 = vpack.c.bf16 %v2054_v16, %v2053_v61  ;;  %v6839_v50 = vpop.permute.xlu0 %6838  ;;  %v6844_v61 = vpop.permute.xlu1 %6843 }
 0x1e7   : > { %v6841_v34 = vunpack.i.h.bf16 %v6839_v50  ;;  %v6840_v58 = vunpack.i.l.bf16 %v6839_v50  ;;  %v6846_v48 = vunpack.i.h.bf16 %v6844_v61  ;;  %v6845_v32 = vunpack.i.l.bf16 %v6844_v61 }
 0x1e9   : > { %v2058_v16 = vsel %vm332_vm2, %v8704_v62, %v6841_v34  ;;  %v10581_v34 = vpack.c.bf16 %v8455_v11, %v8375_v37  ;;  %v7099_v37 = vld [vmem:[%s10306_s3 + $0x110] sm:$0xff]  }
 0x1ea   : > { %1621 = vmatmul.mubr.bf16.gmra.mrb[56].mxu1 %v1328_v9  ;;  %v8845_v9 = vld [vmem:[#allocation2 + $0x1a8] sm:$0x3]  ;;  %v6854_v50 = vpop.permute.xlu1 %6853 }
 0x1eb   : > { %5794 = vmatprep.mubr.msk.bf16.mxu1 %vm332_vm2, %v1331_v47  ;;  %v2630_v47 = vrot.slane %v8845_v9, 1 }
 0x1ed   : > { %v2631_v5 = vsel %vm979_vm6, %v2628_v8, %v2630_v47  ;;  %v7092_v8 = vld [vmem:[%s10306_s3 + $0xd8] sm:$0xff]   ;;  %v2057_v47 = vsel %vm332_vm2, %v8700_v1, %v6840_v58  ;;  %v7098_v58 = vld [vmem:[%s10306_s3 + $0x108] sm:$0xff]  }
 0x1ee   : > { %v6982_v54 = vpack.i.bf16 %v2631_v5, %v2629_v15  ;;  %v2089_v3 = vpack.c.bf16 %v2058_v16, %v2057_v47  ;;  %v10579_v15 = vpack.c.bf16 %v8387_v33, %v8356_v25  ;;  %v7094_v5 = vld [vmem:[%s10306_s3 + $0xe8] sm:$0xff]   ;;  %v7095_v25 = vld [vmem:[%s10306_s3 + $0xf0] sm:$0xff]  }
 0x1f0   : > { %6983 = vrot.lane.b32.xlu1 %v6982_v54, %s7317_s14  ;;  %v2060_v54 = vsel %vm332_vm2, %v8717_v43, %v6846_v48 }
 0x1f2   : > { %1629 = vmatmul.mubr.bf16.gmra.mrb[60].mxu1 %v1330_v36  ;;  %v2056_v36 = vsel %vm332_vm2, %v8674_v27, %v6836_v0 }
 0x1f3   : > { %5831 = vmatprep.mubr.msk.bf16.mxu1 %vm332_vm2, %v2086_v57  ;;  %v2087_v57 = vpack.c.bf16 %v2056_v36, %v2055_v35 }
 0x1fa   : > { %2295 = vmatmul.mubr.bf16.vlgmr.msra.gmra.mrb[0].mxu1 %v2085_v59  ;;  %v6849_v59 = vpop.permute.xlu0 %6848 }
 0x1fb   : > { %5832 = vmatprep.mubr.msk.bf16.mxu1 %vm332_vm2, %v2088_v49  ;;  %3050 = vmatpush1.bf16.msra.mxu1 %v7089_v13  ;;  %v2059_v13 = vsel %vm332_vm2, %v8713_v44, %v6845_v32  ;;  %v6851_v0 = vunpack.i.h.bf16 %v6849_v59  ;;  %v6850_v26 = vunpack.i.l.bf16 %v6849_v59  ;;  %v10580_v49 = vpack.c.bf16 %v8449_v6, %v8371_v19  ;;  %v7097_v19 = vld [vmem:[%s10306_s3 + $0x100] sm:$0xff]   ;;  %v8950_v32 = vld [vmem:[#allocation2 + $0xb0] sm:$0xff] }
 0x1fc   : > { %3051 = vmatprep.subr.bf16.mxu1 %v10442_v40  ;;  %v2091_v33 = vpack.c.bf16 %v2060_v54, %v2059_v13  ;;  %v10583_v59 = vpack.c.bf16 %v8474_v4, %v8396_v38 }
 0x1fd   : > { %v2061_v35 = vsel %vm332_vm2, %v8725_v45, %v6850_v26  ;;  %v2062_v36 = vsel %vm332_vm2, %v8729_v23, %v6851_v0 }
 0x1fe   : > { %v2093_v6 = vpack.c.bf16 %v2062_v36, %v2061_v35  ;;  %v6859_v47 = vpop.permute.xlu0 %6858  ;;  %v10584_v35 = vpack.c.bf16 %v8482_v46, %v8400_v17  ;;  %v8966_v36 = vld [vmem:[#allocation2 + $0xd8] sm:$0xff]  ;;  %v10585_v46 = vpack.c.bf16 %v8488_v7, %v8404_v14  ;;  %v8988_v7 = vld [vmem:[#allocation2 + $0x108] sm:$0xff] }
 0x1ff   : > { %3052 = vmatpush1.bf16.msra.mxu1 %v7090_v21  ;;  %v7096_v21 = vld [vmem:[%s10306_s3 + $0xf8] sm:$0xff]   ;;  %v6861_v16 = vunpack.i.h.bf16 %v6859_v47  ;;  %v6860_v61 = vunpack.i.l.bf16 %v6859_v47 }
 0x200   : > { %3053 = vmatprep.subr.bf16.mxu1 %v10442_v40 }
 0x201   : > { %v2065_v48 = vsel %vm332_vm2, %v8751_v51, %v6860_v61  ;;  %v10586_v61 = vpack.c.bf16 %v8494_v60, %v8411_v55 }
 0x202   : > { %2303 = vmatmul.mubr.bf16.gmra.mrb[4].mxu1 %v2087_v57  ;;  %v6855_v57 = vunpack.i.l.bf16 %v6854_v50  ;;  %v6869_v0 = vpop.permute.xlu0 %6868 }
 0x203   : > { %5833 = vmatprep.mubr.msk.bf16.mxu1 %vm332_vm2, %v10578_v12  ;;  %3054 = vmatpush1.bf16.msra.mxu1 %v7091_v56  ;;  %v6856_v56 = vunpack.i.h.bf16 %v6854_v50  ;;  %v8970_v50 = vld [vmem:[#allocation2 + $0xe0] sm:$0xff] }
 0x204   : > { %3055 = vmatprep.subr.bf16.mxu1 %v10442_v40  ;;  %v2063_v12 = vsel %vm332_vm2, %v8738_v52, %v6855_v57 }
 0x206   : > { %v6879_v47 = vpop.permute.xlu0 %6878 }
 0x207   : > { %3056 = vmatpush1.bf16.msra.mxu1 %v7092_v8  ;;  %v2064_v8 = vsel %vm332_vm2, %v8742_v31, %v6856_v56 }
 0x208   : > { %3057 = vmatprep.subr.bf16.mxu1 %v10442_v40  ;;  %v2095_v11 = vpack.c.bf16 %v2064_v8, %v2063_v12  ;;  %v8980_v12 = vld [vmem:[#allocation2 + $0xf8] sm:$0xff] }
 0x20a   : > { %2311 = vmatmul.mubr.bf16.gmra.mrb[8].mxu1 %v2089_v3  ;;  %v7100_v3 = vld [vmem:[%s10306_s3 + $0x118] sm:$0xff]  }
 0x20b   : > { %5834 = vmatprep.mubr.msk.bf16.mxu1 %vm332_vm2, %v10579_v15  ;;  %3058 = vmatpush1.bf16.msra.mxu1 %v7093_v29  ;;  %v10582_v29 = vpack.c.bf16 %v8461_v10, %v8392_v28  ;;  %v2066_v15 = vsel %vm332_vm2, %v8950_v32, %v6861_v16  ;;  %v6880_v16 = vunpack.i.l.bf16 %v6879_v47 }
 0x20c   : > { %3059 = vmatprep.subr.bf16.mxu1 %v10442_v40  ;;  %v2097_v10 = vpack.c.bf16 %v2066_v15, %v2065_v48 }
 0x20f   : > { %3060 = vmatpush1.bf16.msra.mxu1 %v7094_v5  ;;  %v6864_v5 = vpop.permute.xlu1 %6863 }
 0x210   : > { %3061 = vmatprep.subr.bf16.mxu1 %v10442_v40  ;;  %v6866_v13 = vunpack.i.h.bf16 %v6864_v5  ;;  %v6865_v54 = vunpack.i.l.bf16 %v6864_v5 }
 0x212   : > { %2319 = vmatmul.mubr.bf16.gmra.mrb[12].mxu1 %v2091_v33  ;;  %v2068_v33 = vsel %vm332_vm2, %v8766_v18, %v6866_v13 }
 0x213   : > { %5835 = vmatprep.mubr.msk.bf16.mxu1 %vm332_vm2, %v10580_v49  ;;  %3062 = vmatpush1.bf16.msra.mxu1 %v7095_v25  ;;  %v2067_v25 = vsel %vm332_vm2, %v8762_v24, %v6865_v54  ;;  %v6871_v49 = vunpack.i.h.bf16 %v6869_v0  ;;  %v10587_v54 = vld [vmem:[#allocation13_spill] sm:$0xff] }
 0x214   : > { %3063 = vmatprep.subr.bf16.mxu1 %v10442_v40  ;;  %v2099_v26 = vpack.c.bf16 %v2068_v33, %v2067_v25  ;;  %v10588_v60 = vpack.c.bf16 %v10587_v54, %v8415_v53  ;;  %v9004_v33 = vld [vmem:[#allocation2 + $0x128] sm:$0xff]  ;;  %v7241_v54 = vld [vmem:[#allocation2 + $0x190] sm:$0x3] }
 0x217   : > { %3064 = vmatpush1.bf16.msra.mxu1 %v7096_v21  ;;  %v6870_v21 = vunpack.i.l.bf16 %v6869_v0 }
 0x218   : > { %3065 = vmatprep.subr.bf16.mxu1 %v10442_v40 }
 0x219   : > { %v2069_v4 = vsel %vm332_vm2, %v8966_v36, %v6870_v21 }
 0x21a   : > { %2327 = vmatmul.mubr.bf16.gmra.mrb[16].mxu1 %v2093_v6  ;;  %v6874_v6 = vpop.permute.xlu1 %6873 }
 0x21b   : > { %5836 = vmatprep.mubr.msk.bf16.mxu1 %vm332_vm2, %v10581_v34  ;;  %3066 = vmatpush1.bf16.msra.mxu1 %v7097_v19  ;;  %v2070_v19 = vsel %vm332_vm2, %v8970_v50, %v6871_v49  ;;  %v6876_v57 = vunpack.i.h.bf16 %v6874_v6  ;;  %v6875_v34 = vunpack.i.l.bf16 %v6874_v6  ;;  %v9012_v6 = vld [vmem:[#allocation2 + $0x138] sm:$0xff] }
 0x21c   : > { %3067 = vmatprep.subr.bf16.mxu1 %v10442_v40  ;;  %v2101_v56 = vpack.c.bf16 %v2070_v19, %v2069_v4  ;;  %v10589_v4 = vld [vmem:[#allocation18_spill] sm:$0xff] }
 0x21d   : > { %v2072_v8 = vsel %vm332_vm2, %v8980_v12, %v6876_v57  ;;  %v10590_v19 = vpack.c.bf16 %v10589_v4, %v8419_v30  ;;  %v9016_v57 = vld [vmem:[#allocation2 + $0x140] sm:$0xff] }
 0x21e   : > { %v6884_v15 = vpop.permute.xlu1 %6883 }
 0x21f   : > { %3068 = vmatpush1.bf16.msra.mxu1 %v7098_v58  ;;  %v2071_v58 = vsel %vm332_vm2, %v8784_v41, %v6875_v34  ;;  %v6885_v13 = vunpack.i.l.bf16 %v6884_v15 }
 0x220   : > { %3069 = vmatprep.subr.bf16.mxu1 %v10442_v40 }
 0x222   : > { %2335 = vmatmul.mubr.bf16.gmra.mrb[20].mxu1 %v2095_v11  ;;  %v6881_v11 = vunpack.i.h.bf16 %v6879_v47 }
 0x223   : > { %5837 = vmatprep.mubr.msk.bf16.mxu1 %vm332_vm2, %v10582_v29  ;;  %3070 = vmatpush1.bf16.msra.mxu1 %v7099_v37  ;;  %v2103_v37 = vpack.c.bf16 %v2072_v8, %v2071_v58  ;;  %v2073_v29 = vsel %vm332_vm2, %v8988_v7, %v6880_v16  ;;  %v9024_v16 = vld [vmem:[#allocation2 + $0x150] sm:$0xff] }
 0x224   : > { %3071 = vmatprep.subr.bf16.mxu1 %v10442_v40 }
 0x227   : > { %3072 = vmatpush1.bf16.msra.mxu1 %v7100_v3  ;;  %v8992_v3 = vld [vmem:[#allocation2 + $0x110] sm:$0xff] }
 0x228   : > { %v2074_v48 = vsel %vm332_vm2, %v8992_v3, %v6881_v11 }
 0x229   : > { %v2105_v5 = vpack.c.bf16 %v2074_v48, %v2073_v29  ;;  %v9028_v29 = vld [vmem:[#allocation2 + $0x158] sm:$0xff] }
 0x22a   : > { %2343 = vmatmul.mubr.bf16.gmra.mrb[24].mxu1 %v2097_v10  ;;  %v6886_v10 = vunpack.i.h.bf16 %v6884_v15 }
 0x22b   : > { %5838 = vmatprep.mubr.msk.bf16.mxu1 %vm332_vm2, %v10583_v59  ;;  %v9000_v59 = vld [vmem:[#allocation2 + $0x120] sm:$0xff] }
 0x22c   : > { %v2075_v25 = vsel %vm332_vm2, %v9000_v59, %v6885_v13  ;;  %v2076_v0 = vsel %vm332_vm2, %v9004_v33, %v6886_v10 }
 0x22d   : > { %v2107_v49 = vpack.c.bf16 %v2076_v0, %v2075_v25  ;;  %v10593_v25 = vld [vmem:[#allocation9_spill] sm:$0xff] }
 0x22e   : > { %v10594_v0 = vpack.c.bf16 %v10593_v25, %v8427_v39  ;;  %v2733_v25 = vrot.slane %v8700_v1, 2 }
 0x232   : > { %2351 = vmatmul.mubr.bf16.gmra.mrb[28].mxu1 %v2099_v26  ;;  %v6889_v26 = vpop.permute.xlu0 %6888 }
 0x233   : > { %5839 = vmatprep.mubr.msk.bf16.mxu1 %vm332_vm2, %v10584_v35  ;;  %v6891_v21 = vunpack.i.h.bf16 %v6889_v26  ;;  %v6890_v35 = vunpack.i.l.bf16 %v6889_v26  ;;  %v9036_v26 = vld [vmem:[#allocation2 + $0x168] sm:$0xff] }
 0x235   : > { %v2078_v34 = vsel %vm332_vm2, %v9016_v57, %v6891_v21  ;;  %v9040_v21 = vld [vmem:[#allocation2 + $0x170] sm:$0xff] }
 0x236   : > { %v6899_v15 = vpop.permute.xlu0 %6898 }
 0x237   : > { %v6901_v10 = vunpack.i.h.bf16 %v6899_v15  ;;  %v6900_v13 = vunpack.i.l.bf16 %v6899_v15 }
 0x23a   : > { %2359 = vmatmul.mubr.bf16.gmra.mrb[32].mxu1 %v2101_v56  ;;  %v2077_v56 = vsel %vm332_vm2, %v9012_v6, %v6890_v35  ;;  %v2082_v35 = vsel %vm332_vm2, %v9040_v21, %v6901_v10  ;;  %v6909_v15 = vpop.permute.xlu0 %6908 }
 0x23b   : > { %5840 = vmatprep.mubr.msk.bf16.mxu1 %vm332_vm2, %v10585_v46  ;;  %v6894_v46 = vpop.permute.xlu1 %6893  ;;  %v2109_v58 = vpack.c.bf16 %v2078_v34, %v2077_v56  ;;  %v6911_v10 = vunpack.i.h.bf16 %v6909_v15 }
 0x23c   : > { %v6896_v8 = vunpack.i.h.bf16 %v6894_v46  ;;  %v6895_v47 = vunpack.i.l.bf16 %v6894_v46 }
 0x23e   : > { %v2080_v48 = vsel %vm332_vm2, %v9028_v29, %v6896_v8  ;;  %v10596_v8 = vld [vmem:[#allocation55_spill] sm:$0xff] }
 0x23f   : > { %v6904_v4 = vpop.permute.xlu1 %6903 }
 0x240   : > { %v6906_v46 = vunpack.i.h.bf16 %v6904_v4 }
 0x242   : > { %2367 = vmatmul.mubr.bf16.gmra.mrb[36].mxu1 %v2103_v37  ;;  %v10591_v37 = vld [vmem:[#allocation35_spill] sm:$0xff] }
 0x243   : > { %5841 = vmatprep.mubr.msk.bf16.mxu1 %vm332_vm2, %v10586_v61  ;;  %v10592_v11 = vpack.c.bf16 %v10591_v37, %v8423_v2  ;;  %v2079_v61 = vsel %vm332_vm2, %v9024_v16, %v6895_v47  ;;  %v9048_v37 = vld [vmem:[#allocation2 + $0x180] sm:$0xff] }
 0x24a   : > { %2375 = vmatmul.mubr.bf16.gmra.mrb[40].mxu1 %v2105_v5  ;;  %v2111_v5 = vpack.c.bf16 %v2080_v48, %v2079_v61  ;;  %v9052_v61 = vld [vmem:[#allocation2 + $0x188] sm:$0xff] }
 0x24b   : > { %5842 = vmatprep.mubr.msk.bf16.mxu1 %vm332_vm2, %v10588_v60  ;;  %v2019_v60 = vrot.slane %v7241_v54, 2  ;;  %v2084_v48 = vsel %vm332_vm2, %v9052_v61, %v6906_v46  ;;  %v7246_v54 = vld [vmem:[#allocation2 + $0x58] sm:$0x3] }
 0x252   : > { %2383 = vmatmul.mubr.bf16.gmra.mrb[44].mxu1 %v2107_v49  ;;  %v2081_v49 = vsel %vm332_vm2, %v9036_v26, %v6900_v13  ;;  %v6910_v13 = vunpack.i.l.bf16 %v6909_v15  ;;  %v7247_v15 = vld [vmem:[#allocation2 + $0x70] sm:$0x3] }
 0x253   : > { %5843 = vmatprep.mubr.msk.bf16.mxu1 %vm332_vm2, %v10590_v19  ;;  %v10595_v19 = vld [vmem:[#allocation10_spill] sm:$0xff]  ;;  %v2113_v34 = vpack.c.bf16 %v2082_v35, %v2081_v49 }
 0x254   : > { %v2020_v56 = vsel %vm612_vm1, %v10595_v19, %v2019_v60  ;;  %v2736_v60 = vrot.slane %v7246_v54, 2  ;;  %v10597_v49 = vld [vmem:[#allocation46_spill] sm:$0xff]  ;;  %v2840_v19 = vsel %vm332_vm2, %v8678_v22, %v6910_v13  ;;  %v2739_v54 = vrot.slane %v8717_v43, 2 }
 0x255   : > { %v2116_v47 = vpack.c.bf16 %v2020_v56, %v10596_v8  ;;  %v10598_v35 = vpack.c.bf16 %v10597_v49, %v8433_v42  ;;  %v6914_v56 = vpop.permute.xlu1 %6913  ;;  %v2738_v42 = vrot.slane %v8713_v44, 2 }
 0x257   : > { %v2740_v13 = vsel %vm612_vm1, %v2738_v42, %v2739_v54  ;;  %v7249_v42 = vld [vmem:[#allocation2 + $0xa0] sm:$0x3] }
 0x25a   : > { %2391 = vmatmul.mubr.bf16.gmra.mrb[48].mxu1 %v2109_v58  ;;  %v6905_v58 = vunpack.i.l.bf16 %v6904_v4  ;;  %v2841_v4 = vsel %vm332_vm2, %v8674_v27, %v6911_v10  ;;  %v6919_v10 = vpop.permute.xlu0 %6918 }
 0x25b   : > { %5844 = vmatprep.mubr.msk.bf16.mxu1 %vm332_vm2, %v10592_v11  ;;  %v6920_v49 = vunpack.i.l.bf16 %v6919_v10 }
 0x25c   : > { %v2083_v11 = vsel %vm332_vm2, %v9048_v37, %v6905_v58  ;;  %v2872_v58 = vpack.c.bf16 %v2841_v4, %v2840_v19  ;;  %v7248_v4 = vld [vmem:[#allocation2 + $0x88] sm:$0x3] }
 0x25d   : > { %v2746_v19 = vrot.slane %v7248_v4, 2 }
 0x262   : > { %2399 = vmatmul.mubr.bf16.gmra.mrb[52].mxu1 %v2111_v5  ;;  %v2115_v5 = vpack.c.bf16 %v2084_v48, %v2083_v11  ;;  %v6915_v11 = vunpack.i.l.bf16 %v6914_v56 }
 0x263   : > { %5845 = vmatprep.mubr.msk.bf16.mxu1 %vm332_vm2, %v10594_v0  ;;  %v2734_v0 = vrot.slane %v8704_v62, 2 }
 0x264   : > { %v2842_v27 = vsel %vm332_vm2, %v8700_v1, %v6915_v11  ;;  %v2844_v1 = vsel %vm332_vm2, %v8713_v44, %v6920_v49 }
 0x265   : > { %v2737_v46 = vsel %vm612_vm1, %v2734_v0, %v2736_v60 }
 0x26a   : > { %2407 = vmatmul.mubr.bf16.gmra.mrb[56].mxu1 %v2113_v34  ;;  %v2735_v34 = vsel %vm612_vm1, %v2733_v25, %v2734_v0  ;;  %v6921_v0 = vunpack.i.h.bf16 %v6919_v10  ;;  %v6929_v10 = vpop.permute.xlu0 %6928 }
 0x26b   : > { %5846 = vmatprep.mubr.msk.bf16.mxu1 %vm332_vm2, %v2116_v47  ;;  %v6916_v47 = vunpack.i.h.bf16 %v6914_v56  ;;  %v2875_v48 = vpack.c.bf16 %v2737_v46, %v2735_v34  ;;  %v2743_v56 = vrot.slane %v8725_v45, 2  ;;  %v2744_v34 = vrot.slane %v8729_v23, 2  ;;  %v6924_v46 = vpop.permute.xlu1 %6923 }
 0x26c   : > { %v6930_v49 = vunpack.i.l.bf16 %v6929_v10 }
 0x26d   : > { %v2843_v22 = vsel %vm332_vm2, %v8704_v62, %v6916_v47  ;;  %v2845_v62 = vsel %vm332_vm2, %v8717_v43, %v6921_v0  ;;  %v2747_v47 = vsel %vm612_vm1, %v2744_v34, %v2746_v19  ;;  %v6931_v0 = vunpack.i.h.bf16 %v6929_v10 }
 0x26e   : > { %v2874_v25 = vpack.c.bf16 %v2843_v22, %v2842_v27  ;;  %v2876_v11 = vpack.c.bf16 %v2845_v62, %v2844_v1  ;;  %v2748_v27 = vrot.slane %v8738_v52, 2  ;;  %v2749_v22 = vrot.slane %v8742_v31, 2  ;;  %v10599_v1 = vld [vmem:[#allocation49_spill] sm:$0xff] }
 0x26f   : > { %v2848_v4 = vsel %vm332_vm2, %v8738_v52, %v6930_v49  ;;  %v6934_v19 = vpop.permute.xlu1 %6933  ;;  %v10600_v62 = vpack.c.bf16 %v10599_v1, %v8392_v28  ;;  %v6939_v52 = vpop.permute.xlu0 %6938 }
 0x272   : > { %2415 = vmatmul.mubr.bf16.gmra.mrb[60].mxu1 %v2115_v5  ;;  %v2741_v5 = vrot.slane %v7247_v15, 2  ;;  %v6925_v15 = vunpack.i.l.bf16 %v6924_v46 }
 0x273   : > { %5883 = vmatprep.mubr.msk.bf16.mxu1 %vm332_vm2, %v10598_v35 }
 0x274   : > { %v2742_v60 = vsel %vm612_vm1, %v2739_v54, %v2741_v5  ;;  %v2751_v54 = vrot.slane %v7249_v42, 2  ;;  %v2846_v44 = vsel %vm332_vm2, %v8725_v45, %v6925_v15  ;;  %v2849_v45 = vsel %vm332_vm2, %v8742_v31, %v6931_v0 }
 0x275   : > { %v2877_v35 = vpack.c.bf16 %v2742_v60, %v2740_v13  ;;  %v2750_v13 = vsel %vm612_vm1, %v2748_v27, %v2749_v22  ;;  %v6940_v31 = vunpack.i.l.bf16 %v6939_v52  ;;  %v10603_v27 = vld [vmem:[#allocation52_spill] sm:$0xff] }
 0x276   : > { %v2752_v60 = vsel %vm612_vm1, %v2749_v22, %v2751_v54  ;;  %v10604_v22 = vpack.c.bf16 %v10603_v27, %v8400_v17  ;;  %v2806_v27 = vrot.slane %v8845_v9, 2 }
 0x277   : > { %v2852_v28 = vsel %vm332_vm2, %v8762_v24, %v6940_v31  ;;  %v6949_v24 = vpop.permute.xlu0 %6948 }
 0x278   : > { %v6951_v10 = vunpack.i.h.bf16 %v6949_v24 }
 0x27a   : > { %3082 = vmatmul.mubr.bf16.vlgmr.msra.gmra.mrb[0].mxu1 %v2872_v58  ;;  %v2745_v58 = vsel %vm612_vm1, %v2743_v56, %v2744_v34  ;;  %v6936_v56 = vunpack.i.h.bf16 %v6934_v19  ;;  %v6935_v34 = vunpack.i.l.bf16 %v6934_v19 }
 0x27b   : > { %5884 = vmatprep.mubr.msk.bf16.mxu1 %vm332_vm2, %v2875_v48  ;;  %v6926_v48 = vunpack.i.h.bf16 %v6924_v46  ;;  %v2879_v5 = vpack.c.bf16 %v2747_v47, %v2745_v58 }
 0x27c   : > { %v2850_v46 = vsel %vm332_vm2, %v8751_v51, %v6935_v34  ;;  %v2851_v58 = vsel %vm332_vm2, %v8950_v32, %v6936_v56  ;;  %v6944_v51 = vpop.permute.xlu1 %6943  ;;  %v10609_v56 = vld [vmem:[#allocation12_spill] sm:$0xff] }
 0x27d   : > { %v2847_v43 = vsel %vm332_vm2, %v8729_v23, %v6926_v48  ;;  %v2880_v23 = vpack.c.bf16 %v2849_v45, %v2848_v4  ;;  %v2882_v47 = vpack.c.bf16 %v2851_v58, %v2850_v46  ;;  %v10601_v48 = vld [vmem:[#allocation53_spill] sm:$0xff]  ;;  %v6946_v54 = vunpack.i.h.bf16 %v6944_v51  ;;  %v10611_v58 = vld [vmem:[#allocation56_spill] sm:$0xff] }
 0x27e   : > { %v10602_v15 = vpack.c.bf16 %v10601_v48, %v8396_v38  ;;  %v6945_v32 = vunpack.i.l.bf16 %v6944_v51  ;;  %v10610_v34 = vpack.c.bf16 %v10609_v56, %v8415_v53  ;;  %v10613_v48 = vld [vmem:[#allocation61_spill] sm:$0xff] }
 0x280   : > { %v2854_v38 = vsel %vm332_vm2, %v8966_v36, %v6945_v32  ;;  %v6954_v36 = vpop.permute.xlu1 %6953 }
 0x281   : > { %v6956_v49 = vunpack.i.h.bf16 %v6954_v36 }
 0x282   : > { %3090 = vmatmul.mubr.bf16.gmra.mrb[4].mxu1 %v2874_v25  ;;  %v2878_v25 = vpack.c.bf16 %v2847_v43, %v2846_v44  ;;  %v2855_v44 = vsel %vm332_vm2, %v8970_v50, %v6946_v54  ;;  %v6955_v50 = vunpack.i.l.bf16 %v6954_v36 }
 0x283   : > { %5885 = vmatprep.mubr.msk.bf16.mxu1 %vm332_vm2, %v2877_v35  ;;  %v2881_v35 = vpack.c.bf16 %v2752_v60, %v2750_v13  ;;  %v2886_v43 = vpack.c.bf16 %v2855_v44, %v2854_v38  ;;  %v10605_v13 = vld [vmem:[#allocation54_spill] sm:$0xff]  ;;  %v2859_v45 = vsel %vm332_vm2, %v8992_v3, %v6956_v49  ;;  %v2804_v38 = vrot.slane %v8843_v63, 2 }
 0x284   : > { %v10606_v60 = vpack.c.bf16 %v10605_v13, %v8404_v14  ;;  %v2858_v14 = vsel %vm332_vm2, %v8988_v7, %v6955_v50  ;;  %v6964_v7 = vpop.permute.xlu1 %6963 }
 0x285   : > { %v2890_v19 = vpack.c.bf16 %v2859_v45, %v2858_v14  ;;  %v6966_v46 = vunpack.i.h.bf16 %v6964_v7  ;;  %v6965_v3 = vunpack.i.l.bf16 %v6964_v7  ;;  %v7104_v7 = vld [vmem:[%s10308_s5 + $0x18] sm:$0xff]  }
 0x287   : > { %v2862_v53 = vsel %vm332_vm2, %v9012_v6, %v6965_v3 }
 0x288   : > { %v6974_v6 = vpop.permute.xlu1 %6973 }
 0x289   : > { %v6976_v51 = vunpack.i.h.bf16 %v6974_v6 }
 0x28a   : > { %3098 = vmatmul.mubr.bf16.gmra.mrb[8].mxu1 %v2876_v11  ;;  %v6941_v11 = vunpack.i.h.bf16 %v6939_v52  ;;  %v10612_v52 = vpack.c.bf16 %v10611_v58, %v8419_v30  ;;  %v7105_v58 = vld [vmem:[%s10308_s5 + $0x20] sm:$0xff]  }
 0x28b   : > { %5886 = vmatprep.mubr.msk.bf16.mxu1 %vm332_vm2, %v2879_v5  ;;  %v2867_v32 = vsel %vm332_vm2, %v9040_v21, %v6976_v51  ;;  %v2807_v21 = vsel %vm612_vm1, %v2804_v38, %v2806_v27 }
 0x28c   : > { %v2853_v5 = vsel %vm332_vm2, %v8766_v18, %v6941_v11  ;;  %v6950_v18 = vunpack.i.l.bf16 %v6949_v24 }
 0x28d   : > { %v2884_v42 = vpack.c.bf16 %v2853_v5, %v2852_v28 }
 0x28e   : > { %v2856_v17 = vsel %vm332_vm2, %v8784_v41, %v6950_v18  ;;  %v6959_v41 = vpop.permute.xlu0 %6958 }
 0x292   : > { %3106 = vmatmul.mubr.bf16.gmra.mrb[12].mxu1 %v2878_v25  ;;  %v2857_v25 = vsel %vm332_vm2, %v8980_v12, %v6951_v10  ;;  %v6960_v12 = vunpack.i.l.bf16 %v6959_v41 }
 0x293   : > { %5887 = vmatprep.mubr.msk.bf16.mxu1 %vm332_vm2, %v2881_v35  ;;  %v2888_v0 = vpack.c.bf16 %v2857_v25, %v2856_v17  ;;  %v10607_v35 = vld [vmem:[#allocation57_spill] sm:$0xff] }
 0x294   : > { %v10608_v4 = vpack.c.bf16 %v10607_v35, %v8411_v55  ;;  %v2860_v55 = vsel %vm332_vm2, %v9000_v59, %v6960_v12  ;;  %v6969_v59 = vpop.permute.xlu0 %6968 }
 0x295   : > { %v6971_v31 = vunpack.i.h.bf16 %v6969_v59 }
 0x297   : > { %v2865_v28 = vsel %vm332_vm2, %v9028_v29, %v6971_v31 }
 0x29a   : > { %3114 = vmatmul.mubr.bf16.gmra.mrb[16].mxu1 %v2880_v23  ;;  %v6961_v23 = vunpack.i.h.bf16 %v6959_v41 }
 0x29b   : > { %5888 = vmatprep.mubr.msk.bf16.mxu1 %vm332_vm2, %v10600_v62 }
 0x29c   : > { %v2861_v1 = vsel %vm332_vm2, %v9004_v33, %v6961_v23  ;;  %v6970_v33 = vunpack.i.l.bf16 %v6969_v59  ;;  %v7106_v59 = vld [vmem:[%s10308_s5 + $0x28] sm:$0xff]  }
 0x29d   : > { %v2892_v62 = vpack.c.bf16 %v2861_v1, %v2860_v55 }
 0x29e   : > { %v2864_v30 = vsel %vm332_vm2, %v9024_v16, %v6970_v33  ;;  %v6979_v16 = vpop.permute.xlu0 %6978  ;;  %v7107_v33 = vld [vmem:[%s10308_s5 + $0x30] sm:$0xff]  }
 0x29f   : > { %v2896_v5 = vpack.c.bf16 %v2865_v28, %v2864_v30  ;;  %v6981_v44 = vunpack.i.h.bf16 %v6979_v16  ;;  %v6980_v24 = vunpack.i.l.bf16 %v6979_v16 }
 0x2a1   : > { %v2868_v9 = vsel %vm332_vm2, %v9048_v37, %v6980_v24  ;;  %v2869_v18 = vsel %vm332_vm2, %v9052_v61, %v6981_v44  ;;  %v7101_v37 = vld [vmem:[%s10308_s5] sm:$0xff]   ;;  %v7102_v61 = vld [vmem:[%s10308_s5 + $0x8] sm:$0xff]  }
 0x2a2   : > { %3122 = vmatmul.mubr.bf16.gmra.mrb[20].mxu1 %v2882_v47  ;;  %v2863_v47 = vsel %vm332_vm2, %v9016_v57, %v6966_v46  ;;  %v6975_v57 = vunpack.i.l.bf16 %v6974_v6  ;;  %v2900_v25 = vpack.c.bf16 %v2869_v18, %v2868_v9  ;;  %3598 = vmatpush1.bf16.msra.mxu0 %v7101_v37 }
 0x2a3   : > { %5889 = vmatprep.mubr.msk.bf16.mxu1 %vm332_vm2, %v10602_v15  ;;  %v2894_v11 = vpack.c.bf16 %v2863_v47, %v2862_v53  ;;  %v10614_v15 = vpack.c.bf16 %v10613_v48, %v8423_v2  ;;  %3599 = vmatprep.subr.bf16.mxu0 %v10442_v40 }
 0x2a4   : > { %v2866_v2 = vsel %vm332_vm2, %v9036_v26, %v6975_v57  ;;  %v6984_v26 = vpop.permute.xlu1 %6983 }
 0x2a5   : > { %v2898_v29 = vpack.c.bf16 %v2867_v32, %v2866_v2  ;;  %v6986_v13 = vunpack.i.h.bf16 %v6984_v26 }
 0x2a6   : > { %3600 = vmatpush1.bf16.msra.mxu0 %v7102_v61 }
 0x2a7   : > { %v2871_v36 = vsel %vm332_vm2, %v8843_v63, %v6986_v13  ;;  %3601 = vmatprep.subr.bf16.mxu0 %v10442_v40 }
 0x2aa   : > { %3130 = vmatmul.mubr.bf16.gmra.mrb[24].mxu1 %v2884_v42  ;;  %v10615_v42 = vld [vmem:[#allocation58_spill] sm:$0xff] }
 0x2ab   : > { %5890 = vmatprep.mubr.msk.bf16.mxu1 %vm332_vm2, %v10604_v22  ;;  %v10616_v54 = vpack.c.bf16 %v10615_v42, %v8427_v39  ;;  %v2803_v22 = vrot.slane %v8841_v20, 2  ;;  %v10617_v39 = vld [vmem:[#allocation24_spill] sm:$0xff]  ;;  %v7108_v42 = vld [vmem:[%s10308_s5 + $0x38] sm:$0xff]  }
 0x2ad   : > { %v2805_v10 = vsel %vm612_vm1, %v2803_v22, %v2804_v38  ;;  %v3362_v22 = vld [vmem:[#allocation4 + $0x8] sm:$0x3] }
 0x2ae   : > { %v2903_v17 = vpack.c.bf16 %v2807_v21, %v2805_v10  ;;  %v3442_v10 = vrot.slane %v3362_v22, 2  ;;  %v3394_v18 = vrot.slane %v3362_v22, 1 }
 0x2b2   : > { %3138 = vmatmul.mubr.bf16.gmra.mrb[28].mxu1 %v2886_v43  ;;  %v10618_v43 = vpack.c.bf16 %v10617_v39, %v10596_v8  ;;  %v7109_v39 = vld [vmem:[%s10308_s5 + $0x40] sm:$0xff]  }
 0x2b3   : > { %5891 = vmatprep.mubr.msk.bf16.mxu1 %vm332_vm2, %v10606_v60  ;;  %v6985_v60 = vunpack.i.l.bf16 %v6984_v26 }
 0x2b5   : > { %v2870_v8 = vsel %vm332_vm2, %v8841_v20, %v6985_v60  ;;  %v7103_v20 = vld [vmem:[%s10308_s5 + $0x10] sm:$0xff]   ;;  %v7110_v60 = vld [vmem:[%s10308_s5 + $0x48] sm:$0xff]  }
 0x2b6   : > { %3602 = vmatpush1.bf16.msra.mxu0 %v7103_v20 }
 0x2b7   : > { %3603 = vmatprep.subr.bf16.mxu0 %v10442_v40 }
 0x2ba   : > { %3146 = vmatmul.mubr.bf16.gmra.mrb[32].mxu1 %v2888_v0  ;;  %v2902_v0 = vpack.c.bf16 %v2871_v36, %v2870_v8  ;;  %3604 = vmatpush1.bf16.msra.mxu0 %v7104_v7 }
 0x2bb   : > { %5892 = vmatprep.mubr.msk.bf16.mxu1 %vm332_vm2, %v10608_v4  ;;  %v9204_v4 = vld [vmem:[%s10307_s4] ss:$0 sm:$0xff]  ;;  %3605 = vmatprep.subr.bf16.mxu0 %v10442_v40 }
 0x2be   : > { %3606 = vmatpush1.bf16.msra.mxu0 %v7105_v58  ;;  %v7112_v58 = vld [vmem:[%s10308_s5 + $0x58] sm:$0xff]  }
 0x2bf   : > { %3607 = vmatprep.subr.bf16.mxu0 %v10442_v40 }
 0x2c2   : > { %3154 = vmatmul.mubr.bf16.gmra.mrb[36].mxu1 %v2890_v19  ;;  %3608 = vmatpush1.bf16.msra.mxu0 %v7106_v59 }
 0x2c3   : > { %5893 = vmatprep.mubr.msk.bf16.mxu1 %vm332_vm2, %v10610_v34  ;;  %3609 = vmatprep.subr.bf16.mxu0 %v10442_v40 }
 0x2c6   : > { %3610 = vmatpush1.bf16.msra.mxu0 %v7107_v33 }
 0x2c7   : > { %3611 = vmatprep.subr.bf16.mxu0 %v10442_v40 }
 0x2ca   : > { %3162 = vmatmul.mubr.bf16.gmra.mrb[40].mxu1 %v2892_v62  ;;  %3612 = vmatpush1.bf16.msra.mxu0 %v7108_v42 }
 0x2cb   : > { %5894 = vmatprep.mubr.msk.bf16.mxu1 %vm332_vm2, %v10612_v52  ;;  %3613 = vmatprep.subr.bf16.mxu0 %v10442_v40 }
 0x2ce   : > { %3614 = vmatpush1.bf16.msra.mxu0 %v7109_v39 }
 0x2cf   : > { %3615 = vmatprep.subr.bf16.mxu0 %v10442_v40 }
 0x2d2   : > { %3170 = vmatmul.mubr.bf16.gmra.mrb[44].mxu1 %v2894_v11  ;;  %3616 = vmatpush1.bf16.msra.mxu0 %v7110_v60 }
 0x2d3   : > { %5895 = vmatprep.mubr.msk.bf16.mxu1 %vm332_vm2, %v10614_v15  ;;  %3617 = vmatprep.subr.bf16.mxu0 %v10442_v40 }
 0x2da   : > { %3178 = vmatmul.mubr.bf16.gmra.mrb[48].mxu1 %v2896_v5 }
 0x2db   : > { %5896 = vmatprep.mubr.msk.bf16.mxu1 %vm332_vm2, %v10616_v54 }
 0x2e2   : > { %3186 = vmatmul.mubr.bf16.gmra.mrb[52].mxu1 %v2898_v29  ;;  %v9237_v29 = vld [vmem:[#allocation4] sm:$0xff] }
 0x2e3   : > { %5897 = vmatprep.mubr.msk.bf16.mxu1 %vm332_vm2, %v10618_v43  ;;  %v3441_v26 = vrot.slane %v9237_v29, 2  ;;  %v3393_v9 = vrot.slane %v9237_v29, 1 }
 0x2e5   : > { %v3443_v37 = vsel %vm612_vm1, %v3441_v26, %v3442_v10 }
 0x2ea   : > { %3194 = vmatmul.mubr.bf16.gmra.mrb[56].mxu1 %v2900_v25 }
 0x2eb   : > { %5898 = vmatprep.mubr.msk.bf16.mxu1 %vm332_vm2, %v2903_v17 }
 0x2f2   : > { %3202 = vmatmul.mubr.bf16.gmra.mrb[60].mxu1 %v2902_v0 }
 0x34d   : > { %v3083_v49 = vpop.f32.mrb[0].mxu1 }
 0x34e   : > { %v3085_v50 = vpop.f32.mrb[1].mxu1  ;;  %v6454_v14 = vadd.f32 %v9204_v4, %v3083_v49 }
 0x34f   : > { %v3086_v63 = vpop.f32.mrb[2].mxu1  ;;  %v3395_v50 = vsel %vm979_vm6, %v3393_v9, %v3394_v18 }
 0x350   : > { %v3088_v35 = vpop.f32.mrb[3].mxu1  ;;  %v6455_v41 = vadd.f32 %v9204_v4, %v3086_v63  ;;  %v3242_v56 = vmax.f32 %v6454_v14, 0.0 }
 0x352   : > { %v3243_v62 = vmax.f32 %v6455_v41, 0.0 }
 0x355   : > { %v3091_v45 = vpop.f32.mrb[4].mxu1 }
 0x356   : > { %v6456_v19 = vadd.f32 %v9204_v4, %v3091_v45  ;;  %v3093_v23 = vpop.f32.mrb[5].mxu1  ;;  %v7111_v45 = vld [vmem:[%s10308_s5 + $0x50] sm:$0xff]  }
 0x357   : > { %v3094_v12 = vpop.f32.mrb[6].mxu1  ;;  %3618 = vmatpush1.bf16.msra.mxu0 %v7111_v45 }
 0x358   : > { %v3244_v34 = vmax.f32 %v6456_v19, 0.0  ;;  %v6457_v55 = vadd.f32 %v9204_v4, %v3094_v12  ;;  %v3096_v1 = vpop.f32.mrb[7].mxu1  ;;  %3619 = vmatprep.subr.bf16.mxu0 %v10442_v40 }
 0x35a   : > { %v3274_v46 = vmax.f32 %v3242_v56, %v3244_v34  ;;  %v3245_v3 = vmax.f32 %v6457_v55, 0.0 }
 0x35b   : > { %3620 = vmatpush1.bf16.msra.mxu0 %v7112_v58 }
 0x35c   : > { %3290 = vst.msk [vmem:[#allocation3] sm:$0xff] %vm332_vm2, %v3274_v46  ;;  %v3275_v52 = vmax.f32 %v3243_v62, %v3245_v3  ;;  %3907 = vmatprep.subr.bf16.mxu0 %v10442_v40 }
 0x35d   : > { %v3099_v53 = vpop.f32.mrb[8].mxu1 }
 0x35e   : > { %3291 = vst.msk [vmem:[#allocation3 + $0x8] sm:$0xff] %vm332_vm2, %v3275_v52  ;;  %v3101_v47 = vpop.f32.mrb[9].mxu1  ;;  %v6458_v48 = vadd.f32 %v9204_v4, %v3099_v53 }
 0x35f   : > { %v3102_v11 = vpop.f32.mrb[10].mxu1 }
 0x360   : > { %v3104_v31 = vpop.f32.mrb[11].mxu1  ;;  %v6459_v5 = vadd.f32 %v9204_v4, %v3102_v11  ;;  %v3246_v2 = vmax.f32 %v6458_v48, 0.0 }
 0x362   : > { %v3247_v38 = vmax.f32 %v6459_v5, 0.0 }
 0x365   : > { %v3306_v15 = vld [vmem:[#allocation3] ss:$2 sm:$0xff]  ;;  %v3322_v30 = vld [vmem:[#allocation3 + $0x1] ss:$2 sm:$0xff]  ;;  %v3107_v28 = vpop.f32.mrb[12].mxu1 }
 0x366   : > { %v3337_v6 = vmax.f32 %v3306_v15, %v3322_v30  ;;  %v6460_v51 = vadd.f32 %v9204_v4, %v3107_v28  ;;  %v3109_v57 = vpop.f32.mrb[13].mxu1 }
 0x367   : > { %v3110_v54 = vpop.f32.mrb[14].mxu1 }
 0x368   : > { %3346 = vst.msk [vmem:[#allocation4 + $0x11] sm:$0xff] %vm332_vm2, %v3337_v6  ;;  %v3248_v32 = vmax.f32 %v6460_v51, 0.0  ;;  %v6461_v16 = vadd.f32 %v9204_v4, %v3110_v54  ;;  %v3112_v27 = vpop.f32.mrb[15].mxu1 }
 0x36a   : > { %v3276_v44 = vmax.f32 %v3246_v2, %v3248_v32  ;;  %v3249_v24 = vmax.f32 %v6461_v16, 0.0 }
 0x36c   : > { %3292 = vst.msk [vmem:[#allocation3 + $0x10] sm:$0xff] %vm332_vm2, %v3276_v44  ;;  %v3277_v43 = vmax.f32 %v3247_v38, %v3249_v24 }
 0x36d   : > { %v3115_v21 = vpop.f32.mrb[16].mxu1 }
 0x36e   : > { %3293 = vst.msk [vmem:[#allocation3 + $0x18] sm:$0xff] %vm332_vm2, %v3277_v43  ;;  %v3117_v13 = vpop.f32.mrb[17].mxu1  ;;  %v6462_v23 = vadd.f32 %v9204_v4, %v3115_v21 }
 0x36f   : > { %v3118_v17 = vpop.f32.mrb[18].mxu1  ;;  %v9250_v25 = vld [vmem:[#allocation4 + $0x10] sm:$0xff]  ;;  %v3364_v8 = vld [vmem:[#allocation4 + $0x18] sm:$0x3] }
 0x370   : > { %v9252_v36 = vld [vmem:[#allocation4 + $0x18] sm:$0x3]  ;;  %v3120_v0 = vpop.f32.mrb[19].mxu1  ;;  %v3444_v61 = vrot.slane %v9250_v25, 2  ;;  %v3445_v49 = vrot.slane %v3364_v8, 2  ;;  %v3396_v20 = vrot.slane %v9250_v25, 1  ;;  %v6463_v62 = vadd.f32 %v9204_v4, %v3118_v17 }
 0x371   : > { %v3397_v63 = vrot.slane %v3364_v8, 1  ;;  %v3751_v35 = vrot.slane %v9252_v36, 2  ;;  %v3250_v53 = vmax.f32 %v6462_v23, 0.0 }
 0x372   : > { %v3446_v14 = vsel %vm612_vm1, %v3444_v61, %v3445_v49  ;;  %v3251_v31 = vmax.f32 %v6463_v62, 0.0 }
 0x373   : > { %v3482_v41 = vpack.c.bf16 %v3446_v14, %v3443_v37  ;;  %v3398_v19 = vsel %vm979_vm6, %v3396_v20, %v3397_v63  ;;  %v9270_v56 = vsel %vm612_vm1, %v3444_v61, %v3751_v35 }
 0x374   : > { %v6987_v12 = vpack.i.bf16 %v3398_v19, %v3395_v50 }
 0x375   : > { %v3308_v34 = vld [vmem:[#allocation3 + $0x10] ss:$2 sm:$0xff]  ;;  %v3324_v55 = vld [vmem:[#allocation3 + $0x11] ss:$2 sm:$0xff]  ;;  %5912 = vmatprep.mubr.msk.bf16.mxu0 %vm332_vm2, %v3482_v41  ;;  %v3123_v1 = vpop.f32.mrb[20].mxu1 }
 0x376   : > { %v3338_v7 = vmax.f32 %v3308_v34, %v3324_v55  ;;  %6988 = vrot.lane.b32.xlu0 %v6987_v12, %s7317_s14  ;;  %v6464_v46 = vadd.f32 %v9204_v4, %v3123_v1  ;;  %v3125_v3 = vpop.f32.mrb[21].mxu1 }
 0x377   : > { %v3126_v52 = vpop.f32.mrb[22].mxu1 }
 0x378   : > { %3347 = vst.msk [vmem:[#allocation4 + $0x21] sm:$0xff] %vm332_vm2, %v3338_v7  ;;  %v3252_v47 = vmax.f32 %v6464_v46, 0.0  ;;  %v6465_v59 = vadd.f32 %v9204_v4, %v3126_v52  ;;  %v3128_v11 = vpop.f32.mrb[23].mxu1 }
 0x37a   : > { %v3278_v33 = vmax.f32 %v3250_v53, %v3252_v47  ;;  %v3253_v48 = vmax.f32 %v6465_v59, 0.0 }
 0x37c   : > { %3294 = vst.msk [vmem:[#allocation3 + $0x20] sm:$0xff] %vm332_vm2, %v3278_v33  ;;  %v3279_v15 = vmax.f32 %v3251_v31, %v3253_v48 }
 0x37d   : > { %v3131_v30 = vpop.f32.mrb[24].mxu1 }
 0x37e   : > { %3295 = vst.msk [vmem:[#allocation3 + $0x28] sm:$0xff] %vm332_vm2, %v3279_v15  ;;  %v3133_v28 = vpop.f32.mrb[25].mxu1  ;;  %v6466_v16 = vadd.f32 %v9204_v4, %v3131_v30 }
 0x37f   : > { %v3134_v6 = vpop.f32.mrb[26].mxu1  ;;  %v9285_v5 = vld [vmem:[#allocation4 + $0x20] sm:$0xff]  ;;  %v9287_v51 = vld [vmem:[#allocation4 + $0x28] sm:$0x3] }
 0x380   : > { %v3136_v57 = vpop.f32.mrb[27].mxu1  ;;  %v9289_v42 = vld [vmem:[#allocation4 + $0x28] sm:$0x3]  ;;  %v3754_v54 = vrot.slane %v9287_v51, 2  ;;  %v3447_v32 = vrot.slane %v9285_v5, 2  ;;  %v6467_v26 = vadd.f32 %v9204_v4, %v3134_v6  ;;  %v3254_v18 = vmax.f32 %v6466_v16, 0.0 }
 0x381   : > { %v4062_v2 = vrot.slane %v9289_v42, 2  ;;  %v3366_v61 = vld [vmem:[#allocation4 + $0x28] sm:$0x3]  ;;  %v9310_v35 = vrot.slane %v9285_v5, 1 }
 0x382   : > { %v9296_v27 = vsel %vm612_vm1, %v3447_v32, %v3754_v54  ;;  %v3255_v8 = vmax.f32 %v6467_v26, 0.0  ;;  %v3400_v14 = vrot.slane %v3366_v61, 1  ;;  %v3448_v45 = vrot.slane %v3366_v61, 2 }
 0x383   : > { %v9299_v22 = vsel %vm612_vm1, %v3447_v32, %v4062_v2  ;;  %v3791_v39 = vpack.c.bf16 %v9296_v27, %v9270_v56  ;;  %v7126_v56 = vld [vmem:[%s10308_s5 + $0xc8] sm:$0xff]  }
 0x384   : > { %v3401_v3 = vsel %vm979_vm6, %v9310_v35, %v3400_v14  ;;  %v9329_v59 = vsel %vm612_vm1, %v3447_v32, %v3448_v45 }
 0x385   : > { %v3310_v38 = vld [vmem:[#allocation3 + $0x20] ss:$2 sm:$0xff]  ;;  %v3326_v44 = vld [vmem:[#allocation3 + $0x21] ss:$2 sm:$0xff]  ;;  %v3139_v24 = vpop.f32.mrb[28].mxu1 }
 0x386   : > { %v3339_v43 = vmax.f32 %v3310_v38, %v3326_v44  ;;  %v6468_v10 = vadd.f32 %v9204_v4, %v3139_v24  ;;  %v3141_v21 = vpop.f32.mrb[29].mxu1 }
 0x387   : > { %v3142_v9 = vpop.f32.mrb[30].mxu1 }
 0x388   : > { %3348 = vst.msk [vmem:[#allocation4 + $0x31] sm:$0xff] %vm332_vm2, %v3339_v43  ;;  %v3256_v13 = vmax.f32 %v6468_v10, 0.0  ;;  %v6469_v60 = vadd.f32 %v9204_v4, %v3142_v9  ;;  %v3144_v17 = vpop.f32.mrb[31].mxu1 }
 0x38a   : > { %v3280_v0 = vmax.f32 %v3254_v18, %v3256_v13  ;;  %v3257_v37 = vmax.f32 %v6469_v60, 0.0 }
 0x38c   : > { %3296 = vst.msk [vmem:[#allocation3 + $0x30] sm:$0xff] %vm332_vm2, %v3280_v0  ;;  %v3281_v49 = vmax.f32 %v3255_v8, %v3257_v37 }
 0x38d   : > { %v3147_v50 = vpop.f32.mrb[32].mxu1 }
 0x38e   : > { %3297 = vst.msk [vmem:[#allocation3 + $0x38] sm:$0xff] %vm332_vm2, %v3281_v49  ;;  %v3149_v63 = vpop.f32.mrb[33].mxu1  ;;  %v6470_v11 = vadd.f32 %v9204_v4, %v3147_v50 }
 0x38f   : > { %v3150_v41 = vpop.f32.mrb[34].mxu1  ;;  %v9312_v19 = vld [vmem:[#allocation4 + $0x30] sm:$0xff]  ;;  %v3368_v23 = vld [vmem:[#allocation4 + $0x38] sm:$0x3] }
 0x390   : > { %v9314_v12 = vld [vmem:[#allocation4 + $0x38] sm:$0x3]  ;;  %v3152_v34 = vpop.f32.mrb[35].mxu1  ;;  %v9317_v55 = vrot.slane %v9312_v19, 1  ;;  %v3403_v1 = vrot.slane %v3368_v23, 1  ;;  %v3451_v62 = vrot.slane %v3368_v23, 2  ;;  %v6471_v2 = vadd.f32 %v9204_v4, %v3150_v41 }
 0x391   : > { %v9319_v7 = vld [vmem:[#allocation4 + $0x38] sm:$0x3]  ;;  %v4065_v46 = vrot.slane %v9314_v12, 2  ;;  %v3450_v53 = vrot.slane %v9312_v19, 2  ;;  %v3258_v44 = vmax.f32 %v6470_v11, 0.0 }
 0x392   : > { %v3404_v58 = vsel %vm979_vm6, %v9317_v55, %v3403_v1  ;;  %v3757_v52 = vrot.slane %v9319_v7, 2  ;;  %v3259_v10 = vmax.f32 %v6471_v2, 0.0 }
 0x393   : > { %v6992_v47 = vpack.i.bf16 %v3404_v58, %v3401_v3  ;;  %v9333_v31 = vsel %vm612_vm1, %v3450_v53, %v3451_v62  ;;  %v9339_v48 = vsel %vm612_vm1, %v3450_v53, %v4065_v46 }
 0x394   : > { %v9336_v33 = vsel %vm612_vm1, %v3450_v53, %v3757_v52  ;;  %v3484_v6 = vpack.c.bf16 %v9333_v31, %v9329_v59  ;;  %v4102_v57 = vpack.c.bf16 %v9339_v48, %v9299_v22  ;;  %v7116_v59 = vld [vmem:[%s10308_s5 + $0x78] sm:$0xff]   ;;  %v7117_v31 = vld [vmem:[%s10308_s5 + $0x80] sm:$0xff]   ;;  %v7134_v22 = vld [vmem:[%s10308_s5 + $0x108] sm:$0xff]  }
 0x395   : > { %v3312_v15 = vld [vmem:[#allocation3 + $0x30] ss:$2 sm:$0xff]  ;;  %v3328_v30 = vld [vmem:[#allocation3 + $0x31] ss:$2 sm:$0xff]  ;;  %6993 = vrot.lane.b32.xlu1 %v6992_v47, %s7317_s14  ;;  %v3155_v28 = vpop.f32.mrb[36].mxu1 }
 0x396   : > { %v3340_v54 = vmax.f32 %v3312_v15, %v3328_v30  ;;  %v6472_v32 = vadd.f32 %v9204_v4, %v3155_v28  ;;  %v3157_v16 = vpop.f32.mrb[37].mxu1 }
 0x397   : > { %v3158_v38 = vpop.f32.mrb[38].mxu1 }
 0x398   : > { %3349 = vst.msk [vmem:[#allocation4 + $0x41] sm:$0xff] %vm332_vm2, %v3340_v54  ;;  %v3260_v24 = vmax.f32 %v6472_v32, 0.0  ;;  %v6473_v43 = vadd.f32 %v9204_v4, %v3158_v38  ;;  %v3160_v26 = vpop.f32.mrb[39].mxu1 }
 0x39a   : > { %v3282_v21 = vmax.f32 %v3258_v44, %v3260_v24  ;;  %v3261_v9 = vmax.f32 %v6473_v43, 0.0 }
 0x39c   : > { %3298 = vst.msk [vmem:[#allocation3 + $0x40] sm:$0xff] %vm332_vm2, %v3282_v21  ;;  %v3283_v18 = vmax.f32 %v3259_v10, %v3261_v9  ;;  %v3706_v10 = vrot.slane %v9287_v51, 1 }
 0x39d   : > { %v3163_v13 = vpop.f32.mrb[40].mxu1 }
 0x39e   : > { %3299 = vst.msk [vmem:[#allocation3 + $0x48] sm:$0xff] %vm332_vm2, %v3283_v18  ;;  %v3165_v60 = vpop.f32.mrb[41].mxu1  ;;  %v6474_v14 = vadd.f32 %v9204_v4, %v3163_v13 }
 0x39f   : > { %v3166_v17 = vpop.f32.mrb[42].mxu1  ;;  %v9352_v8 = vld [vmem:[#allocation4 + $0x40] sm:$0xff]  ;;  %v9354_v0 = vld [vmem:[#allocation4 + $0x48] sm:$0x3] }
 0x3a0   : > { %v3168_v37 = vpop.f32.mrb[43].mxu1  ;;  %v9356_v61 = vld [vmem:[#allocation4 + $0x48] sm:$0x3]  ;;  %v3760_v49 = vrot.slane %v9354_v0, 2  ;;  %v3453_v63 = vrot.slane %v9352_v8, 2  ;;  %v6475_v3 = vadd.f32 %v9204_v4, %v3166_v17  ;;  %v3262_v47 = vmax.f32 %v6474_v14, 0.0 }
 0x3a1   : > { %v4068_v50 = vrot.slane %v9356_v61, 2  ;;  %v3370_v32 = vld [vmem:[#allocation4 + $0x48] sm:$0x3]  ;;  %v9377_v24 = vrot.slane %v9352_v8, 1  ;;  %v3703_v14 = vrot.slane %v9252_v36, 1 }
 0x3a2   : > { %v9363_v45 = vsel %vm612_vm1, %v3453_v63, %v3760_v49  ;;  %v3263_v28 = vmax.f32 %v6475_v3, 0.0  ;;  %v3406_v43 = vrot.slane %v3370_v32, 1  ;;  %v3454_v26 = vrot.slane %v3370_v32, 2 }
 0x3a3   : > { %v9366_v41 = vsel %vm612_vm1, %v3453_v63, %v4068_v50  ;;  %v3793_v62 = vpack.c.bf16 %v9363_v45, %v9336_v33  ;;  %v7127_v33 = vld [vmem:[%s10308_s5 + $0xd0] sm:$0xff]  }
 0x3a5   : > { %v3314_v23 = vld [vmem:[#allocation3 + $0x40] ss:$2 sm:$0xff]  ;;  %v3330_v34 = vld [vmem:[#allocation3 + $0x41] ss:$2 sm:$0xff]  ;;  %v3171_v1 = vpop.f32.mrb[44].mxu1 }
 0x3a6   : > { %v3341_v46 = vmax.f32 %v3314_v23, %v3330_v34  ;;  %v6476_v58 = vadd.f32 %v9204_v4, %v3171_v1  ;;  %v3173_v52 = vpop.f32.mrb[45].mxu1  ;;  %v3407_v34 = vsel %vm979_vm6, %v9377_v24, %v3406_v43 }
 0x3a7   : > { %v3174_v53 = vpop.f32.mrb[46].mxu1  ;;  %v9397_v52 = vsel %vm612_vm1, %v3453_v63, %v3454_v26 }
 0x3a8   : > { %3350 = vst.msk [vmem:[#allocation4 + $0x51] sm:$0xff] %vm332_vm2, %v3341_v46  ;;  %v3264_v11 = vmax.f32 %v6476_v58, 0.0  ;;  %v6477_v15 = vadd.f32 %v9204_v4, %v3174_v53  ;;  %v3176_v30 = vpop.f32.mrb[47].mxu1  ;;  %v3707_v58 = vsel %vm979_vm6, %v9310_v35, %v3706_v10 }
 0x3aa   : > { %v3284_v54 = vmax.f32 %v3262_v47, %v3264_v11  ;;  %v3265_v2 = vmax.f32 %v6477_v15, 0.0 }
 0x3ac   : > { %3300 = vst.msk [vmem:[#allocation3 + $0x50] sm:$0xff] %vm332_vm2, %v3284_v54  ;;  %v3285_v16 = vmax.f32 %v3263_v28, %v3265_v2 }
 0x3ad   : > { %v3179_v38 = vpop.f32.mrb[48].mxu1 }
 0x3ae   : > { %3301 = vst.msk [vmem:[#allocation3 + $0x58] sm:$0xff] %vm332_vm2, %v3285_v16  ;;  %v3181_v44 = vpop.f32.mrb[49].mxu1  ;;  %v6478_v36 = vadd.f32 %v9204_v4, %v3179_v38 }
 0x3af   : > { %v3182_v21 = vpop.f32.mrb[50].mxu1  ;;  %v9380_v9 = vld [vmem:[#allocation4 + $0x50] sm:$0xff]  ;;  %v3372_v18 = vld [vmem:[#allocation4 + $0x58] sm:$0x3]  ;;  %v3704_v44 = vsel %vm979_vm6, %v3396_v20, %v3703_v14 }
 0x3b0   : > { %v3679_v13 = vld [vmem:[#allocation4 + $0x58] sm:$0x3]  ;;  %v3184_v60 = vpop.f32.mrb[51].mxu1  ;;  %v9383_v17 = vrot.slane %v9380_v9, 1  ;;  %v3409_v37 = vrot.slane %v3372_v18, 1  ;;  %v3457_v50 = vrot.slane %v3372_v18, 2  ;;  %v6479_v32 = vadd.f32 %v9204_v4, %v3182_v21 }
 0x3b1   : > { %v9385_v49 = vld [vmem:[#allocation4 + $0x58] sm:$0x3]  ;;  %v3763_v23 = vrot.slane %v3679_v13, 2  ;;  %v3456_v46 = vrot.slane %v9380_v9, 2  ;;  %v7007_v26 = vpack.i.bf16 %v3707_v58, %v3704_v44  ;;  %v3266_v10 = vmax.f32 %v6478_v36, 0.0 }
 0x3b2   : > { %v3410_v51 = vsel %vm979_vm6, %v9383_v17, %v3409_v37  ;;  %v4071_v1 = vrot.slane %v9385_v49, 2  ;;  %v3715_v14 = vrot.slane %v3679_v13, 1  ;;  %v4014_v13 = vrot.slane %v9289_v42, 1 }
 0x3b3   : > { %v6997_v3 = vpack.i.bf16 %v3410_v51, %v3407_v34  ;;  %v9401_v53 = vsel %vm612_vm1, %v3456_v46, %v3457_v50  ;;  %v9404_v47 = vsel %vm612_vm1, %v3456_v46, %v3763_v23  ;;  %v3267_v50 = vmax.f32 %v6479_v32, 0.0 }
 0x3b4   : > { %v9407_v11 = vsel %vm612_vm1, %v3456_v46, %v4071_v1  ;;  %v3486_v63 = vpack.c.bf16 %v9401_v53, %v9397_v52  ;;  %v7124_v52 = vld [vmem:[%s10308_s5 + $0xb8] sm:$0xff]  }
 0x3b5   : > { %v3316_v15 = vld [vmem:[#allocation3 + $0x50] ss:$2 sm:$0xff]  ;;  %v3332_v30 = vld [vmem:[#allocation3 + $0x51] ss:$2 sm:$0xff]  ;;  %6998 = vrot.lane.b32.xlu0 %v6997_v3, %s7317_s14  ;;  %v3187_v28 = vpop.f32.mrb[52].mxu1  ;;  %v4104_v54 = vpack.c.bf16 %v9407_v11, %v9366_v41  ;;  %v7142_v41 = vld [vmem:[%s10310_s7 + $0x10] sm:$0xff]  }
 0x3b6   : > { %v3342_v2 = vmax.f32 %v3316_v15, %v3332_v30  ;;  %v6480_v16 = vadd.f32 %v9204_v4, %v3187_v28  ;;  %v3189_v38 = vpop.f32.mrb[53].mxu1  ;;  %v4017_v28 = vrot.slane %v9314_v12, 1 }
 0x3b7   : > { %v3190_v43 = vpop.f32.mrb[54].mxu1 }
 0x3b8   : > { %3351 = vst.msk [vmem:[#allocation4 + $0x61] sm:$0xff] %vm332_vm2, %v3342_v2  ;;  %v3268_v18 = vmax.f32 %v6480_v16, 0.0  ;;  %v6481_v60 = vadd.f32 %v9204_v4, %v3190_v43  ;;  %v3192_v37 = vpop.f32.mrb[55].mxu1  ;;  %v3716_v16 = vsel %vm979_vm6, %v9383_v17, %v3715_v14 }
 0x3b9   : > { %7008 = vrot.lane.b32.xlu0 %v7007_v26, %s7317_s14 }
 0x3ba   : > { %v3286_v21 = vmax.f32 %v3266_v10, %v3268_v18  ;;  %v3269_v23 = vmax.f32 %v6481_v60, 0.0  ;;  %v4018_v10 = vsel %vm979_vm6, %v9317_v55, %v4017_v28 }
 0x3bc   : > { %3302 = vst.msk [vmem:[#allocation3 + $0x60] sm:$0xff] %vm332_vm2, %v3286_v21  ;;  %v3287_v34 = vmax.f32 %v3267_v50, %v3269_v23 }
 0x3bd   : > { %v3195_v51 = vpop.f32.mrb[56].mxu1 }
 0x3be   : > { %3303 = vst.msk [vmem:[#allocation3 + $0x68] sm:$0xff] %vm332_vm2, %v3287_v34  ;;  %v3197_v20 = vpop.f32.mrb[57].mxu1  ;;  %v6482_v26 = vadd.f32 %v9204_v4, %v3195_v51 }
 0x3bf   : > { %v3198_v1 = vpop.f32.mrb[58].mxu1  ;;  %v9424_v46 = vld [vmem:[#allocation4 + $0x60] sm:$0xff]  ;;  %v3681_v3 = vld [vmem:[#allocation4 + $0x68] sm:$0x3]  ;;  %v4015_v20 = vsel %vm979_vm6, %v9310_v35, %v4014_v13 }
 0x3c0   : > { %v3990_v58 = vld [vmem:[#allocation4 + $0x68] sm:$0x3]  ;;  %v3200_v36 = vpop.f32.mrb[59].mxu1  ;;  %v3717_v15 = vrot.slane %v9424_v46, 1  ;;  %v3718_v30 = vrot.slane %v3681_v3, 1  ;;  %v3766_v2 = vrot.slane %v3681_v3, 2  ;;  %v6483_v23 = vadd.f32 %v9204_v4, %v3198_v1 }
 0x3c1   : > { %v4074_v32 = vrot.slane %v3990_v58, 2  ;;  %v3459_v44 = vrot.slane %v9424_v46, 2  ;;  %v7027_v3 = vpack.i.bf16 %v4018_v10, %v4015_v20  ;;  %v3270_v36 = vmax.f32 %v6482_v26, 0.0 }
 0x3c2   : > { %v3719_v38 = vsel %vm979_vm6, %v3717_v15, %v3718_v30  ;;  %v4026_v35 = vrot.slane %v3990_v58, 1  ;;  %v3712_v10 = vrot.slane %v9354_v0, 1  ;;  %v3709_v20 = vrot.slane %v9319_v7, 1 }
 0x3c3   : > { %v7017_v43 = vpack.i.bf16 %v3719_v38, %v3716_v16  ;;  %v9437_v18 = vsel %vm612_vm1, %v3459_v44, %v3766_v2  ;;  %v9440_v12 = vsel %vm612_vm1, %v3459_v44, %v4074_v32  ;;  %v3271_v32 = vmax.f32 %v6483_v23, 0.0  ;;  %v3374_v38 = vld [vmem:[#allocation4 + $0x68] sm:$0x3] }
 0x3c4   : > { %v3795_v42 = vpack.c.bf16 %v9437_v18, %v9404_v47  ;;  %v3412_v13 = vrot.slane %v3374_v38, 1  ;;  %v4027_v58 = vsel %vm979_vm6, %v3717_v15, %v4026_v35  ;;  %v3713_v7 = vsel %vm979_vm6, %v9377_v24, %v3712_v10  ;;  %v9485_v10 = vld [vmem:[#allocation4 + $0x90] sm:$0xff] }
 0x3c5   : > { %v3318_v60 = vld [vmem:[#allocation3 + $0x60] ss:$2 sm:$0xff]  ;;  %v3334_v37 = vld [vmem:[#allocation3 + $0x61] ss:$2 sm:$0xff]  ;;  %7018 = vrot.lane.b32.xlu0 %v7017_v43, %s7317_s14  ;;  %v3203_v50 = vpop.f32.mrb[60].mxu1  ;;  %v3710_v35 = vsel %vm979_vm6, %v9317_v55, %v3709_v20  ;;  %v7129_v47 = vld [vmem:[%s10308_s5 + $0xe0] sm:$0xff]  }
 0x3c6   : > { %v3343_v21 = vmax.f32 %v3318_v60, %v3334_v37  ;;  %v6484_v34 = vadd.f32 %v9204_v4, %v3203_v50  ;;  %v3205_v51 = vpop.f32.mrb[61].mxu1  ;;  %v3460_v37 = vrot.slane %v3374_v38, 2  ;;  %v3413_v0 = vsel %vm979_vm6, %v3717_v15, %v3412_v13 }
 0x3c7   : > { %v3206_v14 = vpop.f32.mrb[62].mxu1  ;;  %v7012_v13 = vpack.i.bf16 %v3713_v7, %v3710_v35  ;;  %v4020_v35 = vrot.slane %v9356_v61, 1 }
 0x3c8   : > { %3352 = vst.msk [vmem:[#allocation4 + $0x71] sm:$0xff] %vm332_vm2, %v3343_v21  ;;  %v3272_v30 = vmax.f32 %v6484_v34, 0.0  ;;  %v6485_v28 = vadd.f32 %v9204_v4, %v3206_v14  ;;  %v3208_v2 = vpop.f32.mrb[63].mxu1 }
 0x3c9   : > { %7028 = vrot.lane.b32.xlu0 %v7027_v3, %s7317_s14  ;;  %v9465_v2 = vsel %vm612_vm1, %v3459_v44, %v3460_v37 }
 0x3ca   : > { %v3288_v16 = vmax.f32 %v3270_v36, %v3272_v30  ;;  %v3273_v1 = vmax.f32 %v6485_v28, 0.0 }
 0x3cc   : > { %3304 = vst.msk [vmem:[#allocation3 + $0x70] sm:$0xff] %vm332_vm2, %v3288_v16  ;;  %v3289_v43 = vmax.f32 %v3271_v32, %v3273_v1 }
 0x3ce   : > { %3305 = vst.msk [vmem:[#allocation3 + $0x78] sm:$0xff] %vm332_vm2, %v3289_v43 }
 0x3cf   : > { %v9455_v26 = vld [vmem:[#allocation4 + $0x70] sm:$0xff]  ;;  %v3992_v60 = vld [vmem:[#allocation4 + $0x78] sm:$0x3] }
 0x3d0   : > { %v3376_v4 = vld [vmem:[#allocation4 + $0x78] sm:$0x3]  ;;  %v4028_v50 = vrot.slane %v9455_v26, 1  ;;  %v4029_v21 = vrot.slane %v3992_v60, 1  ;;  %v4077_v23 = vrot.slane %v3992_v60, 2  ;;  %v3462_v14 = vrot.slane %v9455_v26, 2 }
 0x3d1   : > { %v3415_v34 = vrot.slane %v3376_v4, 1  ;;  %v3463_v51 = vrot.slane %v3376_v4, 2  ;;  %v3996_v60 = vld [vmem:[#allocation4 + $0x98] sm:$0x3] }
 0x3d2   : > { %v4030_v3 = vsel %vm979_vm6, %v4028_v50, %v4029_v21  ;;  %v9475_v1 = vsel %vm612_vm1, %v3462_v14, %v4077_v23  ;;  %v3683_v4 = vld [vmem:[#allocation4 + $0x78] sm:$0x3]  ;;  %v4083_v37 = vrot.slane %v3996_v60, 2  ;;  %v4082_v21 = vrot.slane %v9485_v10, 2 }
 0x3d3   : > { %v3416_v36 = vsel %vm979_vm6, %v4028_v50, %v3415_v34  ;;  %v7037_v30 = vpack.i.bf16 %v4030_v3, %v4027_v58  ;;  %v9468_v32 = vsel %vm612_vm1, %v3462_v14, %v3463_v51  ;;  %v3721_v23 = vrot.slane %v3683_v4, 1 }
 0x3d4   : > { %v7002_v28 = vpack.i.bf16 %v3416_v36, %v3413_v0  ;;  %v3488_v16 = vpack.c.bf16 %v9468_v32, %v9465_v2  ;;  %v3769_v58 = vrot.slane %v3683_v4, 2  ;;  %v4023_v36 = vrot.slane %v9385_v49, 1 }
 0x3d5   : > { %v3320_v15 = vld [vmem:[#allocation3 + $0x70] ss:$2 sm:$0xff]  ;;  %v3336_v38 = vld [vmem:[#allocation3 + $0x71] ss:$2 sm:$0xff]  ;;  %7038 = vrot.lane.b32.xlu0 %v7037_v30, %s7317_s14  ;;  %v4034_v30 = vrot.slane %v9485_v10, 1 }
 0x3d6   : > { %7003 = vrot.lane.b32.xlu1 %v7002_v28, %s7317_s14  ;;  %v3344_v43 = vmax.f32 %v3320_v15, %v3336_v38  ;;  %v9495_v15 = vsel %vm612_vm1, %v4082_v21, %v4083_v37  ;;  %v3722_v38 = vsel %vm979_vm6, %v4028_v50, %v3721_v23  ;;  %v4024_v37 = vsel %vm979_vm6, %v9383_v17, %v4023_v36 }
 0x3d8   : > { %3353 = vst.msk [vmem:[#allocation4 + $0x81] sm:$0xff] %vm332_vm2, %v3344_v43 }
 0x3da   : > { %7013 = vrot.lane.b32.xlu1 %v7012_v13, %s7317_s14  ;;  %v4035_v13 = vrot.slane %v3996_v60, 1 }
 0x3df   : > { %v9488_v34 = vld [vmem:[#allocation4 + $0x80] sm:$0xff]  ;;  %v3685_v51 = vld [vmem:[#allocation4 + $0x88] sm:$0x3] }
 0x3e0   : > { %v3994_v3 = vld [vmem:[#allocation4 + $0x88] sm:$0x3]  ;;  %v3723_v55 = vrot.slane %v9488_v34, 1  ;;  %v3724_v20 = vrot.slane %v3685_v51, 1  ;;  %v3772_v0 = vrot.slane %v3685_v51, 2  ;;  %v3771_v7 = vrot.slane %v9488_v34, 2 }
 0x3e1   : > { %v4080_v28 = vrot.slane %v3994_v3, 2  ;;  %v9501_v51 = vsel %vm612_vm1, %v3462_v14, %v3769_v58  ;;  %v4032_v21 = vrot.slane %v3994_v3, 1  ;;  %v4021_v14 = vsel %vm979_vm6, %v9377_v24, %v4020_v35  ;;  %v7113_v24 = vld [vmem:[%s10308_s5 + $0x60] sm:$0xff]  }
 0x3e2   : > { %v3725_v43 = vsel %vm979_vm6, %v3723_v55, %v3724_v20  ;;  %v9504_v49 = vsel %vm612_vm1, %v3771_v7, %v3772_v0  ;;  %v7032_v60 = vpack.i.bf16 %v4024_v37, %v4021_v14  ;;  %v4036_v20 = vsel %vm979_vm6, %v4034_v30, %v4035_v13  ;;  %v7119_v30 = vld [vmem:[%s10308_s5 + $0x90] sm:$0xff]   ;;  %v7121_v14 = vld [vmem:[%s10308_s5 + $0xa0] sm:$0xff]  }
 0x3e3   : > { %v7022_v4 = vpack.i.bf16 %v3725_v43, %v3722_v38  ;;  %v9507_v44 = vsel %vm612_vm1, %v3771_v7, %v4080_v28  ;;  %v3797_v50 = vpack.c.bf16 %v9504_v49, %v9501_v51  ;;  %v4033_v58 = vsel %vm979_vm6, %v3723_v55, %v4032_v21  ;;  %v7114_v55 = vld [vmem:[%s10308_s5 + $0x68] sm:$0xff]   ;;  %v7120_v43 = vld [vmem:[%s10308_s5 + $0x98] sm:$0xff]  }
 0x3e4   : > { %v4108_v61 = vpack.c.bf16 %v9495_v15, %v9507_v44  ;;  %v7042_v28 = vpack.i.bf16 %v4036_v20, %v4033_v58  ;;  %v7132_v49 = vld [vmem:[%s10308_s5 + $0xf8] sm:$0xff]   ;;  %v7147_v44 = vld [vmem:[%s10310_s7 + $0x68] sm:$0xff]   ;;  %v7150_v15 = vld [vmem:[%s10310_s7 + $0x30] sm:$0xff]  }
 0x3e5   : > { %7023 = vrot.lane.b32.xlu1 %v7022_v4, %s7317_s14 }
 0x3e8   : > { %v6989_v23 = vpop.permute.xlu0 %6988 }
 0x3e9   : > { %v6991_v0 = vunpack.i.h.bf16 %v6989_v23  ;;  %v6990_v17 = vunpack.i.l.bf16 %v6989_v23  ;;  %7033 = vrot.lane.b32.xlu1 %v7032_v60, %s7317_s14  ;;  %v7122_v60 = vld [vmem:[%s10308_s5 + $0xa8] sm:$0xff]   ;;  %v7123_v23 = vld [vmem:[%s10308_s5 + $0xb0] sm:$0xff]  }
 0x3eb   : > { %v3474_v3 = vsel %vm332_vm2, %v9250_v25, %v6991_v0  ;;  %v3473_v36 = vsel %vm332_vm2, %v9237_v29, %v6990_v17  ;;  %v7115_v29 = vld [vmem:[%s10308_s5 + $0x70] sm:$0xff]  }
 0x3ec   : > { %v3481_v7 = vpack.c.bf16 %v3474_v3, %v3473_v36 }
 0x3ed   : > { %7043 = vrot.lane.b32.xlu1 %v7042_v28, %s7317_s14  ;;  %s325_s14 = scalar_lea.vmem [#allocation6], %s5728_s25 }
 0x3ee   : > { %3630 = vmatmul.mubr.bf16.vlgmr.msra.gmra.mrb[32].mxu0 %v3481_v7  ;;  %s5662_s27 = sshll.u32 %s325_s14, 4  ;;  %s10258_s27 = int_to_ptr.vmem [resolvable:$true] %s5662_s27 }
 0x3ef   : > { %5913 = vmatprep.mubr.msk.bf16.mxu0 %vm332_vm2, %v3484_v6  ;;  %3908 = vmatpush1.bf16.msra.mxu0 %v7113_v24  ;;  %v7118_v6 = vld [vmem:[%s10308_s5 + $0x88] sm:$0xff]   ;;  %s7250_s17 = scalar_lea.vmem %s10258_s27, 1024  ;;  %p7257_p0 = scmp.lt.s32.totalorder %s10258_s27, %s7255_s22 }
 0x3f0   : > { %3909 = vmatprep.subr.bf16.mxu0 %v10442_v40  ;;  %p7251_p11 = scmp.ne.s32.totalorder %s10258_s27, %s7250_s17  ;;  %p7258_p1 = scmp.lt.s32.totalorder %s7256_s23, %s7250_s17 }
 0x3f2   : > { %p7252_p12 = pnand %p7251_p11, %p7409_p5  ;;  %p7259_p2 = por %p7258_p1, %p7257_p0 }
 0x3f3   : > { %3910 = vmatpush1.bf16.msra.mxu0 %v7114_v55 }
 0x3f4   : > { %3911 = vmatprep.subr.bf16.mxu0 %v10442_v40  ;;  %p7253_p13 = pneg %p7252_p12 }
 0x3f6   : > { %p7260_p3 = pnand %p7259_p2, %p7253_p13 }
 0x3f7   : > { %3912 = vmatpush1.bf16.msra.mxu0 %v7115_v29 }
 0x3f8   : > { %3913 = vmatprep.subr.bf16.mxu0 %v10442_v40 }
 0x3fb   : > { %3914 = vmatpush1.bf16.msra.mxu0 %v7116_v59 }
 0x3fc   : > { %3915 = vmatprep.subr.bf16.mxu0 %v10442_v40 }
 0x3ff   : > { %3916 = vmatpush1.bf16.msra.mxu0 %v7117_v31 }
 0x400   : > { %3917 = vmatprep.subr.bf16.mxu0 %v10442_v40 }
 0x403   : > { %3918 = vmatpush1.bf16.msra.mxu0 %v7118_v6  ;;  %v7125_v6 = vld [vmem:[%s10308_s5 + $0xc0] sm:$0xff]  }
 0x404   : > { %3919 = vmatprep.subr.bf16.mxu0 %v10442_v40 }
 0x407   : > { %v6994_v38 = vpop.permute.xlu1 %6993  ;;  %3920 = vmatpush1.bf16.msra.mxu0 %v7119_v30 }
 0x408   : > { %v6996_v35 = vunpack.i.h.bf16 %v6994_v38  ;;  %v6995_v13 = vunpack.i.l.bf16 %v6994_v38  ;;  %3921 = vmatprep.subr.bf16.mxu0 %v10442_v40 }
 0x40a   : > { %v3475_v4 = vsel %vm332_vm2, %v9285_v5, %v6995_v13  ;;  %v3476_v37 = vsel %vm332_vm2, %v9312_v19, %v6996_v35  ;;  %v7128_v13 = vld [vmem:[%s10308_s5 + $0xd8] sm:$0xff]  }
 0x40b   : > { %v3483_v21 = vpack.c.bf16 %v3476_v37, %v3475_v4  ;;  %3922 = vmatpush1.bf16.msra.mxu0 %v7120_v43 }
 0x40c   : > { %3923 = vmatprep.subr.bf16.mxu0 %v10442_v40 }
 0x40d   : > { %3638 = vmatmul.mubr.bf16.gmra.mrb[36].mxu0 %v3483_v21 }
 0x40e   : > { %5914 = vmatprep.mubr.msk.bf16.mxu0 %vm332_vm2, %v3486_v63 }
 0x40f   : > { %3924 = vmatpush1.bf16.msra.mxu0 %v7121_v14 }
 0x410   : > { %3925 = vmatprep.subr.bf16.mxu0 %v10442_v40 }
 0x413   : > { %3926 = vmatpush1.bf16.msra.mxu0 %v7122_v60  ;;  %v7130_v60 = vld [vmem:[%s10308_s5 + $0xe8] sm:$0xff]  }
 0x414   : > { %3927 = vmatprep.subr.bf16.mxu0 %v10442_v40 }
 0x417   : > { %3928 = vmatpush1.bf16.msra.mxu0 %v7123_v23 }
 0x418   : > { %3929 = vmatprep.subr.bf16.mxu0 %v10442_v40 }
 0x41b   : > { %3930 = vmatpush1.bf16.msra.mxu0 %v7124_v52 }
 0x41c   : > { %4218 = vmatprep.subr.bf16.mxu0 %v10442_v40 }
 0x427   : > { %v6999_v53 = vpop.permute.xlu0 %6998 }
 0x428   : > { %v7001_v63 = vunpack.i.h.bf16 %v6999_v53  ;;  %v7000_v58 = vunpack.i.l.bf16 %v6999_v53  ;;  %v7131_v53 = vld [vmem:[%s10308_s5 + $0xf0] sm:$0xff]  }
 0x42a   : > { %v3477_v20 = vsel %vm332_vm2, %v9352_v8, %v7000_v58  ;;  %v3478_v0 = vsel %vm332_vm2, %v9380_v9, %v7001_v63 }
 0x42b   : > { %v3485_v17 = vpack.c.bf16 %v3478_v0, %v3477_v20  ;;  %v7009_v24 = vpop.permute.xlu0 %7008  ;;  %v7136_v20 = vld [vmem:[%s10308_s5 + $0x118] sm:$0xff]   ;;  %v7137_v0 = vld [vmem:[%s10310_s7 + $0x40] sm:$0xff]  }
 0x42c   : > { %v7011_v59 = vunpack.i.h.bf16 %v7009_v24  ;;  %v7010_v31 = vunpack.i.l.bf16 %v7009_v24 }
 0x42d   : > { %3646 = vmatmul.mubr.bf16.gmra.mrb[40].mxu0 %v3485_v17 }
 0x42e   : > { %5915 = vmatprep.mubr.msk.bf16.mxu0 %vm332_vm2, %v3488_v16  ;;  %v3783_v2 = vsel %vm332_vm2, %v9285_v5, %v7011_v59  ;;  %v3782_v32 = vsel %vm332_vm2, %v9250_v25, %v7010_v31 }
 0x42f   : > { %v3790_v30 = vpack.c.bf16 %v3783_v2, %v3782_v32 }
 0x448   : > { %v7004_v3 = vpop.permute.xlu1 %7003 }
 0x449   : > { %v7006_v36 = vunpack.i.h.bf16 %v7004_v3  ;;  %v7005_v28 = vunpack.i.l.bf16 %v7004_v3 }
 0x44b   : > { %v3479_v7 = vsel %vm332_vm2, %v9424_v46, %v7005_v28  ;;  %v3480_v55 = vsel %vm332_vm2, %v9455_v26, %v7006_v36  ;;  %v7138_v28 = vld [vmem:[%s10310_s7] sm:$0xff]  }
 0x44c   : > { %v3487_v29 = vpack.c.bf16 %v3480_v55, %v3479_v7  ;;  %v7014_v16 = vpop.permute.xlu1 %7013 }
 0x44d   : > { %v7016_v38 = vunpack.i.h.bf16 %v7014_v16  ;;  %v7015_v43 = vunpack.i.l.bf16 %v7014_v16 }
 0x44e   : > { %3654 = vmatmul.mubr.bf16.gmra.mrb[44].mxu0 %v3487_v29 }
 0x44f   : > { %5952 = vmatprep.mubr.msk.bf16.mxu0 %vm332_vm2, %v3791_v39  ;;  %v3784_v25 = vsel %vm332_vm2, %v9312_v19, %v7015_v43  ;;  %v3785_v27 = vsel %vm332_vm2, %v9352_v8, %v7016_v38  ;;  %v7019_v39 = vpop.permute.xlu0 %7018 }
 0x450   : > { %v3792_v45 = vpack.c.bf16 %v3785_v27, %v3784_v25  ;;  %v7020_v35 = vunpack.i.l.bf16 %v7019_v39  ;;  %v7146_v25 = vld [vmem:[%s10310_s7 + $0x20] sm:$0xff]   ;;  %v7152_v27 = vld [vmem:[%s10310_s7 + $0x38] sm:$0xff]  }
 0x452   : > { %v3786_v4 = vsel %vm332_vm2, %v9380_v9, %v7020_v35 }
 0x453   : > { %v7029_v48 = vpop.permute.xlu0 %7028 }
 0x454   : > { %v7031_v63 = vunpack.i.h.bf16 %v7029_v48  ;;  %v7030_v58 = vunpack.i.l.bf16 %v7029_v48 }
 0x456   : > { %3940 = vmatmul.mubr.bf16.vlgmr.msra.gmra.mrb[32].mxu0 %v3790_v30  ;;  %v4094_v17 = vsel %vm332_vm2, %v9312_v19, %v7031_v63  ;;  %v4093_v3 = vsel %vm332_vm2, %v9285_v5, %v7030_v58  ;;  %v7140_v5 = vld [vmem:[%s10310_s7 + $0x8] sm:$0xff]   ;;  %v7141_v19 = vld [vmem:[%s10310_s7 + $0x50] sm:$0xff]  }
 0x457   : > { %4219 = vmatpush1.bf16.msra.mxu0 %v7125_v6  ;;  %5953 = vmatprep.mubr.msk.bf16.mxu0 %vm332_vm2, %v3793_v62  ;;  %v7021_v62 = vunpack.i.h.bf16 %v7019_v39  ;;  %v7024_v21 = vpop.permute.xlu1 %7023  ;;  %v4101_v24 = vpack.c.bf16 %v4094_v17, %v4093_v3  ;;  %v7039_v31 = vpop.permute.xlu0 %7038  ;;  %v7153_v39 = vld [vmem:[%s10310_s7 + $0x80] sm:$0xff]  }
 0x458   : > { %4220 = vmatprep.subr.bf16.mxu0 %v10442_v40  ;;  %v7025_v14 = vunpack.i.l.bf16 %v7024_v21  ;;  %v7041_v2 = vunpack.i.h.bf16 %v7039_v31  ;;  %v7040_v32 = vunpack.i.l.bf16 %v7039_v31 }
 0x459   : > { %v3787_v37 = vsel %vm332_vm2, %v9424_v46, %v7021_v62 }
 0x45a   : > { %v3794_v18 = vpack.c.bf16 %v3787_v37, %v3786_v4  ;;  %v3788_v23 = vsel %vm332_vm2, %v9455_v26, %v7025_v14  ;;  %v4097_v16 = vsel %vm332_vm2, %v9424_v46, %v7040_v32  ;;  %v4098_v6 = vsel %vm332_vm2, %v9455_v26, %v7041_v2  ;;  %v7145_v26 = vld [vmem:[%s10310_s7 + $0x60] sm:$0xff]  }
 0x45b   : > { %4221 = vmatpush1.bf16.msra.mxu0 %v7126_v56  ;;  %v7034_v36 = vpop.permute.xlu1 %7033  ;;  %v4105_v38 = vpack.c.bf16 %v4098_v6, %v4097_v16  ;;  %v7155_v16 = vld [vmem:[%s10310_s7 + $0x90] sm:$0xff]  }
 0x45c   : > { %4222 = vmatprep.subr.bf16.mxu0 %v10442_v40  ;;  %v7036_v7 = vunpack.i.h.bf16 %v7034_v36  ;;  %v7035_v55 = vunpack.i.l.bf16 %v7034_v36 }
 0x45e   : > { %3948 = vmatmul.mubr.bf16.gmra.mrb[36].mxu0 %v3792_v45  ;;  %v4095_v29 = vsel %vm332_vm2, %v9352_v8, %v7035_v55  ;;  %v4096_v59 = vsel %vm332_vm2, %v9380_v9, %v7036_v7  ;;  %v10619_v8 = vpack.c.bf16 %v9475_v1, %v9440_v12  ;;  %v7144_v9 = vld [vmem:[%s10310_s7 + $0x18] sm:$0xff]  }
 0x45f   : > { %4223 = vmatpush1.bf16.msra.mxu0 %v7127_v33  ;;  %5954 = vmatprep.mubr.msk.bf16.mxu0 %vm332_vm2, %v3795_v42  ;;  %v7026_v42 = vunpack.i.h.bf16 %v7024_v21  ;;  %v4103_v11 = vpack.c.bf16 %v4096_v59, %v4095_v29  ;;  %v7044_v30 = vpop.permute.xlu1 %7043  ;;  %v9763_v33 = vld [vmem:[%s10309_s6] ss:$0 sm:$0xff] }
 0x460   : > { %4224 = vmatprep.subr.bf16.mxu0 %v10442_v40  ;;  %v7046_v43 = vunpack.i.h.bf16 %v7044_v30  ;;  %v7045_v56 = vunpack.i.l.bf16 %v7044_v30 }
 0x461   : > { %v3789_v52 = vsel %vm332_vm2, %v9488_v34, %v7026_v42  ;;  %v9769_v42 = vld [vmem:[#allocation5 + $0x8] sm:$0x3] }
 0x462   : > { %v3796_v51 = vpack.c.bf16 %v3789_v52, %v3788_v23  ;;  %v4099_v12 = vsel %vm332_vm2, %v9488_v34, %v7045_v56  ;;  %v4100_v46 = vsel %vm332_vm2, %v9485_v10, %v7046_v43  ;;  %v7148_v10 = vld [vmem:[%s10310_s7 + $0x28] sm:$0xff]   ;;  %v7149_v34 = vld [vmem:[%s10310_s7 + $0x70] sm:$0xff]  }
 0x463   : > { %4225 = vmatpush1.bf16.msra.mxu0 %v7128_v13  ;;  %v4107_v1 = vpack.c.bf16 %v4100_v46, %v4099_v12 }
 0x464   : > { %4226 = vmatprep.subr.bf16.mxu0 %v10442_v40 }
 0x466   : > { %3956 = vmatmul.mubr.bf16.gmra.mrb[40].mxu0 %v3794_v18  ;;  %v9767_v18 = vld [vmem:[#allocation5] sm:$0xff] }
 0x467   : > { %4227 = vmatpush1.bf16.msra.mxu0 %v7129_v47  ;;  %5955 = vmatprep.mubr.msk.bf16.mxu0 %vm332_vm2, %v3797_v50  ;;  %v7133_v50 = vld [vmem:[%s10308_s5 + $0x100] sm:$0xff]   ;;  %v4347_v52 = vrot.slane %v9767_v18, 1 }
 0x468   : > { %4228 = vmatprep.subr.bf16.mxu0 %v10442_v40 }
 0x46b   : > { %4229 = vmatpush1.bf16.msra.mxu0 %v7130_v60 }
 0x46c   : > { %4230 = vmatprep.subr.bf16.mxu0 %v10442_v40 }
 0x46e   : > { %3964 = vmatmul.mubr.bf16.gmra.mrb[44].mxu0 %v3796_v51 }
 0x46f   : > { %4231 = vmatpush1.bf16.msra.mxu0 %v7131_v53  ;;  %5992 = vmatprep.mubr.msk.bf16.mxu0 %vm332_vm2, %v4102_v57  ;;  %v7135_v57 = vld [vmem:[%s10308_s5 + $0x110] sm:$0xff]   ;;  %v4348_v53 = vrot.slane %v9769_v42, 1 }
 0x470   : > { %4232 = vmatprep.subr.bf16.mxu0 %v10442_v40 }
 0x471   : > { %v4349_v58 = vsel %vm979_vm6, %v4347_v52, %v4348_v53  ;;  %v7157_v53 = vld [vmem:[%s10310_s7 + $0xa0] sm:$0xff]  }
 0x473   : > { %4233 = vmatpush1.bf16.msra.mxu0 %v7132_v49 }
 0x474   : > { %4234 = vmatprep.subr.bf16.mxu0 %v10442_v40 }
 0x477   : > { %4235 = vmatpush1.bf16.msra.mxu0 %v7133_v50 }
 0x478   : > { %4236 = vmatprep.subr.bf16.mxu0 %v10442_v40 }
 0x47b   : > { %4237 = vmatpush1.bf16.msra.mxu0 %v7134_v22 }
 0x47c   : > { %4238 = vmatprep.subr.bf16.mxu0 %v10442_v40 }
 0x47f   : > { %4239 = vmatpush1.bf16.msra.mxu0 %v7135_v57 }
 0x480   : > { %4240 = vmatprep.subr.bf16.mxu0 %v10442_v40  ;;  %v7139_v40 = vld [vmem:[%s10310_s7 + $0x48] sm:$0xff]  }
 0x483   : > { %4241 = vmatpush1.bf16.msra.mxu0 %v7136_v20 }
 0x484   : > { %6190 = vmatprep.subr.bf16.mxu0 %v7137_v0 }
 0x486   : > { %4251 = vmatmul.mubr.bf16.vlgmr.msra.gmra.mrb[32].mxu0 %v4101_v24 }
 0x487   : > { %5993 = vmatprep.mubr.msk.bf16.mxu0 %vm332_vm2, %v4104_v54  ;;  %6191 = vmatpush3.bf16.msra.mxu0 %v7138_v28  ;;  %v7143_v54 = vld [vmem:[%s10310_s7 + $0x58] sm:$0xff]  }
 0x488   : > { %6192 = vmatprep.subr.bf16.mxu0 %v7139_v40 }
 0x48b   : > { %6193 = vmatpush3.bf16.msra.mxu0 %v7140_v5  ;;  %v7154_v5 = vld [vmem:[%s10310_s7 + $0x88] sm:$0xff]  }
 0x48c   : > { %6194 = vmatprep.subr.bf16.mxu0 %v7141_v19 }
 0x48e   : > { %4259 = vmatmul.mubr.bf16.gmra.mrb[36].mxu0 %v4103_v11 }
 0x48f   : > { %5994 = vmatprep.mubr.msk.bf16.mxu0 %vm332_vm2, %v10619_v8  ;;  %6195 = vmatpush3.bf16.msra.mxu0 %v7142_v41 }
 0x490   : > { %6196 = vmatprep.subr.bf16.mxu0 %v7143_v54 }
 0x493   : > { %6197 = vmatpush3.bf16.msra.mxu0 %v7144_v9 }
 0x494   : > { %6198 = vmatprep.subr.bf16.mxu0 %v7145_v26 }
 0x496   : > { %4267 = vmatmul.mubr.bf16.gmra.mrb[40].mxu0 %v4105_v38 }
 0x497   : > { %5995 = vmatprep.mubr.msk.bf16.mxu0 %vm332_vm2, %v4108_v61  ;;  %6199 = vmatpush3.bf16.msra.mxu0 %v7146_v25  ;;  %v7151_v61 = vld [vmem:[%s10310_s7 + $0x78] sm:$0xff]  }
 0x498   : > { %6200 = vmatprep.subr.bf16.mxu0 %v7147_v44 }
 0x49b   : > { %6201 = vmatpush3.bf16.msra.mxu0 %v7148_v10 }
 0x49c   : > { %6202 = vmatprep.subr.bf16.mxu0 %v7149_v34 }
 0x49e   : > { %4275 = vmatmul.mubr.bf16.gmra.mrb[44].mxu0 %v4107_v1 }
 0x49f   : > { %6203 = vmatpush3.bf16.msra.mxu0 %v7150_v15  ;;  %v7156_v15 = vld [vmem:[%s10310_s7 + $0x98] sm:$0xff]  }
 0x4a0   : > { %6204 = vmatprep.subr.bf16.mxu0 %v7151_v61 }
 0x4a3   : > { %6205 = vmatpush3.bf16.msra.mxu0 %v7152_v27 }
 0x4a4   : > { %6382 = vmatprep.subr.bf16.mxu0 %v7153_v39 }
 0x559   : > { %v4252_v45 = vpop.f32.mrb[32].mxu0 }
 0x55a   : > { %v6486_v62 = vadd.f32 %v9763_v33, %v4252_v45  ;;  %v4254_v35 = vpop.f32.mrb[33].mxu0 }
 0x55b   : > { %v4255_v13 = vpop.f32.mrb[34].mxu0 }
 0x55c   : > { %v4291_v4 = vmax.f32 %v6486_v62, 0.0  ;;  %v6487_v37 = vadd.f32 %v9763_v33, %v4255_v13  ;;  %v4257_v21 = vpop.f32.mrb[35].mxu0 }
 0x55e   : > { %4300 = vst [vmem:[#allocation5 + $0x11] sm:$0xff] %v4291_v4  ;;  %v4292_v47 = vmax.f32 %v6487_v37, 0.0 }
 0x560   : > { %4301 = vst [vmem:[#allocation5 + $0x21] sm:$0xff] %v4292_v47 }
 0x561   : > { %v4260_v14 = vpop.f32.mrb[36].mxu0 }
 0x562   : > { %v6488_v60 = vadd.f32 %v9763_v33, %v4260_v14  ;;  %v4262_v23 = vpop.f32.mrb[37].mxu0 }
 0x563   : > { %v4263_v51 = vpop.f32.mrb[38].mxu0 }
 0x564   : > { %v4293_v49 = vmax.f32 %v6488_v60, 0.0  ;;  %v6489_v50 = vadd.f32 %v9763_v33, %v4263_v51  ;;  %v4265_v22 = vpop.f32.mrb[39].mxu0 }
 0x565   : > { %v9775_v48 = vld [vmem:[#allocation5 + $0x10] sm:$0xff]  ;;  %v9777_v57 = vld [vmem:[#allocation5 + $0x18] sm:$0x3] }
 0x566   : > { %4302 = vst [vmem:[#allocation5 + $0x31] sm:$0xff] %v4293_v49  ;;  %v4294_v63 = vmax.f32 %v6489_v50, 0.0  ;;  %v4350_v20 = vrot.slane %v9775_v48, 1  ;;  %v4351_v0 = vrot.slane %v9777_v57, 1  ;;  %v4411_v55 = vpack.c.bf16 %v9775_v48, %v9767_v18 }
 0x567   : > { %v9785_v28 = vld [vmem:[#allocation5 + $0x20] sm:$0xff]  ;;  %v9787_v24 = vld [vmem:[#allocation5 + $0x28] sm:$0x3] }
 0x568   : > { %4303 = vst [vmem:[#allocation5 + $0x41] sm:$0xff] %v4294_v63  ;;  %v4352_v17 = vsel %vm979_vm6, %v4350_v20, %v4351_v0  ;;  %v9797_v41 = vrot.slane %v9785_v28, 1  ;;  %v4354_v11 = vrot.slane %v9787_v24, 1  ;;  %v9839_v45 = vld [vmem:[#allocation5 + $0x28] sm:$0x3] }
 0x569   : > { %v4268_v3 = vpop.f32.mrb[40].mxu0  ;;  %v4412_v36 = vpack.c.bf16 %v4352_v17, %v4349_v58  ;;  %v5226_v50 = vrot.slane %v9839_v45, 1 }
 0x56a   : > { %v6490_v40 = vadd.f32 %v9763_v33, %v4268_v3  ;;  %v4270_v7 = vpop.f32.mrb[41].mxu0  ;;  %v4355_v30 = vsel %vm979_vm6, %v9797_v41, %v4354_v11 }
 0x56b   : > { %v4271_v19 = vpop.f32.mrb[42].mxu0  ;;  %4647 = vmatprep.mubr.bf16.mxu0 %v4412_v36  ;;  %v4379_v7 = vrot.slane %v9767_v18, 2 }
 0x56c   : > { %v4295_v29 = vmax.f32 %v6490_v40, 0.0  ;;  %v6491_v59 = vadd.f32 %v9763_v33, %v4271_v19  ;;  %v4273_v31 = vpop.f32.mrb[43].mxu0  ;;  %4648 = vmatmul.mubr.bf16.vlgmr.msra.gmra.mrb[48].mxu0 %v4411_v55  ;;  %v7158_v40 = vld [vmem:[%s10310_s7 + $0xa8] sm:$0xff]   ;;  %v4380_v55 = vrot.slane %v9769_v42, 2  ;;  %v4383_v19 = vrot.slane %v9777_v57, 2 }
 0x56d   : > { %6383 = vmatpush3.bf16.msra.mxu0 %v7153_v39  ;;  %v9800_v54 = vld [vmem:[#allocation5 + $0x30] sm:$0xff]  ;;  %v9802_v2 = vld [vmem:[#allocation5 + $0x38] sm:$0x3] }
 0x56e   : > { %4304 = vst [vmem:[#allocation5 + $0x51] sm:$0xff] %v4295_v29  ;;  %v4296_v32 = vmax.f32 %v6491_v59, 0.0  ;;  %6384 = vmatprep.subr.bf16.mxu0 %v7154_v5  ;;  %v9805_v8 = vrot.slane %v9800_v54, 1  ;;  %v4357_v9 = vrot.slane %v9802_v2, 1  ;;  %v9817_v43 = vld [vmem:[#allocation5 + $0x38] sm:$0x3]  ;;  %v9832_v34 = vpack.c.bf16 %v9800_v54, %v9785_v28 }
 0x56f   : > { %v9811_v6 = vld [vmem:[#allocation5 + $0x40] sm:$0xff]  ;;  %v9819_v56 = vld [vmem:[#allocation5 + $0x48] sm:$0x3]  ;;  %v9828_v10 = vrot.slane %v9800_v54, 2  ;;  %v4824_v27 = vrot.slane %v9817_v43, 2  ;;  %v9893_v29 = vsel %vm979_vm6, %v9797_v41, %v5226_v50 }
 0x570   : > { %4305 = vst [vmem:[#allocation5 + $0x61] sm:$0xff] %v4296_v32  ;;  %v4358_v38 = vsel %vm979_vm6, %v9805_v8, %v4357_v9  ;;  %v9821_v1 = vld [vmem:[#allocation5 + $0x48] sm:$0x3]  ;;  %v9824_v26 = vrot.slane %v9811_v6, 2  ;;  %v4827_v39 = vrot.slane %v9819_v56, 2  ;;  %v9844_v4 = vrot.slane %v9811_v6, 1 }
 0x571   : > { %6385 = vmatpush3.bf16.msra.mxu0 %v7154_v5  ;;  %v4276_v12 = vpop.f32.mrb[44].mxu0  ;;  %v4415_v46 = vpack.c.bf16 %v4358_v38, %v4355_v30  ;;  %v4360_v37 = vrot.slane %v9821_v1, 1  ;;  %v9847_v21 = vld [vmem:[#allocation5 + $0x38] sm:$0x3]  ;;  %v9866_v51 = vsel %vm612_vm1, %v9828_v10, %v4824_v27  ;;  %v4382_v5 = vrot.slane %v9775_v48, 2  ;;  %v7159_v38 = vld [vmem:[%s10310_s7 + $0xb0] sm:$0xff]  }
 0x572   : > { %v6492_v25 = vadd.f32 %v9763_v33, %v4276_v12  ;;  %v4278_v44 = vpop.f32.mrb[45].mxu0  ;;  %6386 = vmatprep.subr.bf16.mxu0 %v7155_v16  ;;  %v9855_v60 = vsel %vm612_vm1, %v9824_v26, %v4827_v39  ;;  %v5229_v22 = vrot.slane %v9847_v21, 1  ;;  %v5198_v11 = vld [vmem:[#allocation5 + $0x48] sm:$0x3]  ;;  %v4381_v12 = vsel %vm612_vm1, %v4379_v7, %v4380_v55 }
 0x573   : > { %v4279_v61 = vpop.f32.mrb[46].mxu0  ;;  %4655 = vmatprep.mubr.bf16.mxu0 %v4415_v46  ;;  %v4854_v49 = vpack.c.bf16 %v9855_v60, %v9866_v51  ;;  %v4361_v63 = vsel %vm979_vm6, %v9844_v4, %v4360_v37  ;;  %v4384_v46 = vsel %vm612_vm1, %v4382_v5, %v4383_v19  ;;  %v7160_v50 = vld [vmem:[%s10310_s7 + $0xb8] sm:$0xff]   ;;  %v5258_v7 = vrot.slane %v9839_v45, 2  ;;  %v7190_v51 = vld [vmem:[%s10310_s7 + $0x190] sm:$0xff]  }
 0x574   : > { %v4297_v62 = vmax.f32 %v6492_v25, 0.0  ;;  %v6493_v35 = vadd.f32 %v9763_v33, %v4279_v61  ;;  %v4281_v13 = vpop.f32.mrb[47].mxu0  ;;  %4656 = vmatmul.mubr.bf16.gmra.mrb[52].mxu0 %v9832_v34  ;;  %v9897_v59 = vsel %vm979_vm6, %v9805_v8, %v5229_v22  ;;  %v5232_v25 = vrot.slane %v5198_v11, 1 }
 0x575   : > { %6387 = vmatpush3.bf16.msra.mxu0 %v7155_v16  ;;  %v9849_v47 = vld [vmem:[#allocation5 + $0x50] sm:$0xff]  ;;  %v9851_v14 = vld [vmem:[#allocation5 + $0x58] sm:$0x3]  ;;  %v5290_v42 = vpack.c.bf16 %v9897_v59, %v9893_v29  ;;  %v4392_v19 = vrot.slane %v9821_v1, 2 }
 0x576   : > { %4306 = vst [vmem:[#allocation5 + $0x71] sm:$0xff] %v4297_v62  ;;  %v4298_v33 = vmax.f32 %v6493_v35, 0.0  ;;  %6388 = vmatprep.subr.bf16.mxu0 %v7156_v15  ;;  %v9858_v23 = vrot.slane %v9849_v47, 1  ;;  %v4363_v52 = vrot.slane %v9851_v14, 1  ;;  %v9882_v36 = vpack.c.bf16 %v9849_v47, %v9811_v6  ;;  %v5200_v57 = vld [vmem:[#allocation5 + $0x58] sm:$0x3] }
 0x577   : > { %v9876_v17 = vld [vmem:[#allocation5 + $0x60] sm:$0xff]  ;;  %v9878_v3 = vld [vmem:[#allocation5 + $0x68] sm:$0x3]  ;;  %v5235_v44 = vrot.slane %v5200_v57, 1  ;;  %v9927_v62 = vrot.slane %v9849_v47, 2  ;;  %v4395_v35 = vrot.slane %v9851_v14, 2  ;;  %v9943_v14 = vsel %vm979_vm6, %v9844_v4, %v5232_v25 }
 0x578   : > { %4307 = vst [vmem:[#allocation5 + $0x81] sm:$0xff] %v4298_v33  ;;  %v4364_v58 = vsel %vm979_vm6, %v9858_v23, %v4363_v52  ;;  %v9901_v31 = vrot.slane %v9876_v17, 1  ;;  %v4366_v18 = vrot.slane %v9878_v3, 1  ;;  %v5202_v13 = vld [vmem:[#allocation5 + $0x68] sm:$0x3]  ;;  %v9931_v33 = vrot.slane %v9785_v28, 2 }
 0x579   : > { %6389 = vmatpush3.bf16.msra.mxu0 %v7156_v15  ;;  %v4418_v0 = vpack.c.bf16 %v4364_v58, %v4361_v63  ;;  %v4389_v15 = vrot.slane %v9802_v2, 2  ;;  %v4386_v2 = vrot.slane %v9787_v24, 2  ;;  %v9947_v22 = vsel %vm979_vm6, %v9858_v23, %v5235_v44  ;;  %v7195_v29 = vld [vmem:[%s10310_s7 + $0x1e8] sm:$0xff]  }
 0x57a   : > { %6390 = vmatprep.subr.bf16.mxu0 %v7157_v53  ;;  %v4367_v61 = vsel %vm979_vm6, %v9901_v31, %v4366_v18  ;;  %v5264_v24 = vrot.slane %v5198_v11, 2  ;;  %v5267_v63 = vrot.slane %v5200_v57, 2  ;;  %v5293_v58 = vpack.c.bf16 %v9947_v22, %v9943_v14  ;;  %v7161_v57 = vld [vmem:[%s10310_s7 + $0x100] sm:$0xff]   ;;  %v7196_v59 = vld [vmem:[%s10310_s7 + $0x1a8] sm:$0xff]  }
 0x57b   : > { %4663 = vmatprep.mubr.bf16.mxu0 %v4418_v0  ;;  %v5238_v0 = vrot.slane %v5202_v13, 1  ;;  %v4390_v55 = vsel %vm612_vm1, %v9828_v10, %v4389_v15  ;;  %v4396_v18 = vsel %vm612_vm1, %v9927_v62, %v4395_v35  ;;  %v9959_v11 = vrot.slane %v9876_v17, 2  ;;  %v7162_v35 = vld [vmem:[%s10310_s7 + $0xc0] sm:$0xff]  }
 0x57c   : > { %4664 = vmatmul.mubr.bf16.gmra.mrb[56].mxu0 %v9882_v36  ;;  %v9984_v25 = vsel %vm612_vm1, %v9927_v62, %v5267_v63  ;;  %v5270_v44 = vrot.slane %v5202_v13, 2  ;;  %v9988_v15 = vsel %vm612_vm1, %v9931_v33, %v5258_v7  ;;  %v10001_v13 = vld [vmem:[#allocation5 + $0x28] sm:$0x3] }
 0x57d   : > { %6391 = vmatpush3.bf16.msra.mxu0 %v7157_v53  ;;  %v9906_v32 = vld [vmem:[#allocation5 + $0x70] sm:$0xff]  ;;  %v9908_v9 = vld [vmem:[#allocation5 + $0x78] sm:$0x3]  ;;  %v4413_v53 = vpack.c.bf16 %v4384_v46, %v4381_v12  ;;  %v9980_v46 = vsel %vm612_vm1, %v9824_v26, %v5264_v24  ;;  %v4393_v24 = vsel %vm612_vm1, %v9824_v26, %v4392_v19  ;;  %v4789_v7 = vrot.slane %v10001_v13, 1 }
 0x57e   : > { %6392 = vmatprep.subr.bf16.mxu0 %v7158_v40  ;;  %v9911_v16 = vrot.slane %v9906_v32, 1  ;;  %v4369_v30 = vrot.slane %v9908_v9, 1  ;;  %v5204_v37 = vld [vmem:[#allocation5 + $0x78] sm:$0x3]  ;;  %v9936_v52 = vpack.c.bf16 %v9906_v32, %v9876_v17  ;;  %v9965_v45 = vrot.slane %v9906_v32, 2 }
 0x57f   : > { %v4419_v63 = vpack.c.bf16 %v4396_v18, %v4393_v24  ;;  %v4398_v19 = vrot.slane %v9878_v3, 2  ;;  %v7166_v3 = vld [vmem:[%s10310_s7 + $0xd0] sm:$0xff]   ;;  %v7169_v24 = vld [vmem:[%s10310_s7 + $0x120] sm:$0xff]  }
 0x580   : > { %v4370_v27 = vsel %vm979_vm6, %v9911_v16, %v4369_v30  ;;  %v9969_v30 = vsel %vm979_vm6, %v9901_v31, %v5238_v0  ;;  %v4401_v0 = vrot.slane %v9908_v9, 2  ;;  %v7165_v9 = vld [vmem:[%s10310_s7 + $0x110] sm:$0xff]  }
 0x581   : > { %6393 = vmatpush3.bf16.msra.mxu0 %v7158_v40  ;;  %v4421_v39 = vpack.c.bf16 %v4370_v27, %v4367_v61  ;;  %v5241_v40 = vrot.slane %v5204_v37, 1  ;;  %v5273_v27 = vrot.slane %v5204_v37, 2  ;;  %v7163_v37 = vld [vmem:[%s10310_s7 + $0x108] sm:$0xff]  }
 0x582   : > { %6394 = vmatprep.subr.bf16.mxu0 %v7159_v38 }
 0x583   : > { %4671 = vmatprep.mubr.bf16.mxu0 %v4421_v39  ;;  %v9973_v1 = vsel %vm979_vm6, %v9911_v16, %v5241_v40  ;;  %v4387_v39 = vsel %vm612_vm1, %v9931_v33, %v4386_v2  ;;  %v10012_v2 = vsel %vm612_vm1, %v9959_v11, %v5270_v44  ;;  %v10019_v40 = vld [vmem:[#allocation5 + $0x18] sm:$0x3]  ;;  %v4399_v44 = vsel %vm612_vm1, %v9959_v11, %v4398_v19 }
 0x584   : > { %4672 = vmatmul.mubr.bf16.gmra.mrb[60].mxu0 %v9936_v52  ;;  %v5296_v12 = vpack.c.bf16 %v9973_v1, %v9969_v30  ;;  %v4786_v18 = vrot.slane %v10019_v40, 1  ;;  %v4795_v19 = vrot.slane %v9819_v56, 1  ;;  %v4849_v56 = vpack.c.bf16 %v9785_v28, %v9775_v48  ;;  %v7207_v1 = vld [vmem:[%s10310_s7 + $0x230] sm:$0xff]  }
 0x585   : > { %6395 = vmatpush3.bf16.msra.mxu0 %v7159_v38  ;;  %6398 = vmatprep.mubr.bf16.mxu0 %v4413_v53  ;;  %v5261_v38 = vrot.slane %v9847_v21, 2  ;;  %v5294_v21 = vpack.c.bf16 %v9984_v25, %v9980_v46 }
 0x586   : > { %6396 = vmatprep.subr.bf16.mxu0 %v7160_v50 }
 0x587   : > { %v9992_v61 = vsel %vm612_vm1, %v9828_v10, %v5261_v38  ;;  %v4416_v10 = vpack.c.bf16 %v4390_v55, %v4387_v39  ;;  %v7164_v55 = vld [vmem:[%s10310_s7 + $0xc8] sm:$0xff]   ;;  %v4790_v38 = vsel %vm979_vm6, %v9797_v41, %v4789_v7  ;;  %v4787_v39 = vsel %vm979_vm6, %v4350_v20, %v4786_v18  ;;  %v7168_v41 = vld [vmem:[%s10310_s7 + $0xd8] sm:$0xff]   ;;  %v7170_v20 = vld [vmem:[%s10310_s7 + $0xe0] sm:$0xff]  }
 0x588   : > { %v5291_v53 = vpack.c.bf16 %v9992_v61, %v9988_v15  ;;  %v7174_v7 = vld [vmem:[%s10310_s7 + $0xf0] sm:$0xff]   ;;  %v7177_v18 = vld [vmem:[%s10310_s7 + $0x140] sm:$0xff]  }
 0x589   : > { %6397 = vmatpush3.bf16.msra.mxu0 %v7160_v50  ;;  %v10016_v50 = vsel %vm612_vm1, %v9965_v45, %v5273_v27 }
 0x58a   : > { %6242 = vmatprep.subr.bf16.mxu0 %v7161_v57  ;;  %v5297_v26 = vpack.c.bf16 %v10016_v50, %v10012_v2  ;;  %v4402_v57 = vsel %vm612_vm1, %v9965_v45, %v4401_v0  ;;  %v7173_v0 = vld [vmem:[%s10310_s7 + $0x130] sm:$0xff]  }
 0x58b   : > { %v4422_v27 = vpack.c.bf16 %v4402_v57, %v4399_v44  ;;  %v4792_v57 = vrot.slane %v9817_v43, 1  ;;  %v4764_v44 = vld [vmem:[#allocation5 + $0x68] sm:$0x3] }
 0x58c   : > { %6399 = vmatmul.mubr.bf16.vlgmr.msra.gmra.mrb[64].mxu0 %v4416_v10  ;;  %v4850_v10 = vpack.c.bf16 %v4790_v38, %v4787_v39  ;;  %v4796_v38 = vsel %vm979_vm6, %v9844_v4, %v4795_v19  ;;  %v4801_v43 = vrot.slane %v4764_v44, 1  ;;  %v7179_v4 = vld [vmem:[%s10310_s7 + $0x150] sm:$0xff]  }
 0x58d   : > { %6243 = vmatpush3.bf16.msra.mxu0 %v7162_v35  ;;  %6402 = vmatprep.mubr.bf16.mxu0 %v4419_v63  ;;  %v7167_v35 = vld [vmem:[%s10310_s7 + $0x118] sm:$0xff]   ;;  %v7172_v63 = vld [vmem:[%s10310_s7 + $0xe8] sm:$0xff]  }
 0x58e   : > { %6244 = vmatprep.subr.bf16.mxu0 %v7163_v37  ;;  %v7171_v37 = vld [vmem:[%s10310_s7 + $0x128] sm:$0xff]  }
 0x591   : > { %6245 = vmatpush3.bf16.msra.mxu0 %v7164_v55  ;;  %v7175_v55 = vld [vmem:[%s10310_s7 + $0x138] sm:$0xff]  }
 0x592   : > { %6246 = vmatprep.subr.bf16.mxu0 %v7165_v9  ;;  %v7176_v9 = vld [vmem:[%s10310_s7 + $0xf8] sm:$0xff]  }
 0x594   : > { %6403 = vmatmul.mubr.bf16.gmra.mrb[68].mxu0 %v4422_v27  ;;  %v7178_v27 = vld [vmem:[%s10310_s7 + $0x148] sm:$0xff]  }
 0x595   : > { %6247 = vmatpush3.bf16.msra.mxu0 %v7166_v3  ;;  %5086 = vmatprep.mubr.bf16.mxu0 %v4850_v10  ;;  %v4793_v3 = vsel %vm979_vm6, %v9805_v8, %v4792_v57  ;;  %v4802_v10 = vsel %vm979_vm6, %v9901_v31, %v4801_v43  ;;  %v10093_v8 = vld [vmem:[#allocation5 + $0x80] sm:$0xff]  ;;  %v4821_v57 = vrot.slane %v10001_v13, 2 }
 0x596   : > { %6248 = vmatprep.subr.bf16.mxu0 %v7167_v35  ;;  %v4853_v39 = vpack.c.bf16 %v4796_v38, %v4793_v3  ;;  %v4762_v35 = vld [vmem:[#allocation5 + $0x58] sm:$0x3]  ;;  %v4806_v31 = vrot.slane %v10093_v8, 1  ;;  %v7183_v38 = vld [vmem:[%s10310_s7 + $0x170] sm:$0xff]   ;;  %v4838_v43 = vrot.slane %v10093_v8, 2 }
 0x597   : > { %v4798_v28 = vrot.slane %v4762_v35, 1 }
 0x599   : > { %6249 = vmatpush3.bf16.msra.mxu0 %v7168_v41  ;;  %v4768_v41 = vld [vmem:[#allocation5 + $0x88] sm:$0x3] }
 0x59a   : > { %6250 = vmatprep.subr.bf16.mxu0 %v7169_v24  ;;  %v4852_v24 = vpack.c.bf16 %v9811_v6, %v9800_v54  ;;  %v7181_v54 = vld [vmem:[%s10310_s7 + $0x160] sm:$0xff]  }
 0x59d   : > { %6251 = vmatpush3.bf16.msra.mxu0 %v7170_v20  ;;  %v4799_v20 = vsel %vm979_vm6, %v9858_v23, %v4798_v28 }
 0x59e   : > { %6252 = vmatprep.subr.bf16.mxu0 %v7171_v37  ;;  %v7180_v37 = vld [vmem:[%s10310_s7 + $0x158] sm:$0xff]  }
 0x5a1   : > { %6253 = vmatpush3.bf16.msra.mxu0 %v7172_v63  ;;  %v4856_v63 = vpack.c.bf16 %v4802_v10, %v4799_v20  ;;  %v7191_v10 = vld [vmem:[%s10310_s7 + $0x1d8] sm:$0xff]   ;;  %v7198_v20 = vld [vmem:[%s10310_s7 + $0x1b0] sm:$0xff]  }
 0x5a2   : > { %6254 = vmatprep.subr.bf16.mxu0 %v7173_v0  ;;  %v4766_v0 = vld [vmem:[#allocation5 + $0x78] sm:$0x3] }
 0x5a3   : > { %v4804_v6 = vrot.slane %v4766_v0, 1 }
 0x5a5   : > { %6255 = vmatpush3.bf16.msra.mxu0 %v7174_v7  ;;  %v4807_v7 = vrot.slane %v4768_v41, 1  ;;  %v4805_v19 = vsel %vm979_vm6, %v9911_v16, %v4804_v6  ;;  %v4858_v16 = vpack.c.bf16 %v10093_v8, %v9906_v32  ;;  %v4830_v32 = vrot.slane %v4762_v35, 2  ;;  %v5206_v6 = vld [vmem:[#allocation5 + $0x88] sm:$0x3] }
 0x5a6   : > { %6256 = vmatprep.subr.bf16.mxu0 %v7175_v55  ;;  %v4855_v55 = vpack.c.bf16 %v9876_v17, %v9849_v47  ;;  %v4818_v47 = vrot.slane %v10019_v40, 2  ;;  %v4822_v17 = vsel %vm612_vm1, %v9931_v33, %v4821_v57  ;;  %v7185_v33 = vld [vmem:[%s10310_s7 + $0x1c0] sm:$0xff]   ;;  %v4839_v35 = vrot.slane %v4768_v41, 2 }
 0x5a7   : > { %v4808_v23 = vsel %vm979_vm6, %v4806_v31, %v4807_v7  ;;  %v4831_v40 = vsel %vm612_vm1, %v9927_v62, %v4830_v32  ;;  %v7189_v62 = vld [vmem:[%s10310_s7 + $0x1d0] sm:$0xff]   ;;  %v7193_v41 = vld [vmem:[%s10310_s7 + $0x1e0] sm:$0xff]   ;;  %v7202_v7 = vld [vmem:[%s10310_s7 + $0x208] sm:$0xff]  }
 0x5a8   : > { %v4819_v13 = vsel %vm612_vm1, %v4382_v5, %v4818_v47  ;;  %v7186_v5 = vld [vmem:[%s10310_s7 + $0x180] sm:$0xff]   ;;  %v4840_v28 = vsel %vm612_vm1, %v4838_v43, %v4839_v35 }
 0x5a9   : > { %6257 = vmatpush3.bf16.msra.mxu0 %v7176_v9  ;;  %v7182_v9 = vld [vmem:[%s10310_s7 + $0x168] sm:$0xff]   ;;  %v4851_v3 = vpack.c.bf16 %v4822_v17, %v4819_v13 }
 0x5aa   : > { %6406 = vmatprep.subr.bf16.mxu0 %v7177_v18 }
 0x5ac   : > { %5087 = vmatmul.mubr.bf16.vlgmr.msra.gmra.mrb[72].mxu0 %v4849_v56  ;;  %v7184_v56 = vld [vmem:[%s10310_s7 + $0x178] sm:$0xff]  }
 0x5ad   : > { %5094 = vmatprep.mubr.bf16.mxu0 %v4853_v39  ;;  %6407 = vmatpush3.bf16.msra.mxu0 %v7177_v18  ;;  %v4859_v18 = vpack.c.bf16 %v4808_v23, %v4805_v19  ;;  %v5207_v23 = vld [vmem:[#allocation5 + $0x90] sm:$0xff]  ;;  %v7204_v19 = vld [vmem:[%s10310_s7 + $0x218] sm:$0xff]  }
 0x5ae   : > { %6408 = vmatprep.subr.bf16.mxu0 %v7178_v27  ;;  %v5246_v14 = vrot.slane %v5207_v23, 1  ;;  %v5278_v57 = vrot.slane %v5207_v23, 2 }
 0x5b1   : > { %6409 = vmatpush3.bf16.msra.mxu0 %v7178_v27  ;;  %v4833_v27 = vrot.slane %v4764_v44, 2  ;;  %v7187_v44 = vld [vmem:[%s10310_s7 + $0x1c8] sm:$0xff]  }
 0x5b2   : > { %6410 = vmatprep.subr.bf16.mxu0 %v7179_v4 }
 0x5b3   : > { %v4834_v48 = vsel %vm612_vm1, %v9959_v11, %v4833_v27  ;;  %v7188_v11 = vld [vmem:[%s10310_s7 + $0x188] sm:$0xff]  }
 0x5b4   : > { %5095 = vmatmul.mubr.bf16.gmra.mrb[76].mxu0 %v4852_v24  ;;  %v4857_v39 = vpack.c.bf16 %v4834_v48, %v4831_v40  ;;  %v7194_v24 = vld [vmem:[%s10310_s7 + $0x1a0] sm:$0xff]  }
 0x5b5   : > { %5102 = vmatprep.mubr.bf16.mxu0 %v4856_v63  ;;  %6411 = vmatpush3.bf16.msra.mxu0 %v7179_v4  ;;  %v4836_v4 = vrot.slane %v4766_v0, 2  ;;  %v7200_v63 = vld [vmem:[%s10310_s7 + $0x1b8] sm:$0xff]   ;;  %v7201_v0 = vld [vmem:[%s10310_s7 + $0x200] sm:$0xff]  }
 0x5b6   : > { %6412 = vmatprep.subr.bf16.mxu0 %v7180_v37 }
 0x5b7   : > { %v4837_v60 = vsel %vm612_vm1, %v9965_v45, %v4836_v4  ;;  %v7192_v45 = vld [vmem:[%s10310_s7 + $0x198] sm:$0xff]   ;;  %v5996_v4 = vld [vmem:[%s10311_s8] ss:$0 sm:$0xff] }
 0x5b9   : > { %6413 = vmatpush3.bf16.msra.mxu0 %v7180_v37  ;;  %v7199_v37 = vld [vmem:[%s10310_s7 + $0x1f8] sm:$0xff]  }
 0x5ba   : > { %6414 = vmatprep.subr.bf16.mxu0 %v7181_v54 }
 0x5bc   : > { %5103 = vmatmul.mubr.bf16.gmra.mrb[80].mxu0 %v4855_v55  ;;  %v5208_v55 = vld [vmem:[#allocation5 + $0x98] sm:$0x3] }
 0x5bd   : > { %5110 = vmatprep.mubr.bf16.mxu0 %v4859_v18  ;;  %6415 = vmatpush3.bf16.msra.mxu0 %v7181_v54  ;;  %v7203_v54 = vld [vmem:[%s10310_s7 + $0x210] sm:$0xff]   ;;  %v5247_v22 = vrot.slane %v5208_v55, 1 }
 0x5be   : > { %6416 = vmatprep.subr.bf16.mxu0 %v7182_v9 }
 0x5bf   : > { %v5248_v18 = vsel %vm979_vm6, %v5246_v14, %v5247_v22 }
 0x5c1   : > { %6417 = vmatpush3.bf16.msra.mxu0 %v7182_v9 }
 0x5c2   : > { %6418 = vmatprep.subr.bf16.mxu0 %v7183_v38 }
 0x5c4   : > { %5111 = vmatmul.mubr.bf16.gmra.mrb[84].mxu0 %v4858_v16 }
 0x5c5   : > { %6419 = vmatpush3.bf16.msra.mxu0 %v7183_v38  ;;  %6422 = vmatprep.mubr.bf16.mxu0 %v4851_v3  ;;  %v5279_v38 = vrot.slane %v5208_v55, 2 }
 0x5c6   : > { %6420 = vmatprep.subr.bf16.mxu0 %v7184_v56 }
 0x5c7   : > { %v5280_v15 = vsel %vm612_vm1, %v5278_v57, %v5279_v38 }
 0x5c9   : > { %6421 = vmatpush3.bf16.msra.mxu0 %v7184_v56 }
 0x5ca   : > { %6294 = vmatprep.subr.bf16.mxu0 %v7185_v33 }
 0x5cc   : > { %6423 = vmatmul.mubr.bf16.vlgmr.msra.gmra.mrb[64].mxu0 %v4854_v49  ;;  %v4860_v49 = vpack.c.bf16 %v4840_v28, %v4837_v60 }
 0x5cd   : > { %6426 = vmatprep.mubr.bf16.mxu0 %v4857_v39  ;;  %6295 = vmatpush3.bf16.msra.mxu0 %v7186_v5 }
 0x5ce   : > { %6296 = vmatprep.subr.bf16.mxu0 %v7187_v44 }
 0x5d1   : > { %6297 = vmatpush3.bf16.msra.mxu0 %v7188_v11 }
 0x5d2   : > { %6298 = vmatprep.subr.bf16.mxu0 %v7189_v62 }
 0x5d4   : > { %6427 = vmatmul.mubr.bf16.gmra.mrb[68].mxu0 %v4860_v49 }
 0x5d5   : > { %6299 = vmatpush3.bf16.msra.mxu0 %v7190_v51  ;;  %5526 = vmatprep.mubr.bf16.mxu0 %v5290_v42  ;;  %v7197_v42 = vld [vmem:[%s10310_s7 + $0x1f0] sm:$0xff]  }
 0x5d6   : > { %6300 = vmatprep.subr.bf16.mxu0 %v7191_v10 }
 0x5d9   : > { %6301 = vmatpush3.bf16.msra.mxu0 %v7192_v45 }
 0x5da   : > { %6302 = vmatprep.subr.bf16.mxu0 %v7193_v41 }
 0x5dd   : > { %6303 = vmatpush3.bf16.msra.mxu0 %v7194_v24 }
 0x5de   : > { %6304 = vmatprep.subr.bf16.mxu0 %v7195_v29 }
 0x5e1   : > { %6305 = vmatpush3.bf16.msra.mxu0 %v7196_v59 }
 0x5e2   : > { %6306 = vmatprep.subr.bf16.mxu0 %v7197_v42 }
 0x5e5   : > { %6307 = vmatpush3.bf16.msra.mxu0 %v7198_v20 }
 0x5e6   : > { %6308 = vmatprep.subr.bf16.mxu0 %v7199_v37 }
 0x5e9   : > { %6309 = vmatpush3.bf16.msra.mxu0 %v7200_v63 }
 0x5ea   : > { %6430 = vmatprep.subr.bf16.mxu0 %v7201_v0 }
 0x5ec   : > { %5527 = vmatmul.mubr.bf16.vlgmr.msra.gmra.mrb[88].mxu0 %v9832_v34  ;;  %v5244_v34 = vrot.slane %v5206_v6, 1 }
 0x5ed   : > { %5534 = vmatprep.mubr.bf16.mxu0 %v5293_v58  ;;  %6431 = vmatpush3.bf16.msra.mxu0 %v7201_v0  ;;  %v7205_v58 = vld [vmem:[%s10310_s7 + $0x220] sm:$0xff]  }
 0x5ee   : > { %6432 = vmatprep.subr.bf16.mxu0 %v7202_v7  ;;  %v5245_v9 = vsel %vm979_vm6, %v4806_v31, %v5244_v34  ;;  %v7208_v31 = vld [vmem:[%s10310_s7 + $0x238] sm:$0xff]  }
 0x5ef   : > { %v5299_v30 = vpack.c.bf16 %v5248_v18, %v5245_v9 }
 0x5f1   : > { %6433 = vmatpush3.bf16.msra.mxu0 %v7202_v7 }
 0x5f2   : > { %6434 = vmatprep.subr.bf16.mxu0 %v7203_v54 }
 0x5f4   : > { %5535 = vmatmul.mubr.bf16.gmra.mrb[92].mxu0 %v9882_v36  ;;  %v7206_v36 = vld [vmem:[%s10310_s7 + $0x228] sm:$0xff]  }
 0x5f5   : > { %5542 = vmatprep.mubr.bf16.mxu0 %v5296_v12  ;;  %6435 = vmatpush3.bf16.msra.mxu0 %v7203_v54  ;;  %v5298_v12 = vpack.c.bf16 %v5207_v23, %v10093_v8 }
 0x5f6   : > { %6436 = vmatprep.subr.bf16.mxu0 %v7204_v19 }
 0x5f9   : > { %6437 = vmatpush3.bf16.msra.mxu0 %v7204_v19 }
 0x5fa   : > { %6438 = vmatprep.subr.bf16.mxu0 %v7205_v58 }
 0x5fc   : > { %5543 = vmatmul.mubr.bf16.gmra.mrb[96].mxu0 %v9936_v52  ;;  %v5276_v52 = vrot.slane %v5206_v6, 2 }
 0x5fd   : > { %5550 = vmatprep.mubr.bf16.mxu0 %v5299_v30  ;;  %6439 = vmatpush3.bf16.msra.mxu0 %v7205_v58 }
 0x5fe   : > { %6440 = vmatprep.subr.bf16.mxu0 %v7206_v36  ;;  %v5277_v47 = vsel %vm612_vm1, %v4838_v43, %v5276_v52 }
 0x5ff   : > { %v5300_v61 = vpack.c.bf16 %v5280_v15, %v5277_v47 }
 0x601   : > { %6441 = vmatpush3.bf16.msra.mxu0 %v7206_v36 }
 0x602   : > { %6442 = vmatprep.subr.bf16.mxu0 %v7207_v1 }
 0x604   : > { %5551 = vmatmul.mubr.bf16.gmra.mrb[100].mxu0 %v5298_v12 }
 0x605   : > { %6443 = vmatpush3.bf16.msra.mxu0 %v7207_v1  ;;  %6446 = vmatprep.mubr.bf16.mxu0 %v5291_v53 }
 0x606   : > { %6444 = vmatprep.subr.bf16.mxu0 %v7208_v31 }
 0x609   : > { %6445 = vmatpush3.bf16.msra.mxu0 %v7208_v31 }
 0x60c   : > { %6447 = vmatmul.mubr.bf16.vlgmr.msra.gmra.mrb[64].mxu0 %v5294_v21 }
 0x60d   : > { %6450 = vmatprep.mubr.bf16.mxu0 %v5297_v26 }
 0x614   : > { %6451 = vmatmul.mubr.bf16.gmra.mrb[68].mxu0 %v5300_v61 }
 0x63f   : > { %v6206_v53 = vpop.f32.mrb[48].mxu0 }
 0x640   : > { %v6207_v17 = vpop.f32.mrb[49].mxu0 }
 0x641   : > { %v6208_v16 = vadd.f32 %v6207_v17, %v6206_v53  ;;  %v6209_v13 = vpop.f32.mrb[50].mxu0 }
 0x642   : > { %v6210_v56 = vpop.f32.mrb[51].mxu0 }
 0x643   : > { %v6211_v3 = vadd.f32 %v6210_v56, %v6209_v13  ;;  %v6498_v60 = vadd.f32 %v6208_v16, %v5996_v4 }
 0x645   : > { %v6506_v45 = vadd.f32 %v6211_v3, %v5996_v4 }
 0x647   : > { %v6212_v46 = vpop.f32.mrb[52].mxu0 }
 0x648   : > { %v6213_v25 = vpop.f32.mrb[53].mxu0 }
 0x649   : > { %v6214_v21 = vadd.f32 %v6213_v25, %v6212_v46  ;;  %v6215_v27 = vpop.f32.mrb[54].mxu0 }
 0x64a   : > { %v6216_v2 = vpop.f32.mrb[55].mxu0 }
 0x64b   : > { %v6217_v50 = vadd.f32 %v6216_v2, %v6215_v27  ;;  %v6494_v20 = vadd.f32 %v6214_v21, %v5996_v4 }
 0x64d   : > { %v6502_v7 = vadd.f32 %v6217_v50, %v5996_v4 }
 0x64f   : > { %v6218_v26 = vpop.f32.mrb[56].mxu0 }
 0x650   : > { %v6219_v8 = vpop.f32.mrb[57].mxu0 }
 0x651   : > { %v6220_v33 = vadd.f32 %v6219_v8, %v6218_v26  ;;  %v6221_v32 = vpop.f32.mrb[58].mxu0 }
 0x652   : > { %v6222_v48 = vpop.f32.mrb[59].mxu0 }
 0x653   : > { %v6223_v5 = vadd.f32 %v6222_v48, %v6221_v32  ;;  %v6514_v34 = vadd.f32 %v6220_v33, %v5996_v4 }
 0x655   : > { %v6522_v9 = vadd.f32 %v6223_v5, %v5996_v4 }
 0x657   : > { %v6224_v40 = vpop.f32.mrb[60].mxu0 }
 0x658   : > { %v6225_v44 = vpop.f32.mrb[61].mxu0 }
 0x659   : > { %v6226_v39 = vadd.f32 %v6225_v44, %v6224_v40  ;;  %v6227_v43 = vpop.f32.mrb[62].mxu0 }
 0x65a   : > { %v6228_v35 = vpop.f32.mrb[63].mxu0 }
 0x65b   : > { %v6229_v11 = vadd.f32 %v6228_v35, %v6227_v43  ;;  %v6510_v31 = vadd.f32 %v6226_v39, %v5996_v4 }
 0x65d   : > { %v6518_v47 = vadd.f32 %v6229_v11, %v5996_v4 }
 0x67f   : > { %v6258_v62 = vpop.f32.mrb[72].mxu0 }
 0x680   : > { %v6259_v28 = vpop.f32.mrb[73].mxu0 }
 0x681   : > { %v6260_v51 = vadd.f32 %v6259_v28, %v6258_v62  ;;  %v6261_v49 = vpop.f32.mrb[74].mxu0 }
 0x682   : > { %v6262_v10 = vpop.f32.mrb[75].mxu0 }
 0x683   : > { %v6499_v41 = vadd.f32 %v6498_v60, %v6260_v51  ;;  %v6263_v24 = vadd.f32 %v6262_v10, %v6261_v49 }
 0x685   : > { %v6507_v29 = vadd.f32 %v6506_v45, %v6263_v24 }
 0x687   : > { %v6264_v59 = vpop.f32.mrb[76].mxu0 }
 0x688   : > { %v6265_v42 = vpop.f32.mrb[77].mxu0 }
 0x689   : > { %v6266_v37 = vadd.f32 %v6265_v42, %v6264_v59  ;;  %v6267_v63 = vpop.f32.mrb[78].mxu0 }
 0x68a   : > { %v6268_v0 = vpop.f32.mrb[79].mxu0 }
 0x68b   : > { %v6495_v54 = vadd.f32 %v6494_v20, %v6266_v37  ;;  %v6269_v6 = vadd.f32 %v6268_v0, %v6267_v63 }
 0x68d   : > { %v6503_v23 = vadd.f32 %v6502_v7, %v6269_v6 }
 0x68f   : > { %v6270_v55 = vpop.f32.mrb[80].mxu0 }
 0x690   : > { %v6271_v19 = vpop.f32.mrb[81].mxu0 }
 0x691   : > { %v6272_v14 = vadd.f32 %v6271_v19, %v6270_v55  ;;  %v6273_v22 = vpop.f32.mrb[82].mxu0 }
 0x692   : > { %v6274_v58 = vpop.f32.mrb[83].mxu0 }
 0x693   : > { %v6515_v18 = vadd.f32 %v6514_v34, %v6272_v14  ;;  %v6275_v36 = vadd.f32 %v6274_v58, %v6273_v22 }
 0x695   : > { %v6523_v30 = vadd.f32 %v6522_v9, %v6275_v36 }
 0x697   : > { %v6276_v1 = vpop.f32.mrb[84].mxu0 }
 0x698   : > { %v6277_v12 = vpop.f32.mrb[85].mxu0 }
 0x699   : > { %v6278_v52 = vadd.f32 %v6277_v12, %v6276_v1  ;;  %v6279_v57 = vpop.f32.mrb[86].mxu0 }
 0x69a   : > { %v6280_v38 = vpop.f32.mrb[87].mxu0 }
 0x69b   : > { %v6511_v15 = vadd.f32 %v6510_v31, %v6278_v52  ;;  %v6281_v61 = vadd.f32 %v6280_v38, %v6279_v57 }
 0x69d   : > { %v6519_v53 = vadd.f32 %v6518_v47, %v6281_v61 }
 0x6bf   : > { %v6310_v17 = vpop.f32.mrb[88].mxu0 }
 0x6c0   : > { %v6311_v16 = vpop.f32.mrb[89].mxu0 }
 0x6c1   : > { %v6312_v13 = vadd.f32 %v6311_v16, %v6310_v17  ;;  %v6313_v56 = vpop.f32.mrb[90].mxu0 }
 0x6c2   : > { %v6314_v3 = vpop.f32.mrb[91].mxu0 }
 0x6c3   : > { %v6315_v46 = vadd.f32 %v6314_v3, %v6313_v56  ;;  %v6500_v25 = vadd.f32 %v6499_v41, %v6312_v13 }
 0x6c5   : > { %v6508_v21 = vadd.f32 %v6507_v29, %v6315_v46 }
 0x6c7   : > { %v6316_v27 = vpop.f32.mrb[92].mxu0 }
 0x6c8   : > { %v6317_v2 = vpop.f32.mrb[93].mxu0 }
 0x6c9   : > { %v6318_v50 = vadd.f32 %v6317_v2, %v6316_v27  ;;  %v6319_v26 = vpop.f32.mrb[94].mxu0 }
 0x6ca   : > { %v6320_v8 = vpop.f32.mrb[95].mxu0 }
 0x6cb   : > { %v6321_v33 = vadd.f32 %v6320_v8, %v6319_v26  ;;  %v6496_v32 = vadd.f32 %v6495_v54, %v6318_v50 }
 0x6cd   : > { %v6504_v48 = vadd.f32 %v6503_v23, %v6321_v33 }
 0x6cf   : > { %v6322_v5 = vpop.f32.mrb[96].mxu0 }
 0x6d0   : > { %v6323_v40 = vpop.f32.mrb[97].mxu0 }
 0x6d1   : > { %v6324_v44 = vadd.f32 %v6323_v40, %v6322_v5  ;;  %v6325_v39 = vpop.f32.mrb[98].mxu0 }
 0x6d2   : > { %v6326_v43 = vpop.f32.mrb[99].mxu0 }
 0x6d3   : > { %v6327_v35 = vadd.f32 %v6326_v43, %v6325_v39  ;;  %v6516_v11 = vadd.f32 %v6515_v18, %v6324_v44 }
 0x6d5   : > { %v6524_v4 = vadd.f32 %v6523_v30, %v6327_v35 }
 0x6d7   : > { %v6328_v62 = vpop.f32.mrb[100].mxu0 }
 0x6d8   : > { %v6329_v28 = vpop.f32.mrb[101].mxu0 }
 0x6d9   : > { %v6330_v60 = vadd.f32 %v6329_v28, %v6328_v62  ;;  %v6331_v51 = vpop.f32.mrb[102].mxu0 }
 0x6da   : > { %v6332_v49 = vpop.f32.mrb[103].mxu0 }
 0x6db   : > { %v6333_v10 = vadd.f32 %v6332_v49, %v6331_v51  ;;  %v6512_v45 = vadd.f32 %v6511_v15, %v6330_v60 }
 0x6dd   : > { %v6520_v41 = vadd.f32 %v6519_v53, %v6333_v10 }
 0x6df   : > { %v6448_v24 = vpop.f32.mrb[64].mxu0 }
 0x6e0   : > { %v6497_v29 = vadd.f32 %v6496_v32, %v6448_v24  ;;  %v5593_v59 = vpop.f32.mrb[65].mxu0 }
 0x6e1   : > { %v6501_v42 = vadd.f32 %v6500_v25, %v5593_v59  ;;  %v6449_v20 = vpop.f32.mrb[66].mxu0 }
 0x6e2   : > { %v5634_v37 = vmax.f32 %v6497_v29, 0.0  ;;  %v6505_v63 = vadd.f32 %v6504_v48, %v6449_v20  ;;  %v5596_v0 = vpop.f32.mrb[67].mxu0 }
 0x6e3   : > { %v5632_v7 = vmax.f32 %v6501_v42, 0.0  ;;  %v6509_v54 = vadd.f32 %v6508_v21, %v5596_v0 }
 0x6e4   : > { %5642 = vst [vmem:[%s325_s14 + $0x10] sm:$0xff] %v5634_v37  ;;  %v5635_v6 = vmax.f32 %v6505_v63, 0.0 }
 0x6e5   : > { %5640 = vst [vmem:[%s325_s14] sm:$0xff] %v5632_v7  ;;  %v5633_v23 = vmax.f32 %v6509_v54, 0.0 }
 0x6e6   : > { %5643 = vst [vmem:[%s325_s14 + $0x18] sm:$0xff] %v5635_v6 }
 0x6e7   : > { %5641 = vst [vmem:[%s325_s14 + $0x8] sm:$0xff] %v5633_v23  ;;  %v6452_v55 = vpop.f32.mrb[68].mxu0 }
 0x6e8   : > { %v6513_v19 = vadd.f32 %v6512_v45, %v6452_v55  ;;  %v5609_v34 = vpop.f32.mrb[69].mxu0 }
 0x6e9   : > { %v6517_v14 = vadd.f32 %v6516_v11, %v5609_v34  ;;  %v6453_v22 = vpop.f32.mrb[70].mxu0 }
 0x6ea   : > { %v5638_v58 = vmax.f32 %v6513_v19, 0.0  ;;  %v6521_v9 = vadd.f32 %v6520_v41, %v6453_v22  ;;  %v5612_v18 = vpop.f32.mrb[71].mxu0 }
 0x6eb   : > { %v5636_v36 = vmax.f32 %v6517_v14, 0.0  ;;  %v6525_v30 = vadd.f32 %v6524_v4, %v5612_v18 }
 0x6ec   : > { %5646 = vst [vmem:[%s325_s14 + $0x30] sm:$0xff] %v5638_v58  ;;  %v5639_v1 = vmax.f32 %v6521_v9, 0.0 }
 0x6ed   : > { %5644 = vst [vmem:[%s325_s14 + $0x20] sm:$0xff] %v5636_v36  ;;  %v5637_v12 = vmax.f32 %v6525_v30, 0.0 }
 0x6ee   : > { %5647 = vst [vmem:[%s325_s14 + $0x38] sm:$0xff] %v5639_v1 }
 0x6ef   : > { %5645 = vst [vmem:[%s325_s14 + $0x28] sm:$0xff] %v5637_v12 }
 0x6f0   : > { %7263 = shalt.err (!%p7260_p3)
}
 0x6f1   : > { %s7264_s24 = scalar_lea.hbm %s10256_s29, 1024  ;;  %s7268_s26 = scalar_lea.hbm %s10312_s9, 2048 }
 0x6f2   : > { %p7265_p4 = scmp.ne.s32.totalorder %s10256_s29, %s7264_s24  ;;  %p7269_p9 = scmp.lt.u32.totalorder %s10256_s29, %s10312_s9 }
 0x6f3   : > { %p7270_p10 = scmp.lt.u32.totalorder %s7268_s26, %s7264_s24  ;;  %p7272_p12 = scmp.lt.u32.totalorder %s7264_s24, %s10256_s29 }
 0x6f4   : > { %p7266_p7 = pnand %p7265_p4, %p7409_p5 }
 0x6f5   : > { %p7271_p11 = por %p7270_p10, %p7269_p9 }
 0x6f6   : > { %p7267_p8 = pneg %p7266_p7 }
 0x6f7   : > { %p7273_p13 = por %p7272_p12, %p7271_p11 }
 0x6f9   : > { %p7274_p0 = pnand %p7273_p13, %p7267_p8 }
 0x6fb   : > { %7277 = shalt.err (!%p7274_p0)
}
 0x6fc   : > { %s7319_s17 = smov 128   ;;  %s7320_s21 = smov 8  }
 0x6fd   : > { %6702 = dma.vmem_to_hbm [thread:$0]  (%p7409_p5), %s10258_s27, 1024, %s10256_s29, %s10262_s13, %s7319_s17, %s7319_s17, %s7320_s21  }
 0x6fe PF: > { %p6708_p1 = scmp.ge.s32.totalorder %s7312_s12, 2  ;;  %s5677_s22 = sand.u32 1, %s7300_s30  }
 0x6ff   : > { %s5678_s23 = scalar_lea.sflag [#allocation7], %s5677_s22 }
 0x700   : > { %p6705_p2 = pnand %p6708_p1, %p7413_p6 }
 0x702   : > { %7295 = dma.done.wait (!%p6705_p2), %s5678_s23, 1024  }
 0x703   : > { %7297 = vsyncadd (!%p6705_p2), %s5678_s23, 4294966272  ;;  %p19_p3 = scmp.ge.s32.totalorder %s7396_s15, 4   ;;  %s10620_s30 = smov %s7304_s10 }
 0x704   : > { %s10621_s10 = smov %s7308_s11  ;;  %s10622_s11 = smov %s7407_s18 }
 0x705   : > { %s10623_s12 = smov %s7396_s15  ;;  %21 = sbr.rel (!%p19_p3) target bundleno = 3 (0x3), region = 121 }
 0x70c   :  { %5683 = vsyncpa [#allocation7], 1 }
 0x70d   :  { %5685 = vsyncpa [#allocation7 + $0x1], 1 }

</bundles_post_ra>
